<compile_context>
chip_gen: v5e
topology: v5e:2x2
jax: 0.10.0
libtpu: 0.0.40
codegen_flags: <defaults>
</compile_context>

<pallas_src>
import functools

import jax
import jax.numpy as jnp
import numpy as np
from jax.experimental import pallas as pl
from jax.experimental.pallas import tpu as pltpu

CONTENT_EMB_DIM = 32
N_SPEAKER = 5
SPEAKER_EMB_DIM = 96
DIM = SPEAKER_EMB_DIM + CONTENT_EMB_DIM   # 128
HID = 256
K = 3
HALO = 2                                  # receptive field halo of two chained k=3 convs
IND_ROWS = 16                             # indicator rows (>= K, bf16 sublane-pack aligned)
K1 = K * CONTENT_EMB_DIM + IND_ROWS       # layer-1 contraction depth = 112


def _round_up(x, m):
    return ((x + m - 1) // m) * m


def _cdiv(a, b):
    return (a + b - 1) // b


# -----------------------------------------------------------------------------
# Kernel
# -----------------------------------------------------------------------------
def _latent_kernel(L, TL,
                   cw_ref,               # [32, TL+4]   bf16 content window (zero-padded)
                   w1_ref,               # [512, 112]   bf16 per-batch layer-1 weight
                   w2_ref, b2_ref,       # [3,128,256] bf16, [128,1] f32 (conv branch L2)
                   w4_ref, b4_ref,       # [3,128,256] bf16, [128,1] f32 (gate branch L2)
                   out_ref):             # [128, TL]    output tile (NCL)
    t = pl.program_id(1)
    s = t * TL                  # first output column of this tile (global)
    TLH = TL + 2                # hidden width (positions s-1 .. s+TL)

    # --- layer 1: content taps stacked along K + speaker/bias indicator rows ----
    cw = cw_ref[...]                                                    # [32, TL+4]
    x_stk_c = jnp.concatenate(
        [cw[:, 0:TLH], cw[:, 1:TLH + 1], cw[:, 2:TLH + 2]], axis=0)     # [96, TLH]

    # Indicator row r (< K): 1 iff tap r of hidden column j reads a position in
    # [0, L).  It multiplies weight column 96+r = (W1_spk_r @ emb) (+ b1 on r=1),
    # so the speaker/bias contribution appears exactly where PyTorch's zero
    # padding allows it.  Rows K..15 multiply zero weight columns.
    pos_h = s - 1 + jax.lax.broadcasted_iota(jnp.int32, (IND_ROWS, TLH), 1)
    rows = jax.lax.broadcasted_iota(jnp.int32, (IND_ROWS, TLH), 0)
    pos_tap = pos_h + rows - 1
    ind = jnp.where(
        jnp.logical_and(rows < K,
                        jnp.logical_and(pos_tap >= 0, pos_tap < L)),
        1.0, 0.0).astype(jnp.bfloat16)                                  # [16, TLH]

    x_stk = jnp.concatenate([x_stk_c, ind], axis=0)                     # [112, TLH]
    pre = jnp.dot(w1_ref[...], x_stk,
                  preferred_element_type=jnp.float32)                   # [512, TLH]

    # Zero hidden positions outside [0, L): reproduces the zero padding the
    # second Conv1d sees in PyTorch (fused leaky-relu + mask + bf16 cast).
    in_seq_h = jnp.logical_and(pos_h[0:1] >= 0, pos_h[0:1] < L)         # [1, TLH]
    act = jnp.where(in_seq_h, jnp.maximum(pre, 0.2 * pre),
                    0.0).astype(jnp.bfloat16)                           # [512, TLH]
    h = act[0:HID, :]            # conv branch hidden [256, TLH]
    g = act[HID:2 * HID, :]      # gate branch hidden [256, TLH]

    # --- layer 2: per-tap matmuls (K=256 fills the MXU depth) --------------------
    acc_c = jnp.dot(w2_ref[0], h[:, 0:TL], preferred_element_type=jnp.float32)
    acc_g = jnp.dot(w4_ref[0], g[:, 0:TL], preferred_element_type=jnp.float32)
    for k in range(1, K):
        acc_c = acc_c + jnp.dot(w2_ref[k], h[:, k:k + TL],
                                preferred_element_type=jnp.float32)
        acc_g = acc_g + jnp.dot(w4_ref[k], g[:, k:k + TL],
                                preferred_element_type=jnp.float32)

    conv_out = acc_c + b2_ref[...]
    gate = jax.nn.sigmoid(acc_g + b4_ref[...])
    out_ref[...] = (gate * conv_out).astype(out_ref.dtype)


# -----------------------------------------------------------------------------
# Parameters
# -----------------------------------------------------------------------------
def init_params(key):
    """Deterministic synthetic parameters in PyTorch layout ([Cout, Cin, K])."""
    ks = jax.random.split(key, 8)

    def u(k, shape, fan_in):
        bound = 1.0 / np.sqrt(fan_in)
        return jax.random.uniform(k, shape, jnp.float32, -bound, bound)

    return {
        "emb_table": jax.random.normal(ks[0], (N_SPEAKER, SPEAKER_EMB_DIM),
                                       jnp.float32),
        "conv1_w": u(ks[1], (HID, DIM, K), DIM * K),
        "conv1_b": u(ks[2], (HID,), DIM * K),
        "conv2_w": u(ks[3], (DIM, HID, K), HID * K),
        "conv2_b": u(ks[4], (DIM,), HID * K),
        "gate1_w": u(ks[5], (HID, DIM, K), DIM * K),
        "gate1_b": u(ks[6], (HID,), DIM * K),
        "gate2_w": u(ks[7], (DIM, HID, K), HID * K),
        "gate2_b": jnp.full((DIM,), 2.0, jnp.float32),   # final_layer.bias.fill_(2.0)
    }


def pack_params(raw):
    """Pack PyTorch-layout params into the kernel's MXU-friendly layouts."""
    w1 = jnp.concatenate([raw["conv1_w"], raw["gate1_w"]], axis=0)      # [512, 128, 3]
    b1 = jnp.concatenate([raw["conv1_b"], raw["gate1_b"]])              # [512]
    w1_content = w1[:, :CONTENT_EMB_DIM, :]                             # [512, 32, 3]
    w1_speaker = w1[:, CONTENT_EMB_DIM:, :]                             # [512, 96, 3]
    # Tap-major content columns: [512, 96]
    w1c = jnp.concatenate([w1_content[:, :, k] for k in range(K)], axis=1)
    return {
        "emb_table": raw["emb_table"].astype(jnp.float32),              # [5, 96]
        "w1c": w1c.astype(jnp.bfloat16),                                # [512, 96]
        "w1s": w1_speaker.astype(jnp.float32),                          # [512, 96, 3]
        "b1": b1.astype(jnp.float32),                                   # [512]
        "w2": jnp.transpose(raw["conv2_w"], (2, 0, 1)).astype(jnp.bfloat16),  # [3,128,256]
        "b2": raw["conv2_b"].astype(jnp.float32)[:, None],                    # [128, 1]
        "w4": jnp.transpose(raw["gate2_w"], (2, 0, 1)).astype(jnp.bfloat16),
        "b4": raw["gate2_b"].astype(jnp.float32)[:, None],
    }


# -----------------------------------------------------------------------------
# Wrapper
# -----------------------------------------------------------------------------
def latent_embedding(content_emb, speaker, kparams, *,
                     tl_target=1024, out_dtype=jnp.float32):
    """content_emb: [B, 32, L] (NCL), speaker: [B] int -> [B, 128, L] (NCL)."""
    B, Cc, L = content_emb.shape
    assert Cc == CONTENT_EMB_DIM

    # Lane-dense output tile, forced to a multiple of 128.
    TL = max(128, _round_up(min(tl_target, L), 128))
    # v7x 2-TensorCore occupancy: with B == 1 make sure there are >= 2 L-tiles
    # whenever L allows it, so both "parallel" grid axes give each core work.
    if B == 1:
        TL = min(TL, max(128, _round_up(_cdiv(L, 2), 128)))
    assert TL % 128 == 0
    nT = _cdiv(L, TL)
    TLW = TL + 2 * HALO

    # --- per-batch layer-1 weight: content taps + speaker/bias columns ----------
    spk_vec = kparams["emb_table"][speaker.astype(jnp.int32)]            # [B, 96] f32
    sc = jnp.einsum("bs,osk->bok", spk_vec, kparams["w1s"],
                    precision=jax.lax.Precision.HIGHEST)                 # [B, 512, 3]
    sc = sc.at[:, :, 1].add(kparams["b1"])     # bias rides on the always-valid tap
    sc = jnp.pad(sc, ((0, 0), (0, 0), (0, IND_ROWS - K)))                # [B, 512, 16]
    w1x = jnp.concatenate(
        [jnp.broadcast_to(kparams["w1c"][None],
                          (B, 2 * HID, K * CONTENT_EMB_DIM)),
         sc.astype(jnp.bfloat16)], axis=2)                               # [B, 512, 112]

    # --- overlapping bf16 content windows with a 2-column halo -------------------
    # TODO(synk): replace this wrapper-side windowing pass with an in-kernel
    # halo DMA (memory_space=pl.ANY + pltpu.make_async_copy).
    xp = jnp.pad(content_emb.astype(jnp.bfloat16),
                 ((0, 0), (0, 0), (HALO, nT * TL - L + HALO)))           # [B, 32, nT*TL+4]
    starts = jnp.arange(nT, dtype=jnp.int32) * TL
    win_idx = starts[:, None] + jnp.arange(TLW, dtype=jnp.int32)[None, :]
    cw = jnp.transpose(jnp.take(xp, win_idx, axis=2), (0, 2, 1, 3))      # [B, nT, 32, TLW]

    kernel = functools.partial(_latent_kernel, L, TL)

    grid_spec = pltpu.PrefetchScalarGridSpec(
        num_scalar_prefetch=0,
        grid=(B, nT),
        in_specs=[
            pl.BlockSpec((None, None, CONTENT_EMB_DIM, TLW),
                         lambda b, t: (b, t, 0, 0)),
            pl.BlockSpec((None, 2 * HID, K1), lambda b, t: (b, 0, 0)),
            pl.BlockSpec((K, DIM, HID), lambda b, t: (0, 0, 0)),
            pl.BlockSpec((DIM, 1), lambda b, t: (0, 0)),
            pl.BlockSpec((K, DIM, HID), lambda b, t: (0, 0, 0)),
            pl.BlockSpec((DIM, 1), lambda b, t: (0, 0)),
        ],
        out_specs=pl.BlockSpec((None, DIM, TL), lambda b, t: (b, 0, t)),
    )

    # Output emitted directly at [B, 128, L]: the final L-tile is a partial
    # (masked) block, so there is no padded output allocation and no post-slice.
    return pl.pallas_call(
        kernel,
        out_shape=jax.ShapeDtypeStruct((B, DIM, L), out_dtype),
        grid_spec=grid_spec,
        compiler_params=pltpu.CompilerParams(
            dimension_semantics=("parallel", "parallel"),
            vmem_limit_bytes=32 * 1024 * 1024),
    )(cw, w1x, kparams["w2"], kparams["b2"], kparams["w4"], kparams["b4"])


# -----------------------------------------------------------------------------
# Pure-JAX f32 reference for validation
# -----------------------------------------------------------------------------
def _reference(content_emb, speaker, raw):
    B, _, L = content_emb.shape
    spk = raw["emb_table"][speaker]                                      # [B, 96]
    x = jnp.concatenate(
        [content_emb,
         jnp.broadcast_to(spk[:, :, None], (B, SPEAKER_EMB_DIM, L))],
        axis=1).astype(jnp.float32)                                      # [B, 128, L]

    def conv1d(v, w, b):
        y = jax.lax.conv_general_dilated(
            v, w, window_strides=(1,), padding=((1, 1),),
            dimension_numbers=("NCH", "OIH", "NCH"),
            precision=jax.lax.Precision.HIGHEST)
        return y + b[None, :, None]

    lrelu = lambda v: jnp.where(v > 0, v, 0.2 * v)
    conv = conv1d(lrelu(conv1d(x, raw["conv1_w"], raw["conv1_b"])),
                  raw["conv2_w"], raw["conv2_b"])
    gate = jax.nn.sigmoid(conv1d(lrelu(conv1d(x, raw["gate1_w"], raw["gate1_b"])),
                                 raw["gate2_w"], raw["gate2_b"]))
    return gate * conv


if __name__ == "__main__":
    key = jax.random.PRNGKey(0)
    k_param, k_x1, k_s1, k_x2, k_s2 = jax.random.split(key, 5)

    raw = init_params(k_param)
    kparams = pack_params(raw)

    # Test 1: small shapes, single (partial) L-tile.
    B, L = 2, 16
    content_emb = jax.random.normal(k_x1, (B, CONTENT_EMB_DIM, L), jnp.float32)
    speaker = jax.random.randint(k_s1, (B,), 0, N_SPEAKER)
    out = latent_embedding(content_emb, speaker, kparams)
    jax.block_until_ready(out)
    assert out.shape == (B, DIM, L)
    ref = _reference(content_emb, speaker, raw)
    # bf16 MXU operands (f32 accumulation) -> relaxed tolerance vs. f32 reference.
    np.testing.assert_allclose(np.asarray(out), np.asarray(ref),
                               rtol=3e-2, atol=3e-2)

    # Test 2: B=1 (v7x occupancy guard), multiple L-tiles with L % TL != 0
    # (exercises halo, boundary indicator columns and the partial final block).
    B2, L2 = 1, 200
    content2 = jax.random.normal(k_x2, (B2, CONTENT_EMB_DIM, L2), jnp.float32)
    speaker2 = jax.random.randint(k_s2, (B2,), 0, N_SPEAKER)
    out2 = latent_embedding(content2, speaker2, kparams)
    jax.block_until_ready(out2)
    assert out2.shape == (B2, DIM, L2)
    ref2 = _reference(content2, speaker2, raw)
    np.testing.assert_allclose(np.asarray(out2), np.asarray(ref2),
                               rtol=3e-2, atol=3e-2)

    print("KERNEL_OK")
</pallas_src>

<mosaic_0001>
module attributes {stable_mosaic.version = 11 : i64} {
  func.func @_latent_kernel(%arg0: i32, %arg1: i32, %arg2: memref<1x1x32x132xbf16, #tpu.memory_space<vmem>>, %arg3: memref<1x512x112xbf16, #tpu.memory_space<vmem>>, %arg4: memref<3x128x256xbf16, #tpu.memory_space<vmem>>, %arg5: memref<128x1xf32, #tpu.memory_space<vmem>>, %arg6: memref<3x128x256xbf16, #tpu.memory_space<vmem>>, %arg7: memref<128x1xf32, #tpu.memory_space<vmem>>, %arg8: memref<1x128x128xf32, #tpu.memory_space<vmem>>) attributes {dimension_semantics = [#tpu.dimension_semantics<parallel>, #tpu.dimension_semantics<parallel>], iteration_bounds = array<i64: 2, 1>, scalar_prefetch = 0 : i64, scratch_operands = 0 : i64, tpu.core_type = #tpu.core_type<tc>, window_params = [{transform_indices = @transform_0, window_bounds = array<i64: 1, 1, 32, 132>}, {transform_indices = @transform_1, window_bounds = array<i64: 1, 512, 112>}, {pipeline_mode = #tpu.pipeline_mode<synchronous>, transform_indices = @transform_2, window_bounds = array<i64: 3, 128, 256>}, {pipeline_mode = #tpu.pipeline_mode<synchronous>, transform_indices = @transform_3, window_bounds = array<i64: 128, 1>}, {pipeline_mode = #tpu.pipeline_mode<synchronous>, transform_indices = @transform_4, window_bounds = array<i64: 3, 128, 256>}, {pipeline_mode = #tpu.pipeline_mode<synchronous>, transform_indices = @transform_5, window_bounds = array<i64: 128, 1>}, {transform_indices = @transform_6, window_bounds = array<i64: 1, 128, 128>}]} {
    %c128_i32 = arith.constant 128 : i32
    %0 = arith.muli %arg1, %c128_i32 : i32
    %c0 = arith.constant 0 : index
    %c0_0 = arith.constant 0 : index
    %c0_1 = arith.constant 0 : index
    %c0_2 = arith.constant 0 : index
    %1 = vector.load %arg2[%c0, %c0_0, %c0_1, %c0_2] : memref<1x1x32x132xbf16, #tpu.memory_space<vmem>>, vector<1x1x32x132xbf16>
    %2 = vector.shape_cast %1 : vector<1x1x32x132xbf16> to vector<32x132xbf16>
    %3 = vector.extract_strided_slice %2 {offsets = [0, 0], sizes = [32, 130], strides = [1, 1]} : vector<32x132xbf16> to vector<32x130xbf16>
    %4 = vector.extract_strided_slice %2 {offsets = [0, 1], sizes = [32, 130], strides = [1, 1]} : vector<32x132xbf16> to vector<32x130xbf16>
    %5 = vector.extract_strided_slice %2 {offsets = [0, 2], sizes = [32, 130], strides = [1, 1]} : vector<32x132xbf16> to vector<32x130xbf16>
    %6 = tpu.concatenate %3, %4, %5 in 0 : vector<32x130xbf16>, vector<32x130xbf16>, vector<32x130xbf16> -> vector<96x130xbf16>
    %c1_i32 = arith.constant 1 : i32
    %7 = arith.subi %0, %c1_i32 : i32
    %8 = tpu.iota {dimensions = array<i32: 1>} : vector<16x130xi32>
    %9 = vector.broadcast %7 : i32 to vector<16x130xi32>
    %10 = arith.addi %9, %8 : vector<16x130xi32>
    %11 = tpu.iota {dimensions = array<i32: 0>} : vector<16x130xi32>
    %12 = arith.addi %10, %11 : vector<16x130xi32>
    %c1_i32_3 = arith.constant 1 : i32
    %13 = vector.broadcast %c1_i32_3 : i32 to vector<16x130xi32>
    %14 = arith.subi %12, %13 : vector<16x130xi32>
    %c3_i32 = arith.constant 3 : i32
    %15 = vector.broadcast %c3_i32 : i32 to vector<16x130xi32>
    %16 = arith.cmpi slt, %11, %15 : vector<16x130xi32>
    %c0_i32 = arith.constant 0 : i32
    %17 = vector.broadcast %c0_i32 : i32 to vector<16x130xi32>
    %18 = arith.cmpi sge, %14, %17 : vector<16x130xi32>
    %c16_i32 = arith.constant 16 : i32
    %19 = vector.broadcast %c16_i32 : i32 to vector<16x130xi32>
    %20 = arith.cmpi slt, %14, %19 : vector<16x130xi32>
    %21 = arith.andi %18, %20 : vector<16x130xi1>
    %22 = arith.andi %16, %21 : vector<16x130xi1>
    %cst = arith.constant 1.000000e+00 : f32
    %cst_4 = arith.constant 0.000000e+00 : f32
    %23 = vector.broadcast %cst : f32 to vector<16x130xf32>
    %24 = vector.broadcast %cst_4 : f32 to vector<16x130xf32>
    %25 = arith.select %22, %23, %24 : vector<16x130xi1>, vector<16x130xf32>
    %26 = arith.truncf %25 : vector<16x130xf32> to vector<16x130xbf16>
    %27 = tpu.concatenate %6, %26 in 0 : vector<96x130xbf16>, vector<16x130xbf16> -> vector<112x130xbf16>
    %c0_5 = arith.constant 0 : index
    %c0_6 = arith.constant 0 : index
    %c0_7 = arith.constant 0 : index
    %28 = vector.load %arg3[%c0_5, %c0_6, %c0_7] : memref<1x512x112xbf16, #tpu.memory_space<vmem>>, vector<1x512x112xbf16>
    %29 = vector.shape_cast %28 : vector<1x512x112xbf16> to vector<512x112xbf16>
    %cst_8 = arith.constant dense<0.000000e+00> : vector<512x130xf32>
    %30 = tpu.matmul %29, %27, %cst_8 {dimension_numbers = #tpu.dot_dimension_numbers<[1], [0], [0], [1], [0, 0, 1, 1], [], []>} : vector<512x112xbf16>, vector<112x130xbf16>, vector<512x130xf32> -> vector<512x130xf32>
    %31 = vector.extract_strided_slice %10 {offsets = [0, 0], sizes = [1, 130], strides = [1, 1]} : vector<16x130xi32> to vector<1x130xi32>
    %c0_i32_9 = arith.constant 0 : i32
    %32 = vector.broadcast %c0_i32_9 : i32 to vector<1x130xi32>
    %33 = arith.cmpi sge, %31, %32 : vector<1x130xi32>
    %34 = vector.extract_strided_slice %10 {offsets = [0, 0], sizes = [1, 130], strides = [1, 1]} : vector<16x130xi32> to vector<1x130xi32>
    %c16_i32_10 = arith.constant 16 : i32
    %35 = vector.broadcast %c16_i32_10 : i32 to vector<1x130xi32>
    %36 = arith.cmpi slt, %34, %35 : vector<1x130xi32>
    %37 = arith.andi %33, %36 : vector<1x130xi1>
    %cst_11 = arith.constant 2.000000e-01 : f32
    %38 = vector.broadcast %cst_11 : f32 to vector<512x130xf32>
    %39 = arith.mulf %38, %30 : vector<512x130xf32>
    %40 = arith.maximumf %30, %39 : vector<512x130xf32>
    %cst_12 = arith.constant 0.000000e+00 : f32
    %41 = vector.shape_cast %37 : vector<1x130xi1> to vector<1x130xi1>
    %42 = vector.broadcast %41 : vector<1x130xi1> to vector<512x130xi1>
    %43 = vector.broadcast %cst_12 : f32 to vector<512x130xf32>
    %44 = arith.select %42, %40, %43 : vector<512x130xi1>, vector<512x130xf32>
    %45 = arith.truncf %44 : vector<512x130xf32> to vector<512x130xbf16>
    %46 = vector.extract_strided_slice %45 {offsets = [0, 0], sizes = [256, 130], strides = [1, 1]} : vector<512x130xbf16> to vector<256x130xbf16>
    %47 = vector.extract_strided_slice %45 {offsets = [256, 0], sizes = [256, 130], strides = [1, 1]} : vector<512x130xbf16> to vector<256x130xbf16>
    %c0_13 = arith.constant 0 : index
    %c0_14 = arith.constant 0 : index
    %c0_15 = arith.constant 0 : index
    %48 = vector.load %arg4[%c0_13, %c0_14, %c0_15] : memref<3x128x256xbf16, #tpu.memory_space<vmem>>, vector<1x128x256xbf16>
    %49 = vector.shape_cast %48 : vector<1x128x256xbf16> to vector<128x256xbf16>
    %50 = vector.extract_strided_slice %46 {offsets = [0, 0], sizes = [256, 128], strides = [1, 1]} : vector<256x130xbf16> to vector<256x128xbf16>
    %cst_16 = arith.constant dense<0.000000e+00> : vector<128x128xf32>
    %51 = tpu.matmul %49, %50, %cst_16 {dimension_numbers = #tpu.dot_dimension_numbers<[1], [0], [0], [1], [0, 0, 1, 1], [], []>} : vector<128x256xbf16>, vector<256x128xbf16>, vector<128x128xf32> -> vector<128x128xf32>
    %c0_17 = arith.constant 0 : index
    %c0_18 = arith.constant 0 : index
    %c0_19 = arith.constant 0 : index
    %52 = vector.load %arg6[%c0_17, %c0_18, %c0_19] : memref<3x128x256xbf16, #tpu.memory_space<vmem>>, vector<1x128x256xbf16>
    %53 = vector.shape_cast %52 : vector<1x128x256xbf16> to vector<128x256xbf16>
    %54 = vector.extract_strided_slice %47 {offsets = [0, 0], sizes = [256, 128], strides = [1, 1]} : vector<256x130xbf16> to vector<256x128xbf16>
    %cst_20 = arith.constant dense<0.000000e+00> : vector<128x128xf32>
    %55 = tpu.matmul %53, %54, %cst_20 {dimension_numbers = #tpu.dot_dimension_numbers<[1], [0], [0], [1], [0, 0, 1, 1], [], []>} : vector<128x256xbf16>, vector<256x128xbf16>, vector<128x128xf32> -> vector<128x128xf32>
    %c1 = arith.constant 1 : index
    %c0_21 = arith.constant 0 : index
    %c0_22 = arith.constant 0 : index
    %56 = vector.load %arg4[%c1, %c0_21, %c0_22] : memref<3x128x256xbf16, #tpu.memory_space<vmem>>, vector<1x128x256xbf16>
    %57 = vector.shape_cast %56 : vector<1x128x256xbf16> to vector<128x256xbf16>
    %58 = vector.extract_strided_slice %46 {offsets = [0, 1], sizes = [256, 128], strides = [1, 1]} : vector<256x130xbf16> to vector<256x128xbf16>
    %cst_23 = arith.constant dense<0.000000e+00> : vector<128x128xf32>
    %59 = tpu.matmul %57, %58, %cst_23 {dimension_numbers = #tpu.dot_dimension_numbers<[1], [0], [0], [1], [0, 0, 1, 1], [], []>} : vector<128x256xbf16>, vector<256x128xbf16>, vector<128x128xf32> -> vector<128x128xf32>
    %60 = arith.addf %51, %59 : vector<128x128xf32>
    %c1_24 = arith.constant 1 : index
    %c0_25 = arith.constant 0 : index
    %c0_26 = arith.constant 0 : index
    %61 = vector.load %arg6[%c1_24, %c0_25, %c0_26] : memref<3x128x256xbf16, #tpu.memory_space<vmem>>, vector<1x128x256xbf16>
    %62 = vector.shape_cast %61 : vector<1x128x256xbf16> to vector<128x256xbf16>
    %63 = vector.extract_strided_slice %47 {offsets = [0, 1], sizes = [256, 128], strides = [1, 1]} : vector<256x130xbf16> to vector<256x128xbf16>
    %cst_27 = arith.constant dense<0.000000e+00> : vector<128x128xf32>
    %64 = tpu.matmul %62, %63, %cst_27 {dimension_numbers = #tpu.dot_dimension_numbers<[1], [0], [0], [1], [0, 0, 1, 1], [], []>} : vector<128x256xbf16>, vector<256x128xbf16>, vector<128x128xf32> -> vector<128x128xf32>
    %65 = arith.addf %55, %64 : vector<128x128xf32>
    %c2 = arith.constant 2 : index
    %c0_28 = arith.constant 0 : index
    %c0_29 = arith.constant 0 : index
    %66 = vector.load %arg4[%c2, %c0_28, %c0_29] : memref<3x128x256xbf16, #tpu.memory_space<vmem>>, vector<1x128x256xbf16>
    %67 = vector.shape_cast %66 : vector<1x128x256xbf16> to vector<128x256xbf16>
    %68 = vector.extract_strided_slice %46 {offsets = [0, 2], sizes = [256, 128], strides = [1, 1]} : vector<256x130xbf16> to vector<256x128xbf16>
    %cst_30 = arith.constant dense<0.000000e+00> : vector<128x128xf32>
    %69 = tpu.matmul %67, %68, %cst_30 {dimension_numbers = #tpu.dot_dimension_numbers<[1], [0], [0], [1], [0, 0, 1, 1], [], []>} : vector<128x256xbf16>, vector<256x128xbf16>, vector<128x128xf32> -> vector<128x128xf32>
    %70 = arith.addf %60, %69 : vector<128x128xf32>
    %c2_31 = arith.constant 2 : index
    %c0_32 = arith.constant 0 : index
    %c0_33 = arith.constant 0 : index
    %71 = vector.load %arg6[%c2_31, %c0_32, %c0_33] : memref<3x128x256xbf16, #tpu.memory_space<vmem>>, vector<1x128x256xbf16>
    %72 = vector.shape_cast %71 : vector<1x128x256xbf16> to vector<128x256xbf16>
    %73 = vector.extract_strided_slice %47 {offsets = [0, 2], sizes = [256, 128], strides = [1, 1]} : vector<256x130xbf16> to vector<256x128xbf16>
    %cst_34 = arith.constant dense<0.000000e+00> : vector<128x128xf32>
    %74 = tpu.matmul %72, %73, %cst_34 {dimension_numbers = #tpu.dot_dimension_numbers<[1], [0], [0], [1], [0, 0, 1, 1], [], []>} : vector<128x256xbf16>, vector<256x128xbf16>, vector<128x128xf32> -> vector<128x128xf32>
    %75 = arith.addf %65, %74 : vector<128x128xf32>
    %c0_35 = arith.constant 0 : index
    %c0_36 = arith.constant 0 : index
    %76 = vector.load %arg5[%c0_35, %c0_36] : memref<128x1xf32, #tpu.memory_space<vmem>>, vector<128x1xf32>
    %77 = vector.broadcast %76 : vector<128x1xf32> to vector<128x128xf32>
    %78 = arith.addf %70, %77 : vector<128x128xf32>
    %c0_37 = arith.constant 0 : index
    %c0_38 = arith.constant 0 : index
    %79 = vector.load %arg7[%c0_37, %c0_38] : memref<128x1xf32, #tpu.memory_space<vmem>>, vector<128x1xf32>
    %80 = vector.broadcast %79 : vector<128x1xf32> to vector<128x128xf32>
    %81 = arith.addf %75, %80 : vector<128x128xf32>
    %82 = arith.negf %81 : vector<128x128xf32>
    %83 = math.exp %82 : vector<128x128xf32>
    %cst_39 = arith.constant 1.000000e+00 : f32
    %84 = vector.broadcast %cst_39 : f32 to vector<128x128xf32>
    %85 = arith.addf %84, %83 : vector<128x128xf32>
    %86 = arith.divf %84, %85 : vector<128x128xf32>
    %87 = arith.mulf %86, %78 : vector<128x128xf32>
    %c0_40 = arith.constant 0 : index
    %c0_41 = arith.constant 0 : index
    %c0_42 = arith.constant 0 : index
    %88 = vector.load %arg8[%c0_40, %c0_41, %c0_42] : memref<1x128x128xf32, #tpu.memory_space<vmem>>, vector<1x128x128xf32>
    %89 = vector.shape_cast %88 : vector<1x128x128xf32> to vector<128x128xf32>
    %90 = vector.shape_cast %87 : vector<128x128xf32> to vector<1x128x128xf32>
    tpu.vector_store %arg8[%c0_40, %c0_41, %c0_42], %90 {strides = array<i32>} : memref<1x128x128xf32, #tpu.memory_space<vmem>>, vector<1x128x128xf32>,
    return
  }
  func.func @transform_0(%arg0: i32, %arg1: i32) -> (i32, i32, i32, i32) {
    %c0_i32 = arith.constant 0 : i32
    %c0_i32_0 = arith.constant 0 : i32
    %c0_i32_1 = arith.constant 0 : i32
    return %arg0, %arg1, %c0_i32, %c0_i32_0 : i32, i32, i32, i32
  }
  func.func @transform_1(%arg0: i32, %arg1: i32) -> (i32, i32, i32) {
    %c0_i32 = arith.constant 0 : i32
    %c0_i32_0 = arith.constant 0 : i32
    %c0_i32_1 = arith.constant 0 : i32
    return %arg0, %c0_i32, %c0_i32_0 : i32, i32, i32
  }
  func.func @transform_2(%arg0: i32, %arg1: i32) -> (i32, i32, i32) {
    %c0_i32 = arith.constant 0 : i32
    %c0_i32_0 = arith.constant 0 : i32
    %c0_i32_1 = arith.constant 0 : i32
    %c0_i32_2 = arith.constant 0 : i32
    return %c0_i32, %c0_i32_0, %c0_i32_1 : i32, i32, i32
  }
  func.func @transform_3(%arg0: i32, %arg1: i32) -> (i32, i32) {
    %c0_i32 = arith.constant 0 : i32
    %c0_i32_0 = arith.constant 0 : i32
    %c0_i32_1 = arith.constant 0 : i32
    return %c0_i32, %c0_i32_0 : i32, i32
  }
  func.func @transform_4(%arg0: i32, %arg1: i32) -> (i32, i32, i32) {
    %c0_i32 = arith.constant 0 : i32
    %c0_i32_0 = arith.constant 0 : i32
    %c0_i32_1 = arith.constant 0 : i32
    %c0_i32_2 = arith.constant 0 : i32
    return %c0_i32, %c0_i32_0, %c0_i32_1 : i32, i32, i32
  }
  func.func @transform_5(%arg0: i32, %arg1: i32) -> (i32, i32) {
    %c0_i32 = arith.constant 0 : i32
    %c0_i32_0 = arith.constant 0 : i32
    %c0_i32_1 = arith.constant 0 : i32
    return %c0_i32, %c0_i32_0 : i32, i32
  }
  func.func @transform_6(%arg0: i32, %arg1: i32) -> (i32, i32, i32) {
    %c0_i32 = arith.constant 0 : i32
    %c0_i32_0 = arith.constant 0 : i32
    return %arg0, %c0_i32, %arg1 : i32, i32, i32
  }
}

</mosaic_0001>

<bundles_post_ra>
// kernel: tpu_custom_call.1
= control target key start
LH: loop header
LB: loop body
LE: loop exit
PB: predicated region body
PF: predicated region fallthrough
CT: control target
= control target key end

     0   :  { %s5045_s21 = smov 0   ;;  %s5047_s22 = smov 0   ;;  %s6929_s0 = inlined_call_operand.vmem [shape: bf16[2,1,32,132], index: 0, kind: input, shape index: {}]   ;;  %s6930_s1 = inlined_call_operand.vmem [shape: bf16[2,512,112], index: 1, kind: input, shape index: {}]   ;;  %s6931_s2 = inlined_call_operand.vmem [shape: bf16[3,128,256], index: 2, kind: input, shape index: {}]   ;;  %s6932_s3 = inlined_call_operand.vmem [shape: f32[128,1], index: 3, kind: input, shape index: {}]   ;;  %s6933_s4 = inlined_call_operand.vmem [shape: bf16[3,128,256], index: 4, kind: input, shape index: {}]   ;;  %s6934_s5 = inlined_call_operand.vmem [shape: f32[128,1], index: 5, kind: input, shape index: {}]   ;;  %s6935_s6 = inlined_call_operand.vmem [shape: f32[2,128,16], index: 6, kind: output, shape index: {}]  }
   0x1   :  { %s5049_s23 = smov 0  }
   0x2 LB: > { %s28_s24 = sadd.s32 1, %s4999_s22  ;;  %p4065_p0 = scmp.ge.s32.totalorder %s5003_s23, 1  ;;  %s5003_s23 = sphi %s5049_s23, %s16_s23   ;;  %s4999_s22 = sphi %s5047_s22, %s7021_s22   ;;  %s4995_s21 = sphi %s5045_s21, %s7020_s21  }
   0x3   : > { %p30_p1 = scmp.ge.s32.totalorder %s28_s24, 2  ;;  %p242_p2 = scmp.lt.s32.totalorder %s5003_s23, 3 }
   0x5   : > { %s7023_s24 = smov (%p30_p1, %s28_s24), 0  ;;  %p243_p3 = pnand %p4065_p0, %p242_p2 }
   0x7   : > { %246 = sbr.rel (%p243_p3) target bundleno = 1510 (0x5e6), region = 44 }
   0xc   : > { %p284_p4 = scmp.lt.s32.totalorder %s4995_s21, 1  ;;  %s5005_s29 = smov 126   ;;  %v363_v12 = vlaneseq  ;;  %v5007_v22 = vmov 0.0   ;;  %v5008_v26 = vmov 0.0|0.0   ;;  %vm355_vm9 = vcmask 1031168  }
   0xd   : > { %s5006_s30 = smov 127   ;;  %v409_v27 = vunpack.c.h.b16 %v5008_v26  ;;  %v408_v28 = vunpack.c.l.b16 %v5008_v26  ;;  %vm340_vm10 = vcmask 1039360   ;;  %vm638_vm11 = vcmask 916480   ;;  %v4366_v58 = vld [vmem:[%s6931_s2] sm:$0xf] }
   0xe   : > { %s7025_s21 = smov (!%p284_p4, %s4995_s21), 1  ;;  %v364_v13 = vand.u32 127, %v363_v12  ;;  %v370_v17 = vshrl.u32 %v363_v12, 7 }
   0xf   : > { %s4750_s25 = sshll.u32 %s7025_s21, 5  ;;  %s4751_s7 = sshll.u32 %s7025_s21, 8 }
  0x10   : > { %s292_s28 = scalar_lea.vmem %s6929_s0, %s4750_s25  ;;  %v365_v14 = vadd.s32 128, %v364_v13  ;;  %v5089_v15 = vadd.s32 4294967295, %v364_v13  ;;  %vm380_vm4 = vcmp.lt.s32.totalorder %v370_v17, 3  ;;  %s5100_s10 = scalar_lea.vmem %s6930_s1, %s4751_s7 }
  0x11   : > { %v4082_v0 = vld [vmem:[%s292_s28 + $0x10] sm:$0xf]  ;;  %v4756_v1 = vld [vmem:[%s292_s28 + $0x14] sm:$0xf0]  ;;  %v4074_v3 = vld [vmem:[%s292_s28] sm:$0xf] }
  0x12   : > { %v5069_v2 = vor.u32 %v4756_v1, %v4082_v0  ;;  %v4754_v4 = vld [vmem:[%s292_s28 + $0x4] sm:$0xf0]  ;;  %v4755_v6 = vld [vmem:[%s292_s28 + $0x14] sm:$0xf]  ;;  %v4084_v7 = vld [vmem:[%s292_s28 + $0x18] sm:$0xf0]  ;;  %v372_v18 = vadd.s32 %v370_v17, %v5089_v15 }
  0x13   : > { %v5071_v5 = vor.u32 %v4754_v4, %v4074_v3  ;;  %v4753_v8 = vld [vmem:[%s292_s28 + $0x4] sm:$0xf]  ;;  %v4076_v9 = vld [vmem:[%s292_s28 + $0x8] sm:$0xf0]  ;;  %v4087_v10 = vor.u32 %v4755_v6, %v4084_v7  ;;  %v368_v16 = vadd.s32 4294967295, %v365_v14  ;;  %v4759_v47 = vld [vmem:[%s5100_s10 + $0x10] sm:$0xff] }
  0x14   : > { %351 = vrot.lane.b32.xlu0 %v5069_v2, %s5005_s29  ;;  %336 = vrot.lane.b32.xlu2 %v5069_v2, %s5006_s30  ;;  %v5079_v11 = vor.u32 %v4753_v8, %v4076_v9  ;;  %v4088_v20 = vadd.s32 4294967295, %v372_v18  ;;  %v4757_v45 = vld [vmem:[%s5100_s10] sm:$0xff]  ;;  %v4758_v46 = vld [vmem:[%s5100_s10 + $0x8] sm:$0xff]  ;;  %vm1073_vm12 = vcmp.ge.s32.totalorder %v5089_v15, 0  ;;  %vm1075_vm13 = vcmp.lt.s32.totalorder %v5089_v15, 16 }
  0x15   : > { %347 = vrot.lane.b32.xlu1 %v5071_v5, %s5005_s29  ;;  %v373_v19 = vadd.s32 %v370_v17, %v368_v16  ;;  %v4760_v48 = vld [vmem:[%s5100_s10 + $0x18] sm:$0xff]  ;;  %v4761_v49 = vld [vmem:[%s5100_s10 + $0x20] sm:$0xff]  ;;  %v4762_v50 = vld [vmem:[%s5100_s10 + $0x28] sm:$0xff] }
  0x16   : > { %vm382_vm0 = vcmp.ge.s32.totalorder %v4088_v20, 0  ;;  %vm386_vm2 = vcmp.lt.s32.totalorder %v4088_v20, 16  ;;  %v4763_v51 = vld [vmem:[%s5100_s10 + $0x30] sm:$0xff]  ;;  %v4764_v52 = vld [vmem:[%s5100_s10 + $0x38] sm:$0xff]  ;;  %v4765_v53 = vld [vmem:[%s5100_s10 + $0x40] sm:$0xff] }
  0x17   : > { %v4089_v21 = vadd.s32 4294967295, %v373_v19  ;;  %vm390_vm5 = vmand %vm382_vm0, %vm386_vm2  ;;  %v4766_v3 = vld [vmem:[%s5100_s10 + $0x48] sm:$0xff] }
  0x18   : > { %vm394_vm7 = vmand %vm380_vm4, %vm390_vm5 }
  0x19   : > { %vm383_vm1 = vcmp.ge.s32.totalorder %v4089_v21, 0  ;;  %vm387_vm3 = vcmp.lt.s32.totalorder %v4089_v21, 16  ;;  %v398_v23 = vsel %vm394_vm7, 1.0, %v5007_v22  ;;  %vm5134_vm14 = vmand %vm1073_vm12, %vm1075_vm13 }
  0x1a   : > { %vm391_vm6 = vmand %vm383_vm1, %vm387_vm3 }
  0x1b   : > { %vm395_vm8 = vmand %vm380_vm4, %vm391_vm6 }
  0x1c   : > { %353 = vrot.lane.b32.xlu0 %v4087_v10, %s5005_s29  ;;  %338 = vrot.lane.b32.xlu2 %v4087_v10, %s5006_s30  ;;  %v399_v24 = vsel %vm395_vm8, 1.0, %v5007_v22  ;;  %v4767_v22 = vld [vmem:[%s5100_s10 + $0x50] sm:$0xff] }
  0x1d   : > { %349 = vrot.lane.b32.xlu1 %v5079_v11, %s5005_s29  ;;  %v402_v25 = vpack.c.bf16 %v399_v24, %v398_v23 }
  0x1f   : > { %v407_v29 = vunpack.c.h.b16 %v402_v25  ;;  %v406_v30 = vunpack.c.l.b16 %v402_v25 }
  0x21   : > { %v411_v31 = vpack.c.b16 %v409_v27, %v407_v29  ;;  %v410_v32 = vpack.c.b16 %v408_v28, %v406_v30 }
  0x23   : > { %905 = vmatpush.bf16.msra.mxu1 %v411_v31  ;;  %736 = vmatpush.bf16.msra.mxu0 %v410_v32 }
  0x24   : > { %332 = vrot.lane.b32.xlu0 %v5071_v5, %s5006_s30 }
  0x25   : > { %334 = vrot.lane.b32.xlu1 %v5079_v11, %s5006_s30 }
  0x6e   : > { %v337_v35 = vpop.permute.xlu2 %336 }
  0x76   : > { %v339_v40 = vpop.permute.xlu2 %338 }
  0x77   : > { %v342_v42 = vsel %vm340_vm10, %v337_v35, %v339_v40 }
  0x86   : > { %v352_v33 = vpop.permute.xlu0 %351 }
  0x87   : > { %v348_v34 = vpop.permute.xlu1 %347 }
  0x8e   : > { %v354_v36 = vpop.permute.xlu0 %353 }
  0x8f   : > { %v350_v37 = vpop.permute.xlu1 %349  ;;  %906 = vmatpush.bf16.msra.mxu1 %v354_v36  ;;  %v357_v38 = vsel %vm355_vm9, %v352_v33, %v354_v36 }
  0x90   : > { %737 = vmatpush.bf16.msra.mxu0 %v357_v38  ;;  %v356_v39 = vsel %vm355_vm9, %v348_v34, %v350_v37 }
  0x93   : > { %907 = vmatpush.bf16.msra.mxu1 %v350_v37 }
  0x94   : > { %738 = vmatpush.bf16.msra.mxu0 %v356_v39 }
  0x96   : > { %v333_v41 = vpop.permute.xlu0 %332 }
  0x97   : > { %908 = vmatpush.bf16.msra.mxu1 %v339_v40  ;;  %v335_v43 = vpop.permute.xlu1 %334 }
  0x98   : > { %739 = vmatpush.bf16.msra.mxu0 %v342_v42  ;;  %v341_v44 = vsel %vm340_vm10, %v333_v41, %v335_v43  ;;  %v4768_v41 = vld [vmem:[%s5100_s10 + $0x58] sm:$0xff] }
  0x9b   : > { %909 = vmatpush.bf16.msra.mxu1 %v335_v43 }
  0x9c   : > { %740 = vmatpush.bf16.msra.mxu0 %v341_v44 }
  0x9f   : > { %910 = vmatpush.bf16.msra.mxu1 %v4087_v10 }
  0xa0   : > { %741 = vmatpush.bf16.msra.mxu0 %v5069_v2 }
  0xa3   : > { %911 = vmatpush.bf16.msra.mxu1 %v5079_v11 }
  0xa4   : > { %742 = vmatpush.bf16.msra.mxu0 %v5071_v5 }
  0xa6   : > { %4252 = vmatmul.msk.bf16.vlgmr.msra.gmra.mxu1 %vm638_vm11, %v4757_v45 }
  0xa7   : > { %4220 = vmatmul.msk.bf16.vlgmr.msra.gmra.mxu0 %vm638_vm11, %v4757_v45 }
  0xb6   : > { %4253 = vmatmul.msk.bf16.gmra.mxu1 %vm638_vm11, %v4758_v46 }
  0xb7   : > { %4221 = vmatmul.msk.bf16.gmra.mxu0 %vm638_vm11, %v4758_v46 }
  0xc6   : > { %4254 = vmatmul.msk.bf16.gmra.mxu1 %vm638_vm11, %v4759_v47 }
  0xc7   : > { %4222 = vmatmul.msk.bf16.gmra.mxu0 %vm638_vm11, %v4759_v47 }
  0xd6   : > { %4255 = vmatmul.msk.bf16.gmra.mxu1 %vm638_vm11, %v4760_v48 }
  0xd7   : > { %4223 = vmatmul.msk.bf16.gmra.mxu0 %vm638_vm11, %v4760_v48 }
  0xe6   : > { %4256 = vmatmul.msk.bf16.gmra.mxu1 %vm638_vm11, %v4761_v49 }
  0xe7   : > { %4224 = vmatmul.msk.bf16.gmra.mxu0 %vm638_vm11, %v4761_v49 }
  0xf6   : > { %4257 = vmatmul.msk.bf16.gmra.mxu1 %vm638_vm11, %v4762_v50 }
  0xf7   : > { %4225 = vmatmul.msk.bf16.gmra.mxu0 %vm638_vm11, %v4762_v50 }
 0x106   : > { %4258 = vmatmul.msk.bf16.gmra.mxu1 %vm638_vm11, %v4763_v51 }
 0x107   : > { %4226 = vmatmul.msk.bf16.gmra.mxu0 %vm638_vm11, %v4763_v51 }
 0x116   : > { %4259 = vmatmul.msk.bf16.gmra.mxu1 %vm638_vm11, %v4764_v52 }
 0x117   : > { %4227 = vmatmul.msk.bf16.gmra.mxu0 %vm638_vm11, %v4764_v52 }
 0x123   : > { %v913_v54 = vpop.f32.mrf.mxu1 }
 0x124   : > { %v744_v55 = vpop.f32.mrf.mxu0 }
 0x125   : > { %v1079_v56 = vmul.f32 0.2, %v744_v55 }
 0x126   : > { %4260 = vmatmul.msk.bf16.gmra.mxu1 %vm638_vm11, %v4765_v53 }
 0x127   : > { %4228 = vmatmul.msk.bf16.gmra.mxu0 %vm638_vm11, %v4765_v53  ;;  %v1207_v57 = vmax.f32 %v744_v55, %v1079_v56 }
 0x129   : > { %v1339_v61 = vsel %vm5134_vm14, %v1207_v57, 0.0 }
 0x12a   : > { %v1467_v0 = vpack.c.bf16 0.0, %v1339_v61  ;;  %v4769_v61 = vld [vmem:[%s5100_s10 + $0x60] sm:$0xff] }
 0x12b   : > { %v915_v59 = vpop.f32.mrf.mxu1 }
 0x12c   : > { %v746_v60 = vpop.f32.mrf.mxu0  ;;  %v1692_v6 = vunpack.c.l.b16 %v1467_v0  ;;  %v1693_v8 = vunpack.c.h.b16 %v1467_v0 }
 0x12d   : > { %v1081_v62 = vmul.f32 0.2, %v746_v60 }
 0x12f   : > { %v1209_v63 = vmax.f32 %v746_v60, %v1081_v62 }
 0x131   : > { %v1341_v1 = vsel %vm5134_vm14, %v1209_v63, 0.0 }
 0x132   : > { %v1468_v2 = vpack.c.bf16 0.0, %v1341_v1 }
 0x133   : > { %v918_v4 = vpop.f32.mrf.mxu1 }
 0x134   : > { %v749_v5 = vpop.f32.mrf.mxu0  ;;  %v1694_v7 = vunpack.c.l.b16 %v1468_v2  ;;  %v1695_v9 = vunpack.c.h.b16 %v1468_v2 }
 0x135   : > { %v1083_v10 = vmul.f32 0.2, %v749_v5 }
 0x136   : > { %v5143_v11 = vpack.c.b16 %v1694_v7, %v1692_v6  ;;  %v5145_v12 = vpack.c.b16 %v1695_v9, %v1693_v8  ;;  %4261 = vmatmul.msk.bf16.gmra.mxu1 %vm638_vm11, %v4766_v3 }
 0x137   : > { %4229 = vmatmul.msk.bf16.gmra.mxu0 %vm638_vm11, %v4766_v3  ;;  %v1211_v13 = vmax.f32 %v749_v5, %v1083_v10 }
 0x139   : > { %v1343_v16 = vsel %vm5134_vm14, %v1211_v13, 0.0 }
 0x13a   : > { %v1469_v19 = vpack.c.bf16 0.0, %v1343_v16 }
 0x13b   : > { %v920_v14 = vpop.f32.mrf.mxu1 }
 0x13c   : > { %v751_v15 = vpop.f32.mrf.mxu0  ;;  %v1697_v25 = vunpack.c.h.b16 %v1469_v19  ;;  %v1696_v27 = vunpack.c.l.b16 %v1469_v19 }
 0x13d   : > { %v1085_v17 = vmul.f32 0.2, %v751_v15 }
 0x13f   : > { %v1213_v18 = vmax.f32 %v751_v15, %v1085_v17 }
 0x141   : > { %v1345_v20 = vsel %vm5134_vm14, %v1213_v18, 0.0  ;;  %v4770_v18 = vld [vmem:[%s5100_s10 + $0x68] sm:$0xff] }
 0x142   : > { %v1470_v21 = vpack.c.bf16 0.0, %v1345_v20 }
 0x143   : > { %v923_v23 = vpop.f32.mrf.mxu1 }
 0x144   : > { %v754_v24 = vpop.f32.mrf.mxu0  ;;  %v1699_v26 = vunpack.c.h.b16 %v1470_v21  ;;  %v1698_v28 = vunpack.c.l.b16 %v1470_v21 }
 0x145   : > { %v1087_v29 = vmul.f32 0.2, %v754_v24 }
 0x146   : > { %v5154_v30 = vpack.c.b16 %v1699_v26, %v1697_v25  ;;  %v5156_v31 = vpack.c.b16 %v1698_v28, %v1696_v27  ;;  %4262 = vmatmul.msk.bf16.gmra.mxu1 %vm638_vm11, %v4767_v22 }
 0x147   : > { %4230 = vmatmul.msk.bf16.gmra.mxu0 %vm638_vm11, %v4767_v22  ;;  %v1215_v32 = vmax.f32 %v754_v24, %v1087_v29 }
 0x149   : > { %v1347_v35 = vsel %vm5134_vm14, %v1215_v32, 0.0 }
 0x14a   : > { %v1471_v38 = vpack.c.bf16 0.0, %v1347_v35 }
 0x14b   : > { %v925_v33 = vpop.f32.mrf.mxu1 }
 0x14c   : > { %v756_v34 = vpop.f32.mrf.mxu0  ;;  %v1701_v44 = vunpack.c.h.b16 %v1471_v38  ;;  %v1700_v46 = vunpack.c.l.b16 %v1471_v38 }
 0x14d   : > { %v1089_v36 = vmul.f32 0.2, %v756_v34 }
 0x14f   : > { %v1217_v37 = vmax.f32 %v756_v34, %v1089_v36 }
 0x151   : > { %v1349_v39 = vsel %vm5134_vm14, %v1217_v37, 0.0 }
 0x152   : > { %v1472_v40 = vpack.c.bf16 0.0, %v1349_v39  ;;  %v4771_v39 = vld [vmem:[%s5100_s10 + $0x70] sm:$0xff] }
 0x153   : > { %v928_v42 = vpop.f32.mrf.mxu1 }
 0x154   : > { %v759_v43 = vpop.f32.mrf.mxu0  ;;  %v1703_v45 = vunpack.c.h.b16 %v1472_v40  ;;  %v1702_v47 = vunpack.c.l.b16 %v1472_v40 }
 0x155   : > { %v1091_v48 = vmul.f32 0.2, %v759_v43 }
 0x156   : > { %v5165_v49 = vpack.c.b16 %v1703_v45, %v1701_v44  ;;  %v5167_v50 = vpack.c.b16 %v1702_v47, %v1700_v46  ;;  %4263 = vmatmul.msk.bf16.gmra.mxu1 %vm638_vm11, %v4768_v41 }
 0x157   : > { %4231 = vmatmul.msk.bf16.gmra.mxu0 %vm638_vm11, %v4768_v41  ;;  %v1219_v51 = vmax.f32 %v759_v43, %v1091_v48 }
 0x159   : > { %v1351_v54 = vsel %vm5134_vm14, %v1219_v51, 0.0 }
 0x15a   : > { %v1473_v57 = vpack.c.bf16 0.0, %v1351_v54 }
 0x15b   : > { %v930_v52 = vpop.f32.mrf.mxu1 }
 0x15c   : > { %v761_v53 = vpop.f32.mrf.mxu0  ;;  %v1705_v0 = vunpack.c.h.b16 %v1473_v57  ;;  %v1704_v2 = vunpack.c.l.b16 %v1473_v57 }
 0x15d   : > { %v1093_v55 = vmul.f32 0.2, %v761_v53 }
 0x15f   : > { %v1221_v56 = vmax.f32 %v761_v53, %v1093_v55 }
 0x161   : > { %v1353_v59 = vsel %vm5134_vm14, %v1221_v56, 0.0 }
 0x162   : > { %v1474_v60 = vpack.c.bf16 0.0, %v1353_v59 }
 0x163   : > { %v933_v62 = vpop.f32.mrf.mxu1 }
 0x164   : > { %v764_v63 = vpop.f32.mrf.mxu0  ;;  %v1707_v1 = vunpack.c.h.b16 %v1474_v60  ;;  %v1706_v3 = vunpack.c.l.b16 %v1474_v60 }
 0x165   : > { %v1095_v4 = vmul.f32 0.2, %v764_v63 }
 0x166   : > { %v5176_v5 = vpack.c.b16 %v1707_v1, %v1705_v0  ;;  %v5178_v6 = vpack.c.b16 %v1706_v3, %v1704_v2  ;;  %4264 = vmatmul.msk.bf16.gmra.mxu1 %vm638_vm11, %v4769_v61 }
 0x167   : > { %4232 = vmatmul.msk.bf16.gmra.mxu0 %vm638_vm11, %v4769_v61  ;;  %v1223_v7 = vmax.f32 %v764_v63, %v1095_v4  ;;  %v4772_v61 = vld [vmem:[%s5100_s10 + $0x78] sm:$0xff] }
 0x168   : > { %1802 = vrot.lane.b32.xlu1 %v5176_v5, %s5006_s30  ;;  %1800 = vrot.lane.b32.xlu0 %v5178_v6, %s5006_s30 }
 0x169   : > { %v1355_v10 = vsel %vm5134_vm14, %v1223_v7, 0.0 }
 0x16a   : > { %v1475_v15 = vpack.c.bf16 0.0, %v1355_v10 }
 0x16b   : > { %v935_v8 = vpop.f32.mrf.mxu1 }
 0x16c   : > { %v766_v9 = vpop.f32.mrf.mxu0  ;;  %v1709_v21 = vunpack.c.h.b16 %v1475_v15  ;;  %v1708_v23 = vunpack.c.l.b16 %v1475_v15 }
 0x16d   : > { %v1097_v13 = vmul.f32 0.2, %v766_v9 }
 0x16f   : > { %v1225_v14 = vmax.f32 %v766_v9, %v1097_v13 }
 0x171   : > { %v1357_v16 = vsel %vm5134_vm14, %v1225_v14, 0.0 }
 0x172   : > { %v1476_v17 = vpack.c.bf16 0.0, %v1357_v16 }
 0x173   : > { %v938_v19 = vpop.f32.mrf.mxu1 }
 0x174   : > { %v769_v20 = vpop.f32.mrf.mxu0  ;;  %v1711_v22 = vunpack.c.h.b16 %v1476_v17  ;;  %v1710_v24 = vunpack.c.l.b16 %v1476_v17 }
 0x175   : > { %v1099_v25 = vmul.f32 0.2, %v769_v20 }
 0x176   : > { %v5191_v26 = vpack.c.b16 %v1711_v22, %v1709_v21  ;;  %v5193_v27 = vpack.c.b16 %v1710_v24, %v1708_v23  ;;  %4265 = vmatmul.msk.bf16.gmra.mxu1 %vm638_vm11, %v4770_v18 }
 0x177   : > { %4233 = vmatmul.msk.bf16.gmra.mxu0 %vm638_vm11, %v4770_v18  ;;  %v1227_v28 = vmax.f32 %v769_v20, %v1099_v25  ;;  %v4773_v20 = vld [vmem:[%s5100_s10 + $0x80] sm:$0xff] }
 0x178   : > { %6966 = vst [vmem:[#allocation2_spill] sm:$0xff] %v5191_v26  ;;  %1806 = vrot.lane.b32.xlu0 %v5191_v26, %s5006_s30  ;;  %1804 = vrot.lane.b32.xlu2 %v5193_v27, %s5006_s30 }
 0x179   : > { %v1359_v33 = vsel %vm5134_vm14, %v1227_v28, 0.0 }
 0x17a   : > { %v1477_v36 = vpack.c.bf16 0.0, %v1359_v33 }
 0x17b   : > { %v940_v29 = vpop.f32.mrf.mxu1 }
 0x17c   : > { %v771_v32 = vpop.f32.mrf.mxu0  ;;  %v1713_v42 = vunpack.c.h.b16 %v1477_v36  ;;  %v1712_v44 = vunpack.c.l.b16 %v1477_v36 }
 0x17d   : > { %v1101_v34 = vmul.f32 0.2, %v771_v32 }
 0x17f   : > { %v1229_v35 = vmax.f32 %v771_v32, %v1101_v34 }
 0x181   : > { %v1361_v37 = vsel %vm5134_vm14, %v1229_v35, 0.0 }
 0x182   : > { %v1478_v38 = vpack.c.bf16 0.0, %v1361_v37 }
 0x183   : > { %v943_v40 = vpop.f32.mrf.mxu1 }
 0x184   : > { %v774_v41 = vpop.f32.mrf.mxu0  ;;  %v1715_v43 = vunpack.c.h.b16 %v1478_v38  ;;  %v1714_v45 = vunpack.c.l.b16 %v1478_v38 }
 0x185   : > { %v1103_v46 = vmul.f32 0.2, %v774_v41 }
 0x186   : > { %v5206_v47 = vpack.c.b16 %v1715_v43, %v1713_v42  ;;  %v5208_v48 = vpack.c.b16 %v1714_v45, %v1712_v44  ;;  %4266 = vmatmul.msk.bf16.gmra.mxu1 %vm638_vm11, %v4771_v39  ;;  %v4774_v43 = vld [vmem:[%s5100_s10 + $0x88] sm:$0xff] }
 0x187   : > { %4234 = vmatmul.msk.bf16.gmra.mxu0 %vm638_vm11, %v4771_v39  ;;  %v1231_v51 = vmax.f32 %v774_v41, %v1103_v46 }
 0x188   : > { %6967 = vst [vmem:[#allocation3_spill] sm:$0xff] %v5206_v47  ;;  %1810 = vrot.lane.b32.xlu2 %v5206_v47, %s5006_s30  ;;  %1808 = vrot.lane.b32.xlu1 %v5208_v48, %s5006_s30 }
 0x189   : > { %6968 = vst [vmem:[#allocation4_spill] sm:$0xff] %v5208_v48  ;;  %v1363_v54 = vsel %vm5134_vm14, %v1231_v51, 0.0 }
 0x18a   : > { %v1479_v57 = vpack.c.bf16 0.0, %v1363_v54 }
 0x18b   : > { %v945_v52 = vpop.f32.mrf.mxu1 }
 0x18c   : > { %v776_v53 = vpop.f32.mrf.mxu0  ;;  %v1717_v0 = vunpack.c.h.b16 %v1479_v57  ;;  %v1716_v2 = vunpack.c.l.b16 %v1479_v57 }
 0x18d   : > { %v1105_v55 = vmul.f32 0.2, %v776_v53 }
 0x18f   : > { %v1233_v56 = vmax.f32 %v776_v53, %v1105_v55 }
 0x191   : > { %v1365_v59 = vsel %vm5134_vm14, %v1233_v56, 0.0 }
 0x192   : > { %v1480_v60 = vpack.c.bf16 0.0, %v1365_v59 }
 0x193   : > { %v948_v62 = vpop.f32.mrf.mxu1 }
 0x194   : > { %v779_v63 = vpop.f32.mrf.mxu0  ;;  %v1719_v1 = vunpack.c.h.b16 %v1480_v60  ;;  %v1718_v3 = vunpack.c.l.b16 %v1480_v60 }
 0x195   : > { %v1107_v4 = vmul.f32 0.2, %v779_v63 }
 0x196   : > { %v5221_v7 = vpack.c.b16 %v1719_v1, %v1717_v0  ;;  %v5223_v8 = vpack.c.b16 %v1718_v3, %v1716_v2  ;;  %4267 = vmatmul.msk.bf16.gmra.mxu1 %vm638_vm11, %v4772_v61  ;;  %v4775_v3 = vld [vmem:[%s5100_s10 + $0x90] sm:$0xff] }
 0x197   : > { %4235 = vmatmul.msk.bf16.gmra.mxu0 %vm638_vm11, %v4772_v61  ;;  %v1235_v9 = vmax.f32 %v779_v63, %v1107_v4 }
 0x198   : > { %6969 = vst [vmem:[#allocation5_spill] sm:$0xff] %v5221_v7  ;;  %1814 = vrot.lane.b32.xlu1 %v5221_v7, %s5006_s30  ;;  %1812 = vrot.lane.b32.xlu0 %v5223_v8, %s5006_s30 }
 0x199   : > { %6970 = vst [vmem:[#allocation6_spill] sm:$0xff] %v5223_v8  ;;  %v1367_v14 = vsel %vm5134_vm14, %v1235_v9, 0.0 }
 0x19a   : > { %v1481_v17 = vpack.c.bf16 0.0, %v1367_v14 }
 0x19b   : > { %v950_v10 = vpop.f32.mrf.mxu1 }
 0x19c   : > { %v781_v13 = vpop.f32.mrf.mxu0  ;;  %v1721_v23 = vunpack.c.h.b16 %v1481_v17  ;;  %v1720_v25 = vunpack.c.l.b16 %v1481_v17 }
 0x19d   : > { %v1109_v15 = vmul.f32 0.2, %v781_v13 }
 0x19f   : > { %v1237_v16 = vmax.f32 %v781_v13, %v1109_v15 }
 0x1a1   : > { %v1369_v18 = vsel %vm5134_vm14, %v1237_v16, 0.0 }
 0x1a2   : > { %v1482_v19 = vpack.c.bf16 0.0, %v1369_v18 }
 0x1a3   : > { %v953_v21 = vpop.f32.mrf.mxu1 }
 0x1a4   : > { %v784_v22 = vpop.f32.mrf.mxu0  ;;  %v1723_v24 = vunpack.c.h.b16 %v1482_v19  ;;  %v1722_v28 = vunpack.c.l.b16 %v1482_v19 }
 0x1a5   : > { %v1111_v29 = vmul.f32 0.2, %v784_v22 }
 0x1a6   : > { %v5236_v32 = vpack.c.b16 %v1723_v24, %v1721_v23  ;;  %v5238_v33 = vpack.c.b16 %v1722_v28, %v1720_v25  ;;  %4268 = vmatmul.msk.bf16.gmra.mxu1 %vm638_vm11, %v4773_v20 }
 0x1a7   : > { %4236 = vmatmul.msk.bf16.gmra.mxu0 %vm638_vm11, %v4773_v20  ;;  %v1239_v34 = vmax.f32 %v784_v22, %v1111_v29 }
 0x1a8   : > { %6971 = vst [vmem:[#allocation7_spill] sm:$0xff] %v5236_v32  ;;  %1818 = vrot.lane.b32.xlu0 %v5236_v32, %s5006_s30  ;;  %1816 = vrot.lane.b32.xlu2 %v5238_v33, %s5006_s30 }
 0x1a9   : > { %6972 = vst [vmem:[#allocation8_spill] sm:$0xff] %v5238_v33  ;;  %v1371_v37 = vsel %vm5134_vm14, %v1239_v34, 0.0  ;;  %v4776_v34 = vld [vmem:[%s5100_s10 + $0x98] sm:$0xff] }
 0x1aa   : > { %v1483_v40 = vpack.c.bf16 0.0, %v1371_v37 }
 0x1ab   : > { %v955_v35 = vpop.f32.mrf.mxu1 }
 0x1ac   : > { %v786_v36 = vpop.f32.mrf.mxu0  ;;  %v1725_v46 = vunpack.c.h.b16 %v1483_v40  ;;  %v1724_v52 = vunpack.c.l.b16 %v1483_v40 }
 0x1ad   : > { %v1113_v38 = vmul.f32 0.2, %v786_v36 }
 0x1af   : > { %v1241_v39 = vmax.f32 %v786_v36, %v1113_v38 }
 0x1b1   : > { %v1373_v41 = vsel %vm5134_vm14, %v1241_v39, 0.0 }
 0x1b2   : > { %v1484_v42 = vpack.c.bf16 0.0, %v1373_v41 }
 0x1b3   : > { %v958_v44 = vpop.f32.mrf.mxu1 }
 0x1b4   : > { %v789_v45 = vpop.f32.mrf.mxu0  ;;  %v1727_v51 = vunpack.c.h.b16 %v1484_v42  ;;  %v1726_v53 = vunpack.c.l.b16 %v1484_v42 }
 0x1b5   : > { %v1115_v54 = vmul.f32 0.2, %v789_v45 }
 0x1b6   : > { %v5251_v55 = vpack.c.b16 %v1727_v51, %v1725_v46  ;;  %v5253_v56 = vpack.c.b16 %v1726_v53, %v1724_v52  ;;  %4269 = vmatmul.msk.bf16.gmra.mxu1 %vm638_vm11, %v4774_v43 }
 0x1b7   : > { %4237 = vmatmul.msk.bf16.gmra.mxu0 %vm638_vm11, %v4774_v43  ;;  %v1243_v57 = vmax.f32 %v789_v45, %v1115_v54 }
 0x1b8   : > { %6973 = vst [vmem:[#allocation9_spill] sm:$0xff] %v5251_v55 }
 0x1b9   : > { %6974 = vst [vmem:[#allocation10_spill] sm:$0xff] %v5253_v56  ;;  %v1375_v61 = vsel %vm5134_vm14, %v1243_v57, 0.0 }
 0x1ba   : > { %v1485_v0 = vpack.c.bf16 0.0, %v1375_v61 }
 0x1bb   : > { %v960_v59 = vpop.f32.mrf.mxu1 }
 0x1bc   : > { %v791_v60 = vpop.f32.mrf.mxu0  ;;  %v1729_v10 = vunpack.c.h.b16 %v1485_v0  ;;  %v1728_v14 = vunpack.c.l.b16 %v1485_v0 }
 0x1bd   : > { %v1117_v62 = vmul.f32 0.2, %v791_v60 }
 0x1bf   : > { %v1245_v63 = vmax.f32 %v791_v60, %v1117_v62  ;;  %v4777_v60 = vld [vmem:[%s5100_s10 + $0xa0] sm:$0xff] }
 0x1c1   : > { %v1377_v1 = vsel %vm5134_vm14, %v1245_v63, 0.0 }
 0x1c2   : > { %v1486_v2 = vpack.c.bf16 0.0, %v1377_v1 }
 0x1c3   : > { %v963_v4 = vpop.f32.mrf.mxu1 }
 0x1c4   : > { %v794_v9 = vpop.f32.mrf.mxu0  ;;  %v1731_v13 = vunpack.c.h.b16 %v1486_v2  ;;  %v1730_v15 = vunpack.c.l.b16 %v1486_v2 }
 0x1c5   : > { %v1119_v16 = vmul.f32 0.2, %v794_v9 }
 0x1c6   : > { %v5262_v17 = vpack.c.b16 %v1731_v13, %v1729_v10  ;;  %v5264_v18 = vpack.c.b16 %v1730_v15, %v1728_v14  ;;  %4270 = vmatmul.msk.bf16.gmra.mxu1 %vm638_vm11, %v4775_v3 }
 0x1c7   : > { %4238 = vmatmul.msk.bf16.gmra.mxu0 %vm638_vm11, %v4775_v3  ;;  %v1247_v19 = vmax.f32 %v794_v9, %v1119_v16 }
 0x1c8   : > { %6975 = vst [vmem:[#allocation11_spill] sm:$0xff] %v5262_v17 }
 0x1c9   : > { %6976 = vst [vmem:[#allocation12_spill] sm:$0xff] %v5264_v18  ;;  %v1379_v22 = vsel %vm5134_vm14, %v1247_v19, 0.0 }
 0x1ca   : > { %v1487_v25 = vpack.c.bf16 0.0, %v1379_v22 }
 0x1cb   : > { %v965_v20 = vpop.f32.mrf.mxu1 }
 0x1cc   : > { %v796_v21 = vpop.f32.mrf.mxu0  ;;  %v1732_v37 = vunpack.c.l.b16 %v1487_v25  ;;  %v1733_v39 = vunpack.c.h.b16 %v1487_v25 }
 0x1cd   : > { %v1121_v23 = vmul.f32 0.2, %v796_v21 }
 0x1cf   : > { %v1249_v24 = vmax.f32 %v796_v21, %v1121_v23  ;;  %v4778_v23 = vld [vmem:[%s5100_s10 + $0xa8] sm:$0xff] }
 0x1d1   : > { %v1381_v28 = vsel %vm5134_vm14, %v1249_v24, 0.0 }
 0x1d2   : > { %v1488_v29 = vpack.c.bf16 0.0, %v1381_v28 }
 0x1d3   : > { %v968_v35 = vpop.f32.mrf.mxu1 }
 0x1d4   : > { %v799_v36 = vpop.f32.mrf.mxu0  ;;  %v1734_v38 = vunpack.c.l.b16 %v1488_v29  ;;  %v1735_v40 = vunpack.c.h.b16 %v1488_v29 }
 0x1d5   : > { %v1123_v41 = vmul.f32 0.2, %v799_v36 }
 0x1d6   : > { %v5273_v42 = vpack.c.b16 %v1734_v38, %v1732_v37  ;;  %v5275_v43 = vpack.c.b16 %v1735_v40, %v1733_v39  ;;  %4271 = vmatmul.msk.bf16.gmra.mxu1 %vm638_vm11, %v4776_v34 }
 0x1d7   : > { %4239 = vmatmul.msk.bf16.gmra.mxu0 %vm638_vm11, %v4776_v34  ;;  %v1251_v44 = vmax.f32 %v799_v36, %v1123_v41 }
 0x1d8   : > { %6977 = vst [vmem:[#allocation13_spill] sm:$0xff] %v5273_v42 }
 0x1d9   : > { %6978 = vst [vmem:[#allocation14_spill] sm:$0xff] %v5275_v43  ;;  %v1383_v51 = vsel %vm5134_vm14, %v1251_v44, 0.0 }
 0x1da   : > { %v1489_v54 = vpack.c.bf16 0.0, %v1383_v51 }
 0x1db   : > { %v970_v45 = vpop.f32.mrf.mxu1 }
 0x1dc   : > { %v801_v46 = vpop.f32.mrf.mxu0  ;;  %v1737_v63 = vunpack.c.h.b16 %v1489_v54  ;;  %v1736_v1 = vunpack.c.l.b16 %v1489_v54 }
 0x1dd   : > { %v1125_v52 = vmul.f32 0.2, %v801_v46 }
 0x1df   : > { %v1253_v53 = vmax.f32 %v801_v46, %v1125_v52 }
 0x1e1   : > { %v1385_v57 = vsel %vm5134_vm14, %v1253_v53, 0.0  ;;  %v5313_v53 = vpop.permute.xlu0 %1800 }
 0x1e2   : > { %v1490_v59 = vpack.c.bf16 0.0, %v1385_v57  ;;  %v4779_v57 = vld [vmem:[%s5100_s10 + $0xb0] sm:$0xff] }
 0x1e3   : > { %v973_v61 = vpop.f32.mrf.mxu1 }
 0x1e4   : > { %v804_v62 = vpop.f32.mrf.mxu0  ;;  %v1739_v0 = vunpack.c.h.b16 %v1490_v59  ;;  %v1738_v2 = vunpack.c.l.b16 %v1490_v59 }
 0x1e5   : > { %v1127_v3 = vmul.f32 0.2, %v804_v62 }
 0x1e6   : > { %v5284_v4 = vpack.c.b16 %v1739_v0, %v1737_v63  ;;  %v5286_v9 = vpack.c.b16 %v1738_v2, %v1736_v1  ;;  %4272 = vmatmul.msk.bf16.gmra.mxu1 %vm638_vm11, %v4777_v60 }
 0x1e7   : > { %4240 = vmatmul.msk.bf16.gmra.mxu0 %vm638_vm11, %v4777_v60  ;;  %v1255_v10 = vmax.f32 %v804_v62, %v1127_v3 }
 0x1e8   : > { %6979 = vst [vmem:[#allocation15_spill] sm:$0xff] %v5284_v4  ;;  %1834 = vrot.lane.b32.xlu0 %v5284_v4, %s5006_s30  ;;  %1832 = vrot.lane.b32.xlu2 %v5286_v9, %s5006_s30 }
 0x1e9   : > { %6980 = vst [vmem:[#allocation16_spill] sm:$0xff] %v5286_v9  ;;  %v1387_v15 = vsel %vm5134_vm14, %v1255_v10, 0.0 }
 0x1ea   : > { %v1491_v20 = vpack.c.bf16 0.0, %v1387_v15 }
 0x1eb   : > { %v975_v13 = vpop.f32.mrf.mxu1 }
 0x1ec   : > { %v806_v14 = vpop.f32.mrf.mxu0  ;;  %v1741_v28 = vunpack.c.h.b16 %v1491_v20  ;;  %v1740_v34 = vunpack.c.l.b16 %v1491_v20  ;;  %v1805_v13 = vpop.permute.xlu2 %1804 }
 0x1ed   : > { %v1129_v16 = vmul.f32 0.2, %v806_v14 }
 0x1ef   : > { %v1257_v19 = vmax.f32 %v806_v14, %v1129_v16  ;;  %v1807_v14 = vpop.permute.xlu0 %1806  ;;  %v5326_v16 = vpop.permute.xlu1 %1802 }
 0x1f1   : > { %v1389_v21 = vsel %vm5134_vm14, %v1257_v19, 0.0 }
 0x1f2   : > { %v1492_v22 = vpack.c.bf16 0.0, %v1389_v21 }
 0x1f3   : > { %v978_v24 = vpop.f32.mrf.mxu1 }
 0x1f4   : > { %v809_v25 = vpop.f32.mrf.mxu0  ;;  %v1743_v29 = vunpack.c.h.b16 %v1492_v22  ;;  %v1742_v35 = vunpack.c.l.b16 %v1492_v22 }
 0x1f5   : > { %v1131_v36 = vmul.f32 0.2, %v809_v25 }
 0x1f6   : > { %v5299_v37 = vpack.c.b16 %v1743_v29, %v1741_v28  ;;  %v5301_v38 = vpack.c.b16 %v1742_v35, %v1740_v34  ;;  %4273 = vmatmul.msk.bf16.gmra.mxu1 %vm638_vm11, %v4778_v23  ;;  %v4780_v34 = vld [vmem:[%s5100_s10 + $0xb8] sm:$0xff] }
 0x1f7   : > { %4241 = vmatmul.msk.bf16.gmra.mxu0 %vm638_vm11, %v4778_v23  ;;  %v1259_v39 = vmax.f32 %v809_v25, %v1131_v36  ;;  %v1811_v25 = vpop.permute.xlu2 %1810 }
 0x1f8   : > { %6981 = vst [vmem:[#allocation17_spill] sm:$0xff] %v5299_v37  ;;  %1838 = vrot.lane.b32.xlu2 %v5299_v37, %s5006_s30  ;;  %1836 = vrot.lane.b32.xlu1 %v5301_v38, %s5006_s30 }
 0x1f9   : > { %6982 = vst [vmem:[#allocation18_spill] sm:$0xff] %v5301_v38  ;;  %v1391_v44 = vsel %vm5134_vm14, %v1259_v39, 0.0 }
 0x1fa   : > { %v1493_v51 = vpack.c.bf16 0.0, %v1391_v44  ;;  %v1809_v36 = vpop.permute.xlu1 %1808 }
 0x1fb   : > { %v980_v40 = vpop.f32.mrf.mxu1 }
 0x1fc   : > { %v811_v41 = vpop.f32.mrf.mxu0  ;;  %v1745_v61 = vunpack.c.h.b16 %v1493_v51  ;;  %v1744_v63 = vunpack.c.l.b16 %v1493_v51 }
 0x1fd   : > { %v1133_v45 = vmul.f32 0.2, %v811_v41 }
 0x1ff   : > { %v1261_v46 = vmax.f32 %v811_v41, %v1133_v45 }
 0x201   : > { %v1393_v52 = vsel %vm5134_vm14, %v1261_v46, 0.0 }
 0x202   : > { %v1494_v54 = vpack.c.bf16 0.0, %v1393_v52 }
 0x203   : > { %v983_v59 = vpop.f32.mrf.mxu1 }
 0x204   : > { %v814_v60 = vpop.f32.mrf.mxu0  ;;  %v1747_v62 = vunpack.c.h.b16 %v1494_v54  ;;  %v1746_v0 = vunpack.c.l.b16 %v1494_v54 }
 0x205   : > { %v1135_v1 = vmul.f32 0.2, %v814_v60 }
 0x206   : > { %v5316_v2 = vpack.c.b16 %v1747_v62, %v1745_v61  ;;  %v5318_v3 = vpack.c.b16 %v1746_v0, %v1744_v63  ;;  %4274 = vmatmul.msk.bf16.gmra.mxu1 %vm638_vm11, %v4779_v57 }
 0x207   : > { %4242 = vmatmul.msk.bf16.gmra.mxu0 %vm638_vm11, %v4779_v57  ;;  %v1263_v10 = vmax.f32 %v814_v60, %v1135_v1  ;;  %v1817_v57 = vpop.permute.xlu2 %1816 }
 0x208   : > { %6983 = vst [vmem:[#allocation19_spill] sm:$0xff] %v5316_v2  ;;  %1842 = vrot.lane.b32.xlu1 %v5316_v2, %s5006_s30  ;;  %1840 = vrot.lane.b32.xlu0 %v5318_v3, %s5006_s30 }
 0x209   : > { %6984 = vst [vmem:[#allocation20_spill] sm:$0xff] %v5318_v3  ;;  %v1395_v20 = vsel %vm5134_vm14, %v1263_v10, 0.0 }
 0x20a   : > { %v1495_v23 = vpack.c.bf16 0.0, %v1395_v20  ;;  %v1813_v28 = vpop.permute.xlu0 %1812  ;;  %v1815_v62 = vpop.permute.xlu1 %1814 }
 0x20b   : > { %v985_v15 = vpop.f32.mrf.mxu1 }
 0x20c   : > { %v816_v19 = vpop.f32.mrf.mxu0  ;;  %v1749_v40 = vunpack.c.h.b16 %v1495_v23  ;;  %v1748_v44 = vunpack.c.l.b16 %v1495_v23  ;;  %v1858_v15 = vsel %vm340_vm10, %v1813_v28, %v1815_v62  ;;  %v4781_v23 = vld [vmem:[%s5100_s10 + $0xc0] sm:$0xff] }
 0x20d   : > { %v1137_v21 = vmul.f32 0.2, %v816_v19 }
 0x20f   : > { %v1265_v22 = vmax.f32 %v816_v19, %v1137_v21 }
 0x211   : > { %v1397_v24 = vsel %vm5134_vm14, %v1265_v22, 0.0  ;;  %v1857_v22 = vsel %vm340_vm10, %v1809_v36, %v1811_v25  ;;  %v1855_v36 = vsel %vm340_vm10, %v5313_v53, %v5326_v16  ;;  %v4782_v16 = vld [vmem:[%s5100_s10 + $0xc8] sm:$0xff] }
 0x212   : > { %v1496_v29 = vpack.c.bf16 0.0, %v1397_v24 }
 0x213   : > { %v988_v35 = vpop.f32.mrf.mxu1 }
 0x214   : > { %v819_v39 = vpop.f32.mrf.mxu0  ;;  %v1751_v41 = vunpack.c.h.b16 %v1496_v29  ;;  %v1750_v45 = vunpack.c.l.b16 %v1496_v29 }
 0x215   : > { %v1139_v46 = vmul.f32 0.2, %v819_v39 }
 0x216   : > { %v5333_v51 = vpack.c.b16 %v1751_v41, %v1749_v40  ;;  %v5335_v52 = vpack.c.b16 %v1750_v45, %v1748_v44  ;;  %4275 = vmatmul.msk.bf16.gmra.mxu1 %vm638_vm11, %v4780_v34  ;;  %v1856_v45 = vsel %vm340_vm10, %v1805_v13, %v1807_v14 }
 0x217   : > { %4243 = vmatmul.msk.bf16.gmra.mxu0 %vm638_vm11, %v4780_v34  ;;  %v1267_v54 = vmax.f32 %v819_v39, %v1139_v46 }
 0x218   : > { %6985 = vst [vmem:[#allocation21_spill] sm:$0xff] %v5333_v51  ;;  %1846 = vrot.lane.b32.xlu0 %v5333_v51, %s5006_s30  ;;  %1844 = vrot.lane.b32.xlu2 %v5335_v52, %s5006_s30 }
 0x219   : > { %6986 = vst [vmem:[#allocation22_spill] sm:$0xff] %v5335_v52  ;;  %v1399_v0 = vsel %vm5134_vm14, %v1267_v54, 0.0 }
 0x21a   : > { %v1819_v59 = vpop.permute.xlu0 %1818  ;;  %v1497_v19 = vpack.c.bf16 0.0, %v1399_v0 }
 0x21b   : > { %v1859_v60 = vsel %vm340_vm10, %v1817_v57, %v1819_v59  ;;  %v990_v61 = vpop.f32.mrf.mxu1 }
 0x21c   : > { %v821_v63 = vpop.f32.mrf.mxu0  ;;  %1884 = vmatpush.bf16.msra.mxu2 %v1859_v60  ;;  %v1753_v34 = vunpack.c.h.b16 %v1497_v19  ;;  %v1752_v39 = vunpack.c.l.b16 %v1497_v19 }
 0x21d   : > { %v1141_v1 = vmul.f32 0.2, %v821_v63 }
 0x21f   : > { %v1269_v10 = vmax.f32 %v821_v63, %v1141_v1 }
 0x220   : > { %1885 = vmatpush.bf16.msra.mxu2 %v1858_v15  ;;  %1828 = vrot.lane.b32.xlu0 %v5273_v42, %s5006_s30 }
 0x221   : > { %v1401_v20 = vsel %vm5134_vm14, %v1269_v10, 0.0 }
 0x222   : > { %v1498_v21 = vpack.c.bf16 0.0, %v1401_v20 }
 0x223   : > { %v993_v24 = vpop.f32.mrf.mxu1 }
 0x224   : > { %v824_v29 = vpop.f32.mrf.mxu0  ;;  %1886 = vmatpush.bf16.msra.mxu2 %v1857_v22  ;;  %v1755_v35 = vunpack.c.h.b16 %v1498_v21  ;;  %v1754_v40 = vunpack.c.l.b16 %v1498_v21 }
 0x225   : > { %v1143_v28 = vmul.f32 0.2, %v824_v29 }
 0x226   : > { %v5353_v41 = vpack.c.b16 %v1755_v35, %v1753_v34  ;;  %v5355_v44 = vpack.c.b16 %v1754_v40, %v1752_v39  ;;  %4276 = vmatmul.msk.bf16.gmra.mxu1 %vm638_vm11, %v4781_v23 }
 0x227   : > { %4244 = vmatmul.msk.bf16.gmra.mxu0 %vm638_vm11, %v4781_v23  ;;  %v1271_v25 = vmax.f32 %v824_v29, %v1143_v28  ;;  %v4783_v28 = vld [vmem:[%s5100_s10 + $0xd0] sm:$0xff] }
 0x228   : > { %6987 = vst [vmem:[#allocation23_spill] sm:$0xff] %v5353_v41  ;;  %1887 = vmatpush.bf16.msra.mxu2 %v1856_v45  ;;  %1794 = vrot.lane.b32.xlu0 %v5154_v30, %s5006_s30 }
 0x229   : > { %6988 = vst [vmem:[#allocation24_spill] sm:$0xff] %v5355_v44  ;;  %1850 = vrot.lane.b32.xlu2 %v5353_v41, %s5006_s30  ;;  %1848 = vrot.lane.b32.xlu1 %v5355_v44, %s5006_s30  ;;  %v1403_v13 = vsel %vm5134_vm14, %v1271_v25, 0.0 }
 0x22a   : > { %v1499_v59 = vpack.c.bf16 0.0, %v1403_v13 }
 0x22b   : > { %v995_v46 = vpop.f32.mrf.mxu1 }
 0x22c   : > { %v826_v54 = vpop.f32.mrf.mxu0  ;;  %1888 = vmatpush.bf16.msra.mxu2 %v1855_v36  ;;  %v2305_v63 = vunpack.c.l.b16 %v1499_v59  ;;  %v2306_v1 = vunpack.c.h.b16 %v1499_v59 }
 0x22d   : > { %v1145_v14 = vmul.f32 0.2, %v826_v54 }
 0x22f   : > { %v1273_v57 = vmax.f32 %v826_v54, %v1145_v14 }
 0x230   : > { %1788 = vrot.lane.b32.xlu0 %v5143_v11, %s5006_s30 }
 0x231   : > { %v1405_v60 = vsel %vm5134_vm14, %v1273_v57, 0.0  ;;  %1798 = vrot.lane.b32.xlu2 %v5165_v49, %s5006_s30  ;;  %1796 = vrot.lane.b32.xlu1 %v5167_v50, %s5006_s30 }
 0x232   : > { %v1500_v53 = vpack.c.bf16 0.0, %v1405_v60 }
 0x233   : > { %v998_v61 = vpop.f32.mrf.mxu1 }
 0x234   : > { %v829_v62 = vpop.f32.mrf.mxu0  ;;  %v2307_v0 = vunpack.c.l.b16 %v1500_v53  ;;  %v2308_v10 = vunpack.c.h.b16 %v1500_v53 }
 0x235   : > { %v1147_v15 = vmul.f32 0.2, %v829_v62 }
 0x236   : > { %v5380_v19 = vpack.c.b16 %v2307_v0, %v2305_v63  ;;  %v5382_v20 = vpack.c.b16 %v2308_v10, %v2306_v1  ;;  %4277 = vmatmul.msk.bf16.gmra.mxu1 %vm638_vm11, %v4782_v16 }
 0x237   : > { %4245 = vmatmul.msk.bf16.gmra.mxu0 %vm638_vm11, %v4782_v16  ;;  %v1275_v21 = vmax.f32 %v829_v62, %v1147_v15  ;;  %v4784_v15 = vld [vmem:[%s5100_s10 + $0xd8] sm:$0xff] }
 0x238   : > { %1822 = vrot.lane.b32.xlu0 %v5251_v55, %s5006_s30 }
 0x239   : > { %1792 = vrot.lane.b32.xlu2 %v5156_v31, %s5006_s30  ;;  %1830 = vrot.lane.b32.xlu1 %v5275_v43, %s5006_s30  ;;  %v1407_v24 = vsel %vm5134_vm14, %v1275_v21, 0.0 }
 0x23a   : > { %v1501_v35 = vpack.c.bf16 0.0, %v1407_v24 }
 0x23b   : > { %v1000_v22 = vpop.f32.mrf.mxu1 }
 0x23c   : > { %v831_v23 = vpop.f32.mrf.mxu0  ;;  %v2310_v36 = vunpack.c.h.b16 %v1501_v35  ;;  %v2309_v54 = vunpack.c.l.b16 %v1501_v35 }
 0x23d   : > { %v1149_v29 = vmul.f32 0.2, %v831_v23 }
 0x23f   : > { %v1277_v34 = vmax.f32 %v831_v23, %v1149_v29 }
 0x241   : > { %v1409_v39 = vsel %vm5134_vm14, %v1277_v34, 0.0  ;;  %1826 = vrot.lane.b32.xlu2 %v5262_v17, %s5006_s30  ;;  %1824 = vrot.lane.b32.xlu1 %v5264_v18, %s5006_s30  ;;  %v4788_v17 = vld [vmem:[%s5100_s10 + $0xf8] sm:$0xff] }
 0x242   : > { %v1502_v40 = vpack.c.bf16 0.0, %v1409_v39 }
 0x243   : > { %v1003_v45 = vpop.f32.mrf.mxu1 }
 0x244   : > { %v834_v25 = vpop.f32.mrf.mxu0  ;;  %v2312_v46 = vunpack.c.h.b16 %v1502_v40  ;;  %v2311_v13 = vunpack.c.l.b16 %v1502_v40 }
 0x245   : > { %v1151_v14 = vmul.f32 0.2, %v834_v25 }
 0x246   : > { %v5401_v57 = vpack.c.b16 %v2312_v46, %v2310_v36  ;;  %v5403_v59 = vpack.c.b16 %v2311_v13, %v2309_v54  ;;  %4278 = vmatmul.msk.bf16.gmra.mxu1 %vm638_vm11, %v4783_v28 }
 0x247   : > { %4246 = vmatmul.msk.bf16.gmra.mxu0 %vm638_vm11, %v4783_v28  ;;  %v1279_v60 = vmax.f32 %v834_v25, %v1151_v14 }
 0x249   : > { %1820 = vrot.lane.b32.xlu2 %v5253_v56, %s5006_s30  ;;  %1790 = vrot.lane.b32.xlu1 %v5145_v12, %s5006_s30  ;;  %v1411_v61 = vsel %vm5134_vm14, %v1279_v60, 0.0 }
 0x24a   : > { %v1503_v0 = vpack.c.bf16 0.0, %v1411_v61 }
 0x24b   : > { %v1005_v53 = vpop.f32.mrf.mxu1 }
 0x24c   : > { %v836_v16 = vpop.f32.mrf.mxu0  ;;  %v2314_v23 = vunpack.c.h.b16 %v1503_v0  ;;  %v2313_v29 = vunpack.c.l.b16 %v1503_v0  ;;  %v4785_v53 = vld [vmem:[%s5100_s10 + $0xe0] sm:$0xff] }
 0x24d   : > { %v1153_v62 = vmul.f32 0.2, %v836_v16 }
 0x24f   : > { %v1281_v63 = vmax.f32 %v836_v16, %v1153_v62 }
 0x251   : > { %v1413_v1 = vsel %vm5134_vm14, %v1281_v63, 0.0 }
 0x252   : > { %v1504_v10 = vpack.c.bf16 0.0, %v1413_v1 }
 0x253   : > { %v1008_v21 = vpop.f32.mrf.mxu1 }
 0x254   : > { %v839_v22 = vpop.f32.mrf.mxu0  ;;  %v2316_v24 = vunpack.c.h.b16 %v1504_v10  ;;  %v2315_v34 = vunpack.c.l.b16 %v1504_v10 }
 0x255   : > { %v1155_v35 = vmul.f32 0.2, %v839_v22 }
 0x256   : > { %v5416_v39 = vpack.c.b16 %v2316_v24, %v2314_v23  ;;  %v5418_v40 = vpack.c.b16 %v2315_v34, %v2313_v29  ;;  %4279 = vmatmul.msk.bf16.gmra.mxu1 %vm638_vm11, %v4784_v15 }
 0x257   : > { %4247 = vmatmul.msk.bf16.gmra.mxu0 %vm638_vm11, %v4784_v15  ;;  %v1283_v28 = vmax.f32 %v839_v22, %v1155_v35 }
 0x259   : > { %v1415_v36 = vsel %vm5134_vm14, %v1283_v28, 0.0 }
 0x25a   : > { %v1505_v13 = vpack.c.bf16 0.0, %v1415_v36  ;;  %v4786_v36 = vld [vmem:[%s5100_s10 + $0xe8] sm:$0xff] }
 0x25b   : > { %v1010_v45 = vpop.f32.mrf.mxu1 }
 0x25c   : > { %v841_v25 = vpop.f32.mrf.mxu0  ;;  %v2318_v62 = vunpack.c.h.b16 %v1505_v13  ;;  %v2317_v0 = vunpack.c.l.b16 %v1505_v13 }
 0x25d   : > { %v1157_v46 = vmul.f32 0.2, %v841_v25 }
 0x25f   : > { %v1285_v54 = vmax.f32 %v841_v25, %v1157_v46 }
 0x261   : > { %v1417_v14 = vsel %vm5134_vm14, %v1285_v54, 0.0 }
 0x262   : > { %v1506_v60 = vpack.c.bf16 0.0, %v1417_v14 }
 0x263   : > { %v1013_v16 = vpop.f32.mrf.mxu1 }
 0x264   : > { %v844_v61 = vpop.f32.mrf.mxu0  ;;  %v2320_v63 = vunpack.c.h.b16 %v1506_v60  ;;  %v2319_v1 = vunpack.c.l.b16 %v1506_v60 }
 0x265   : > { %v1159_v10 = vmul.f32 0.2, %v844_v61 }
 0x266   : > { %v5427_v15 = vpack.c.b16 %v2320_v63, %v2318_v62  ;;  %v5429_v21 = vpack.c.b16 %v2319_v1, %v2317_v0  ;;  %4280 = vmatmul.msk.bf16.gmra.mxu1 %vm638_vm11, %v4785_v53  ;;  %v5447_v63 = vpop.permute.xlu2 %1832 }
 0x267   : > { %4248 = vmatmul.msk.bf16.gmra.mxu0 %vm638_vm11, %v4785_v53  ;;  %v1287_v22 = vmax.f32 %v844_v61, %v1159_v10 }
 0x268   : > { %6989 = vst [vmem:[#allocation25_spill] sm:$0xff] %v5429_v21  ;;  %2415 = vrot.lane.b32.xlu0 %v5427_v15, %s5006_s30  ;;  %2413 = vrot.lane.b32.xlu2 %v5429_v21, %s5006_s30 }
 0x269   : > { %v1419_v29 = vsel %vm5134_vm14, %v1287_v22, 0.0  ;;  %v5454_v22 = vpop.permute.xlu0 %1834 }
 0x26a   : > { %v1507_v28 = vpack.c.bf16 0.0, %v1419_v29 }
 0x26b   : > { %v1015_v23 = vpop.f32.mrf.mxu1 }
 0x26c   : > { %v846_v24 = vpop.f32.mrf.mxu0  ;;  %v2322_v13 = vunpack.c.h.b16 %v1507_v28  ;;  %v2321_v60 = vunpack.c.l.b16 %v1507_v28 }
 0x26d   : > { %v1161_v34 = vmul.f32 0.2, %v846_v24 }
 0x26e   : > { %v5458_v29 = vpop.permute.xlu2 %1838 }
 0x26f   : > { %v1289_v35 = vmax.f32 %v846_v24, %v1161_v34 }
 0x271   : > { %v1421_v45 = vsel %vm5134_vm14, %v1289_v35, 0.0 }
 0x272   : > { %v1508_v25 = vpack.c.bf16 0.0, %v1421_v45 }
 0x273   : > { %v1018_v46 = vpop.f32.mrf.mxu1 }
 0x274   : > { %v849_v54 = vpop.f32.mrf.mxu0  ;;  %v2324_v14 = vunpack.c.h.b16 %v1508_v25  ;;  %v2323_v53 = vunpack.c.l.b16 %v1508_v25  ;;  %v4787_v25 = vld [vmem:[%s5100_s10 + $0xf0] sm:$0xff] }
 0x275   : > { %v1163_v16 = vmul.f32 0.2, %v849_v54 }
 0x276   : > { %v5442_v61 = vpack.c.b16 %v2324_v14, %v2322_v13  ;;  %v5444_v62 = vpack.c.b16 %v2323_v53, %v2321_v60  ;;  %4281 = vmatmul.msk.bf16.gmra.mxu1 %vm638_vm11, %v4786_v36 }
 0x277   : > { %4249 = vmatmul.msk.bf16.gmra.mxu0 %vm638_vm11, %v4786_v36  ;;  %v1291_v0 = vmax.f32 %v849_v54, %v1163_v16 }
 0x278   : > { %2419 = vrot.lane.b32.xlu2 %v5442_v61, %s5006_s30  ;;  %2417 = vrot.lane.b32.xlu1 %v5444_v62, %s5006_s30 }
 0x279   : > { %v1423_v23 = vsel %vm5134_vm14, %v1291_v0, 0.0 }
 0x27a   : > { %v1509_v35 = vpack.c.bf16 0.0, %v1423_v23  ;;  %v1841_v53 = vpop.permute.xlu0 %1840 }
 0x27b   : > { %v1020_v1 = vpop.f32.mrf.mxu1 }
 0x27c   : > { %v851_v10 = vpop.f32.mrf.mxu0  ;;  %v2326_v54 = vunpack.c.h.b16 %v1509_v35  ;;  %v2325_v14 = vunpack.c.l.b16 %v1509_v35 }
 0x27d   : > { %v1165_v24 = vmul.f32 0.2, %v851_v10 }
 0x27f   : > { %v1293_v34 = vmax.f32 %v851_v10, %v1165_v24  ;;  %v1845_v10 = vpop.permute.xlu2 %1844  ;;  %v1837_v24 = vpop.permute.xlu1 %1836 }
 0x281   : > { %v1425_v28 = vsel %vm5134_vm14, %v1293_v34, 0.0 }
 0x282   : > { %v1510_v45 = vpack.c.bf16 0.0, %v1425_v28 }
 0x283   : > { %v1023_v36 = vpop.f32.mrf.mxu1 }
 0x284   : > { %v854_v46 = vpop.f32.mrf.mxu0  ;;  %v2328_v13 = vunpack.c.h.b16 %v1510_v45  ;;  %v2327_v60 = vunpack.c.l.b16 %v1510_v45 }
 0x285   : > { %v1167_v16 = vmul.f32 0.2, %v854_v46 }
 0x286   : > { %v5463_v1 = vpack.c.b16 %v2328_v13, %v2326_v54  ;;  %v5465_v0 = vpack.c.b16 %v2327_v60, %v2325_v14  ;;  %4282 = vmatmul.msk.bf16.gmra.mxu1 %vm638_vm11, %v4787_v25 }
 0x287   : > { %4250 = vmatmul.msk.bf16.gmra.mxu0 %vm638_vm11, %v4787_v25  ;;  %v1295_v23 = vmax.f32 %v854_v46, %v1167_v16  ;;  %v1851_v54 = vpop.permute.xlu2 %1850  ;;  %v1843_v55 = vpop.permute.xlu1 %1842 }
 0x288   : > { %2423 = vrot.lane.b32.xlu1 %v5463_v1, %s5006_s30  ;;  %2421 = vrot.lane.b32.xlu0 %v5465_v0, %s5006_s30 }
 0x289   : > { %v1427_v28 = vsel %vm5134_vm14, %v1295_v23, 0.0 }
 0x28a   : > { %v1847_v45 = vpop.permute.xlu0 %1846  ;;  %v1511_v14 = vpack.c.bf16 0.0, %v1427_v28 }
 0x28b   : > { %v1025_v34 = vpop.f32.mrf.mxu1 }
 0x28c   : > { %v856_v35 = vpop.f32.mrf.mxu0  ;;  %v2330_v46 = vunpack.c.h.b16 %v1511_v14  ;;  %v2329_v34 = vunpack.c.l.b16 %v1511_v14 }
 0x28d   : > { %v1169_v36 = vmul.f32 0.2, %v856_v35 }
 0x28f   : > { %v1297_v13 = vmax.f32 %v856_v35, %v1169_v36 }
 0x291   : > { %v1429_v25 = vsel %vm5134_vm14, %v1297_v13, 0.0 }
 0x292   : > { %v1512_v60 = vpack.c.bf16 0.0, %v1429_v25  ;;  %v1829_v35 = vpop.permute.xlu0 %1828 }
 0x293   : > { %v1028_v4 = vpop.f32.mrf.mxu1 }
 0x294   : > { %v859_v37 = vpop.f32.mrf.mxu0  ;;  %v2332_v16 = vunpack.c.h.b16 %v1512_v60  ;;  %v2331_v2 = vunpack.c.l.b16 %v1512_v60  ;;  %v1799_v4 = vpop.permute.xlu2 %1798 }
 0x295   : > { %v1171_v43 = vmul.f32 0.2, %v859_v37 }
 0x296   : > { %v5478_v51 = vpack.c.b16 %v2332_v16, %v2330_v46  ;;  %v5480_v23 = vpack.c.b16 %v2331_v2, %v2329_v34  ;;  %4283 = vmatmul.msk.bf16.gmra.mxu1 %vm638_vm11, %v4788_v17 }
 0x297   : > { %4251 = vmatmul.msk.bf16.gmra.mxu0 %vm638_vm11, %v4788_v17  ;;  %v1299_v28 = vmax.f32 %v859_v37, %v1171_v43  ;;  %v1866_v43 = vsel %vm340_vm10, %v1845_v10, %v1847_v45 }
 0x298   : > { %2427 = vrot.lane.b32.xlu0 %v5478_v51, %s5006_s30  ;;  %2425 = vrot.lane.b32.xlu2 %v5480_v23, %s5006_s30 }
 0x299   : > { %v1431_v13 = vsel %vm5134_vm14, %v1299_v28, 0.0  ;;  %v1865_v28 = vsel %vm340_vm10, %v1841_v53, %v1843_v55  ;;  %v1864_v55 = vsel %vm340_vm10, %v1837_v24, %v5458_v29 }
 0x29a   : > { %v1513_v46 = vpack.c.bf16 0.0, %v1431_v13  ;;  %v1795_v37 = vpop.permute.xlu0 %1794 }
 0x29b   : > { %v1849_v36 = vpop.permute.xlu1 %1848  ;;  %v1030_v25 = vpop.f32.mrf.mxu1 }
 0x29c   : > { %v861_v14 = vpop.f32.mrf.mxu0  ;;  %v1867_v2 = vsel %vm340_vm10, %v1849_v36, %v1851_v54  ;;  %v1793_v7 = vpop.permute.xlu2 %1792  ;;  %v2334_v32 = vunpack.c.h.b16 %v1513_v46  ;;  %v2333_v13 = vunpack.c.l.b16 %v1513_v46 }
 0x29d   : > { %v1173_v60 = vmul.f32 0.2, %v861_v14  ;;  %1933 = vmatpush.bf16.msra.mxu3 %v1867_v2  ;;  %v1853_v25 = vsel %vm340_vm10, %v1793_v7, %v1795_v37 }
 0x29f   : > { %v1301_v17 = vmax.f32 %v861_v14, %v1173_v60 }
 0x2a1   : > { %v1433_v16 = vsel %vm5134_vm14, %v1301_v17, 0.0  ;;  %1934 = vmatpush.bf16.msra.mxu3 %v1866_v43 }
 0x2a2   : > { %v1514_v34 = vpack.c.bf16 0.0, %v1433_v16  ;;  %v4821_v16 = vld [vmem:[%s6931_s2 + $0x84] sm:$0xf] }
 0x2a3   : > { %v1797_v26 = vpop.permute.xlu1 %1796  ;;  %v1033_v2 = vpop.f32.mrf.mxu1 }
 0x2a4   : > { %v5495_v47 = vpop.f32.mrf.mxu0  ;;  %v1854_v54 = vsel %vm340_vm10, %v1797_v26, %v1799_v4  ;;  %v2336_v36 = vunpack.c.h.b16 %v1514_v34  ;;  %v2335_v14 = vunpack.c.l.b16 %v1514_v34  ;;  %v1789_v26 = vpop.permute.xlu0 %1788 }
 0x2a5   : > { %1889 = vmatpush.bf16.msra.mxu2 %v1854_v54  ;;  %1935 = vmatpush.bf16.msra.mxu3 %v1865_v28  ;;  %v1827_v60 = vpop.permute.xlu2 %1826  ;;  %v4302_v28 = vld [vmem:[%s6931_s2 + $0x80] sm:$0xf]  ;;  %v4822_v54 = vld [vmem:[%s6931_s2 + $0x84] sm:$0xf0] }
 0x2a6   : > { %v5498_v10 = vpack.c.b16 %v2336_v36, %v2334_v32  ;;  %v5500_v45 = vpack.c.b16 %v2335_v14, %v2333_v13  ;;  %v1863_v32 = vsel %vm340_vm10, %v5447_v63, %v5454_v22  ;;  %v4304_v63 = vld [vmem:[%s6931_s2 + $0x88] sm:$0xf0]  ;;  %v4303_v2 = vor.u32 %v4822_v54, %v4302_v28  ;;  %v4318_v54 = vld [vmem:[%s6931_s2 + $0xa0] sm:$0xf] }
 0x2a7   : > { %v4307_v34 = vor.u32 %v4821_v16, %v4304_v63 }
 0x2a8   : > { %2431 = vrot.lane.b32.xlu2 %v5498_v10, %s5006_s30  ;;  %2429 = vrot.lane.b32.xlu1 %v5500_v45, %s5006_s30 }
 0x2a9   : > { %1890 = vmatpush.bf16.msra.mxu2 %v1853_v25  ;;  %1936 = vmatpush.bf16.msra.mxu3 %v1864_v55 }
 0x2ab   : > { %v1831_v53 = vpop.permute.xlu1 %1830  ;;  %v1035_v7 = vpop.f32.mrf.mxu1 }
 0x2ac   : > { %v5509_v4 = vpop.f32.mrf.mxu0  ;;  %v1862_v29 = vsel %vm340_vm10, %v1829_v35, %v1831_v53  ;;  %v1823_v37 = vpop.permute.xlu0 %1822 }
 0x2ad   : > { %1937 = vmatpush.bf16.msra.mxu3 %v1863_v32  ;;  %v1821_v22 = vpop.permute.xlu2 %1820  ;;  %v4312_v32 = vld [vmem:[%s6931_s2 + $0x98] sm:$0xf0] }
 0x2ae   : > { %v1860_v35 = vsel %vm340_vm10, %v1821_v22, %v1823_v37  ;;  %v4825_v22 = vld [vmem:[%s6931_s2 + $0xa4] sm:$0xf] }
 0x2b1   : > { %1938 = vmatpush.bf16.msra.mxu3 %v1862_v29  ;;  %v4824_v29 = vld [vmem:[%s6931_s2 + $0x94] sm:$0xf0] }
 0x2b3   : > { %v1825_v24 = vpop.permute.xlu1 %1824  ;;  %v1038_v43 = vpop.f32.mrf.mxu1 }
 0x2b4   : > { %v5515_v46 = vpop.f32.mrf.mxu0  ;;  %v1861_v17 = vsel %vm340_vm10, %v1825_v24, %v1827_v60  ;;  %v4310_v60 = vld [vmem:[%s6931_s2 + $0x90] sm:$0xf] }
 0x2b5   : > { %1939 = vmatpush.bf16.msra.mxu3 %v1861_v17  ;;  %v4311_v17 = vor.u32 %v4824_v29, %v4310_v60 }
 0x2b9   : > { %1940 = vmatpush.bf16.msra.mxu3 %v1860_v35  ;;  %v4320_v35 = vld [vmem:[%s6931_s2 + $0xa8] sm:$0xf0] }
 0x2bb   : > { %v1791_v36 = vpop.permute.xlu1 %1790  ;;  %v1040_v25 = vpop.f32.mrf.mxu1 }
 0x2bc   : > { %v5532_v13 = vpop.f32.mrf.mxu0  ;;  %v1852_v14 = vsel %vm340_vm10, %v1789_v26, %v1791_v36  ;;  %1941 = vmatmul.bf16.vlgmr.msra.gmra.mxu3 %v4307_v34  ;;  %v4823_v26 = vld [vmem:[%s6931_s2 + $0x94] sm:$0xf]  ;;  %v4323_v34 = vor.u32 %v4825_v22, %v4320_v35  ;;  %v4826_v36 = vld [vmem:[%s6931_s2 + $0xa4] sm:$0xf0] }
 0x2bd   : > { %2127 = vmatpush.bf16.msrb.mxu3 %v5355_v44  ;;  %1891 = vmatpush.bf16.msra.mxu2 %v1852_v14  ;;  %v4315_v7 = vor.u32 %v4823_v26, %v4312_v32 }
 0x2c0   : > { %1892 = vmatmul.bf16.vlgmr.msra.gmra.mxu2 %v4303_v2  ;;  %v4319_v2 = vor.u32 %v4826_v36, %v4318_v54 }
 0x2c1   : > { %2078 = vmatpush.bf16.msrb.mxu2 %v5238_v33  ;;  %2128 = vmatpush.bf16.msrb.mxu3 %v5335_v52 }
 0x2c3   : > { %v1043_v53 = vpop.f32.mrf.mxu1 }
 0x2c4   : > { %v5539_v55 = vpop.f32.mrf.mxu0 }
 0x2c5   : > { %2079 = vmatpush.bf16.msrb.mxu2 %v5223_v8  ;;  %2129 = vmatpush.bf16.msrb.mxu3 %v5318_v3  ;;  %v4350_v8 = vld [vmem:[%s6931_s2 + $0xe0] sm:$0xf] }
 0x2c9   : > { %2080 = vmatpush.bf16.msrb.mxu2 %v5208_v48  ;;  %2130 = vmatpush.bf16.msrb.mxu3 %v5301_v38 }
 0x2cb   : > { %v1045_v43 = vpop.f32.mrf.mxu1 }
 0x2cc   : > { %v5557_v24 = vpop.f32.mrf.mxu0  ;;  %1946 = vmatmul.bf16.gmra.mxu3 %v4315_v7 }
 0x2cd   : > { %2081 = vmatpush.bf16.msrb.mxu2 %v5193_v27  ;;  %2131 = vmatpush.bf16.msrb.mxu3 %v5286_v9 }
 0x2d0   : > { %1897 = vmatmul.bf16.gmra.mxu2 %v4311_v17 }
 0x2d1   : > { %2082 = vmatpush.bf16.msrb.mxu2 %v5178_v6  ;;  %2132 = vmatpush.bf16.msrb.mxu3 %v5273_v42 }
 0x2d3   : > { %v1048_v16 = vpop.f32.mrf.mxu1 }
 0x2d4   : > { %v879_v37 = vpop.f32.mrf.mxu0 }
 0x2d5   : > { %2083 = vmatpush.bf16.msrb.mxu2 %v5167_v50  ;;  %2133 = vmatpush.bf16.msrb.mxu3 %v5264_v18  ;;  %v1187_v63 = vmul.f32 0.2, %v879_v37 }
 0x2d7   : > { %v1315_v28 = vmax.f32 %v879_v37, %v1187_v63 }
 0x2d9   : > { %2084 = vmatpush.bf16.msrb.mxu2 %v5156_v31  ;;  %2134 = vmatpush.bf16.msrb.mxu3 %v5253_v56  ;;  %v1447_v53 = vsel %vm5134_vm14, %v1315_v28, 0.0  ;;  %v4328_v28 = vld [vmem:[%s6931_s2 + $0xb8] sm:$0xf0] }
 0x2da   : > { %v1521_v7 = vpack.c.bf16 0.0, %v1447_v53  ;;  %v4828_v53 = vld [vmem:[%s6931_s2 + $0xb4] sm:$0xf0] }
 0x2db   : > { %v1050_v25 = vpop.f32.mrf.mxu1 }
 0x2dc   : > { %v881_v14 = vpop.f32.mrf.mxu0  ;;  %1951 = vmatmul.bf16.gmra.mxu3 %v4323_v34  ;;  %v2350_v43 = vunpack.c.h.b16 %v1521_v7  ;;  %v2349_v16 = vunpack.c.l.b16 %v1521_v7  ;;  %v4827_v34 = vld [vmem:[%s6931_s2 + $0xb4] sm:$0xf]  ;;  %v4326_v25 = vld [vmem:[%s6931_s2 + $0xb0] sm:$0xf] }
 0x2dd   : > { %2085 = vmatpush.bf16.msrb.mxu2 %v5143_v11  ;;  %v1189_v26 = vmul.f32 0.2, %v881_v14 }
 0x2df   : > { %v1317_v32 = vmax.f32 %v881_v14, %v1189_v26  ;;  %v4331_v14 = vor.u32 %v4827_v34, %v4328_v28 }
 0x2e0   : > { %1902 = vmatmul.bf16.gmra.mxu2 %v4319_v2 }
 0x2e1   : > { %v1449_v60 = vsel %vm5134_vm14, %v1317_v32, 0.0  ;;  %v4327_v32 = vor.u32 %v4828_v53, %v4326_v25 }
 0x2e2   : > { %v1522_v29 = vpack.c.bf16 0.0, %v1449_v60 }
 0x2e3   : > { %v1053_v22 = vpop.f32.mrf.mxu1 }
 0x2e4   : > { %v884_v17 = vpop.f32.mrf.mxu0  ;;  %v2352_v37 = vunpack.c.h.b16 %v1522_v29  ;;  %v2351_v63 = vunpack.c.l.b16 %v1522_v29 }
 0x2e5   : > { %v1191_v35 = vmul.f32 0.2, %v884_v17 }
 0x2e6   : > { %v5588_v54 = vpack.c.b16 %v2352_v37, %v2350_v43  ;;  %v5590_v36 = vpack.c.b16 %v2351_v63, %v2349_v16 }
 0x2e7   : > { %v1319_v2 = vmax.f32 %v884_v17, %v1191_v35 }
 0x2e8   : > { %6990 = vst [vmem:[#allocation26_spill] sm:$0xff] %v5588_v54  ;;  %2447 = vrot.lane.b32.xlu2 %v5588_v54, %s5006_s30  ;;  %2445 = vrot.lane.b32.xlu1 %v5590_v36, %s5006_s30 }
 0x2e9   : > { %6991 = vst [vmem:[#allocation27_spill] sm:$0xff] %v5590_v36  ;;  %v1451_v60 = vsel %vm5134_vm14, %v1319_v2, 0.0  ;;  %v4336_v2 = vld [vmem:[%s6931_s2 + $0xc8] sm:$0xf0] }
 0x2ea   : > { %v1523_v37 = vpack.c.bf16 0.0, %v1451_v60  ;;  %v4830_v60 = vld [vmem:[%s6931_s2 + $0xc4] sm:$0xf0] }
 0x2eb   : > { %v1055_v7 = vpop.f32.mrf.mxu1 }
 0x2ec   : > { %v886_v26 = vpop.f32.mrf.mxu0  ;;  %1956 = vmatmul.bf16.gmra.mxu3 %v4331_v14  ;;  %v2354_v22 = vunpack.c.h.b16 %v1523_v37  ;;  %v2353_v34 = vunpack.c.l.b16 %v1523_v37  ;;  %v4829_v14 = vld [vmem:[%s6931_s2 + $0xc4] sm:$0xf]  ;;  %v4334_v7 = vld [vmem:[%s6931_s2 + $0xc0] sm:$0xf] }
 0x2ed   : > { %v1193_v29 = vmul.f32 0.2, %v886_v26 }
 0x2ef   : > { %v1321_v43 = vmax.f32 %v886_v26, %v1193_v29 }
 0x2f0   : > { %1907 = vmatmul.bf16.gmra.mxu2 %v4327_v32 }
 0x2f1   : > { %v1453_v17 = vsel %vm5134_vm14, %v1321_v43, 0.0  ;;  %v4335_v43 = vor.u32 %v4830_v60, %v4334_v7 }
 0x2f2   : > { %v1524_v16 = vpack.c.bf16 0.0, %v1453_v17 }
 0x2f3   : > { %v1058_v18 = vpop.f32.mrf.mxu1 }
 0x2f4   : > { %v889_v63 = vpop.f32.mrf.mxu0  ;;  %v2356_v35 = vunpack.c.h.b16 %v1524_v16  ;;  %v2355_v28 = vunpack.c.l.b16 %v1524_v16  ;;  %v4339_v18 = vor.u32 %v4829_v14, %v4336_v2 }
 0x2f5   : > { %v1195_v25 = vmul.f32 0.2, %v889_v63 }
 0x2f6   : > { %v5612_v53 = vpack.c.b16 %v2356_v35, %v2354_v22  ;;  %v5614_v26 = vpack.c.b16 %v2355_v28, %v2353_v34  ;;  %v5630_v34 = vpop.permute.xlu2 %2413 }
 0x2f7   : > { %v1323_v32 = vmax.f32 %v889_v63, %v1195_v25 }
 0x2f8   : > { %2451 = vrot.lane.b32.xlu1 %v5612_v53, %s5006_s30  ;;  %2449 = vrot.lane.b32.xlu0 %v5614_v26, %s5006_s30 }
 0x2f9   : > { %v1455_v17 = vsel %vm5134_vm14, %v1323_v32, 0.0  ;;  %v4831_v32 = vld [vmem:[%s6931_s2 + $0xd4] sm:$0xf] }
 0x2fa   : > { %v1525_v35 = vpack.c.bf16 0.0, %v1455_v17 }
 0x2fb   : > { %v1060_v37 = vpop.f32.mrf.mxu1 }
 0x2fc   : > { %v891_v29 = vpop.f32.mrf.mxu0  ;;  %1961 = vmatmul.bf16.gmra.mxu3 %v4339_v18  ;;  %v2358_v14 = vunpack.c.h.b16 %v1525_v35  ;;  %v2357_v42 = vunpack.c.l.b16 %v1525_v35  ;;  %v4832_v35 = vld [vmem:[%s6931_s2 + $0xd4] sm:$0xf0] }
 0x2fd   : > { %v1197_v16 = vmul.f32 0.2, %v891_v29 }
 0x2ff   : > { %v1325_v22 = vmax.f32 %v891_v29, %v1197_v16  ;;  %v4344_v29 = vld [vmem:[%s6931_s2 + $0xd8] sm:$0xf0] }
 0x300   : > { %1912 = vmatmul.bf16.gmra.mxu2 %v4335_v43  ;;  %v4347_v17 = vor.u32 %v4831_v32, %v4344_v29 }
 0x301   : > { %v1457_v63 = vsel %vm5134_vm14, %v1325_v22, 0.0  ;;  %v4342_v22 = vld [vmem:[%s6931_s2 + $0xd0] sm:$0xf] }
 0x302   : > { %v1526_v28 = vpack.c.bf16 0.0, %v1457_v63  ;;  %v5652_v63 = vpop.permute.xlu2 %2419 }
 0x303   : > { %v1063_v18 = vpop.f32.mrf.mxu1 }
 0x304   : > { %v894_v25 = vpop.f32.mrf.mxu0  ;;  %v2360_v2 = vunpack.c.h.b16 %v1526_v28  ;;  %v2359_v7 = vunpack.c.l.b16 %v1526_v28  ;;  %v1183_v28 = vmul.f32 0.2, %v5539_v55  ;;  %v5658_v18 = vpop.permute.xlu0 %2415 }
 0x305   : > { %v1199_v60 = vmul.f32 0.2, %v894_v25 }
 0x306   : > { %v5638_v43 = vpack.c.b16 %v2360_v2, %v2358_v14  ;;  %v5640_v37 = vpack.c.b16 %v2359_v7, %v2357_v42  ;;  %v5654_v42 = vpop.permute.xlu1 %2417  ;;  %v1185_v14 = vmul.f32 0.2, %v5557_v24  ;;  %v4343_v7 = vor.u32 %v4832_v35, %v4342_v22 }
 0x307   : > { %v1327_v16 = vmax.f32 %v894_v25, %v1199_v60  ;;  %v1311_v29 = vmax.f32 %v5539_v55, %v1183_v28 }
 0x308   : > { %2455 = vrot.lane.b32.xlu0 %v5638_v43, %s5006_s30  ;;  %2453 = vrot.lane.b32.xlu2 %v5640_v37, %s5006_s30  ;;  %v1313_v38 = vmax.f32 %v5557_v24, %v1185_v14 }
 0x309   : > { %v1459_v60 = vsel %vm5134_vm14, %v1327_v16, 0.0  ;;  %v5668_v35 = vsel %vm5134_vm14, %v1311_v29, 0.0 }
 0x30a   : > { %v1527_v3 = vpack.c.bf16 0.0, %v1459_v60  ;;  %v2426_v9 = vpop.permute.xlu2 %2425  ;;  %v5672_v16 = vsel %vm5134_vm14, %v1313_v38, 0.0 }
 0x30b   : > { %v1065_v25 = vpop.f32.mrf.mxu1 }
 0x30c   : > { %v896_v2 = vpop.f32.mrf.mxu0  ;;  %1966 = vmatmul.bf16.gmra.mxu3 %v4347_v17  ;;  %v2362_v28 = vunpack.c.h.b16 %v1527_v3  ;;  %v2361_v14 = vunpack.c.l.b16 %v1527_v3  ;;  %v2422_v25 = vpop.permute.xlu0 %2421 }
 0x30d   : > { %v1201_v32 = vmul.f32 0.2, %v896_v2 }
 0x30e   : > { %v2424_v22 = vpop.permute.xlu1 %2423 }
 0x30f   : > { %v1329_v56 = vmax.f32 %v896_v2, %v1201_v32  ;;  %v1520_v32 = vpack.c.bf16 0.0, %v5672_v16 }
 0x310   : > { %1917 = vmatmul.bf16.gmra.mxu2 %v4343_v7 }
 0x311   : > { %v1461_v48 = vsel %vm5134_vm14, %v1329_v56, 0.0  ;;  %v4352_v56 = vld [vmem:[%s6931_s2 + $0xe8] sm:$0xf0] }
 0x312   : > { %v1528_v17 = vpack.c.bf16 0.0, %v1461_v48  ;;  %v4833_v48 = vld [vmem:[%s6931_s2 + $0xe4] sm:$0xf] }
 0x313   : > { %v1068_v7 = vpop.f32.mrf.mxu1 }
 0x314   : > { %v899_v55 = vpop.f32.mrf.mxu0  ;;  %v2364_v24 = vunpack.c.h.b16 %v1528_v17  ;;  %v2363_v2 = vunpack.c.l.b16 %v1528_v17  ;;  %v4355_v17 = vor.u32 %v4833_v48, %v4352_v56  ;;  %v2428_v56 = vpop.permute.xlu0 %2427 }
 0x315   : > { %v1203_v60 = vmul.f32 0.2, %v899_v55 }
 0x316   : > { %v5681_v38 = vpack.c.b16 %v2364_v24, %v2362_v28  ;;  %v5683_v29 = vpack.c.b16 %v2363_v2, %v2361_v14  ;;  %v4834_v28 = vld [vmem:[%s6931_s2 + $0xe4] sm:$0xf0]  ;;  %v2432_v24 = vpop.permute.xlu2 %2431  ;;  %v2347_v2 = vunpack.c.l.b16 %v1520_v32 }
 0x317   : > { %v1331_v7 = vmax.f32 %v899_v55, %v1203_v60  ;;  %v4351_v52 = vor.u32 %v4834_v28, %v4350_v8  ;;  %v6992_v55 = vpack.c.bf16 0.0, %v5668_v35 }
 0x318   : > { %2459 = vrot.lane.b32.xlu2 %v5681_v38, %s5006_s30  ;;  %2457 = vrot.lane.b32.xlu1 %v5683_v29, %s5006_s30 }
 0x319   : > { %v2345_v60 = vunpack.c.l.b16 %v6992_v55  ;;  %v1463_v41 = vsel %vm5134_vm14, %v1331_v7, 0.0  ;;  %v2470_v7 = vsel %vm340_vm10, %v2422_v25, %v2424_v22 }
 0x31a   : > { %v2430_v14 = vpop.permute.xlu1 %2429  ;;  %v1529_v21 = vpack.c.bf16 0.0, %v1463_v41  ;;  %v4360_v41 = vld [vmem:[%s6931_s2 + $0xf8] sm:$0xf0] }
 0x31b   : > { %v2472_v3 = vsel %vm340_vm10, %v2430_v14, %v2432_v24  ;;  %v1070_v48 = vpop.f32.mrf.mxu1  ;;  %v5703_v54 = vpack.c.b16 %v2347_v2, %v2345_v60  ;;  %v2471_v24 = vsel %vm340_vm10, %v2426_v9, %v2428_v56  ;;  %v4835_v9 = vld [vmem:[%s6931_s2 + $0xf4] sm:$0xf]  ;;  %v1181_v60 = vmul.f32 0.2, %v5532_v13 }
 0x31c   : > { %v901_v44 = vpop.f32.mrf.mxu0  ;;  %2497 = vmatpush.bf16.msra.mxu2 %v2472_v3  ;;  %1971 = vmatmul.bf16.gmra.mxu3 %v4355_v17  ;;  %v1177_v17 = vmul.f32 0.2, %v5509_v4  ;;  %v2366_v28 = vunpack.c.h.b16 %v1529_v21  ;;  %v2365_v2 = vunpack.c.l.b16 %v1529_v21  ;;  %v2469_v21 = vsel %vm340_vm10, %v5654_v42, %v5652_v63  ;;  %v4836_v63 = vld [vmem:[%s6931_s2 + $0xf4] sm:$0xf0] }
 0x31d   : > { %v1205_v33 = vmul.f32 0.2, %v901_v44  ;;  %v4363_v25 = vor.u32 %v4835_v9, %v4360_v41 }
 0x31e   : > { %v1305_v22 = vmax.f32 %v5509_v4, %v1177_v17  ;;  %v4358_v4 = vld [vmem:[%s6931_s2 + $0xf0] sm:$0xf]  ;;  %v1309_v17 = vmax.f32 %v5532_v13, %v1181_v60 }
 0x31f   : > { %v1333_v36 = vmax.f32 %v901_v44, %v1205_v33  ;;  %v4359_v48 = vor.u32 %v4836_v63, %v4358_v4 }
 0x320   : > { %1922 = vmatmul.bf16.gmra.mxu2 %v4351_v52  ;;  %2441 = vrot.lane.b32.xlu2 %v5703_v54, %s5006_s30  ;;  %v1175_v52 = vmul.f32 0.2, %v5495_v47  ;;  %v1437_v42 = vsel %vm5134_vm14, %v1305_v22, 0.0  ;;  %v4790_v22 = vld [vmem:[%s6931_s2 + $0x4] sm:$0xf0] }
 0x321   : > { %v1465_v8 = vsel %vm5134_vm14, %v1333_v36, 0.0  ;;  %2498 = vmatpush.bf16.msra.mxu2 %v2471_v24  ;;  %v1516_v24 = vpack.c.bf16 0.0, %v1437_v42 }
 0x322   : > { %v1530_v3 = vpack.c.bf16 0.0, %v1465_v8  ;;  %v1303_v55 = vmax.f32 %v5495_v47, %v1175_v52  ;;  %v2468_v47 = vsel %vm340_vm10, %v5630_v34, %v5658_v18  ;;  %v1179_v8 = vmul.f32 0.2, %v5515_v46  ;;  %v4368_v52 = vld [vmem:[%s6931_s2 + $0x8] sm:$0xf0] }
 0x323   : > { %v2340_v18 = vunpack.c.h.b16 %v1516_v24 }
 0x324   : > { %v2368_v14 = vunpack.c.h.b16 %v1530_v3  ;;  %v2367_v33 = vunpack.c.l.b16 %v1530_v3  ;;  %v1435_v56 = vsel %vm5134_vm14, %v1303_v55, 0.0  ;;  %v1307_v34 = vmax.f32 %v5515_v46, %v1179_v8 }
 0x325   : > { %2499 = vmatpush.bf16.msra.mxu2 %v2470_v7  ;;  %v1515_v3 = vpack.c.bf16 0.0, %v1435_v56  ;;  %v2348_v7 = vunpack.c.h.b16 %v1520_v32  ;;  %v4367_v55 = vor.u32 %v4790_v22, %v4366_v58  ;;  %v2339_v56 = vunpack.c.l.b16 %v1516_v24  ;;  %v4374_v24 = vld [vmem:[%s6931_s2 + $0x10] sm:$0xf] }
 0x326   : > { %v5719_v44 = vpack.c.b16 %v2368_v14, %v2366_v28  ;;  %v5721_v36 = vpack.c.b16 %v2367_v33, %v2365_v2  ;;  %v1441_v28 = vsel %vm5134_vm14, %v1309_v17, 0.0  ;;  %v6993_v14 = vpack.c.bf16 0.0, %v5668_v35  ;;  %v4789_v33 = vld [vmem:[%s6931_s2 + $0x4] sm:$0xf] }
 0x327   : > { %v2338_v13 = vunpack.c.h.b16 %v1515_v3  ;;  %v1439_v46 = vsel %vm5134_vm14, %v1307_v34, 0.0  ;;  %v1518_v32 = vpack.c.bf16 0.0, %v1441_v28  ;;  %v4371_v35 = vor.u32 %v4789_v33, %v4368_v52  ;;  %v4791_v34 = vld [vmem:[%s6931_s2 + $0x14] sm:$0xf] }
 0x328   : > { %2407 = vrot.lane.b32.xlu2 %v5401_v57, %s5006_s30  ;;  %2463 = vrot.lane.b32.xlu1 %v5719_v44, %s5006_s30  ;;  %v2346_v2 = vunpack.c.h.b16 %v6993_v14  ;;  %v1517_v41 = vpack.c.bf16 0.0, %v1439_v46  ;;  %v2337_v17 = vunpack.c.l.b16 %v1515_v3  ;;  %v4792_v3 = vld [vmem:[%s6931_s2 + $0x14] sm:$0xf0]  ;;  %v4793_v46 = vld [vmem:[%s6931_s2 + $0x24] sm:$0xf] }
 0x329   : > { %2500 = vmatpush.bf16.msra.mxu2 %v2469_v21  ;;  %2461 = vrot.lane.b32.xlu0 %v5721_v36, %s5006_s30  ;;  %v5771_v16 = vpack.c.b16 %v2340_v18, %v2338_v13  ;;  %v2344_v21 = vunpack.c.h.b16 %v1518_v32  ;;  %v4376_v18 = vld [vmem:[%s6931_s2 + $0x18] sm:$0xf0] }
 0x32a   : > { %v5773_v9 = vpack.c.b16 %v2348_v7, %v2346_v2  ;;  %v2342_v4 = vunpack.c.h.b16 %v1517_v41  ;;  %v2341_v63 = vunpack.c.l.b16 %v1517_v41  ;;  %v4379_v28 = vor.u32 %v4791_v34, %v4376_v18 }
 0x32b   : > { %v4375_v2 = vor.u32 %v4792_v3, %v4374_v24 }
 0x32c   : > { %1976 = vmatmul.bf16.gmra.mxu3 %v4363_v25  ;;  %v2343_v25 = vunpack.c.l.b16 %v1518_v32  ;;  %v5787_v42 = vpack.c.b16 %v2344_v21, %v2342_v4  ;;  %v4384_v32 = vld [vmem:[%s6931_s2 + $0x28] sm:$0xf0] }
 0x32d   : > { %2501 = vmatpush.bf16.msra.mxu2 %v2468_v47 }
 0x32e   : > { %v5789_v60 = vpack.c.b16 %v2343_v25, %v2341_v63  ;;  %v4795_v25 = vld [vmem:[%s6931_s2 + $0x34] sm:$0xf]  ;;  %v4796_v63 = vld [vmem:[%s6931_s2 + $0x34] sm:$0xf0] }
 0x330   : > { %1927 = vmatmul.bf16.gmra.mxu2 %v4359_v48  ;;  %2401 = vrot.lane.b32.xlu2 %v5380_v19, %s5006_s30 }
 0x331   : > { %2411 = vrot.lane.b32.xlu1 %v5416_v39, %s5006_s30  ;;  %2409 = vrot.lane.b32.xlu0 %v5418_v40, %s5006_s30 }
 0x338   : > { %2435 = vrot.lane.b32.xlu2 %v5771_v16, %s5006_s30 }
 0x339   : > { %2405 = vrot.lane.b32.xlu1 %v5403_v59, %s5006_s30  ;;  %2443 = vrot.lane.b32.xlu0 %v5773_v9, %s5006_s30 }
 0x33c   : > { %2135 = vmatmul.bf16.vlgmr.msrb.gmra.mxu3 %v4371_v35 }
 0x33f   : > { %v1942_v47 = vpop.f32.mrf.mxu3 }
 0x340   : > { %2086 = vmatmul.bf16.vlgmr.msrb.gmra.mxu2 %v4367_v55  ;;  %2890 = vrot.lane.b32.xlu2 %v5156_v31, %s5005_s29  ;;  %v5805_v31 = vpack.c.b16 %v2339_v56, %v2337_v17  ;;  %v4392_v55 = vld [vmem:[%s6931_s2 + $0x38] sm:$0xf0] }
 0x341   : > { %2439 = vrot.lane.b32.xlu1 %v5787_v42, %s5006_s30  ;;  %2437 = vrot.lane.b32.xlu0 %v5789_v60, %s5006_s30 }
 0x343   : > { %v1893_v48 = vpop.f32.mrf.mxu2 }
 0x344   : > { %v5797_v8 = vadd.f32 %v1942_v47, %v1893_v48 }
 0x347   : > { %v1944_v7 = vpop.f32.mrf.mxu3 }
 0x348   : > { %2896 = vrot.lane.b32.xlu2 %v5165_v49, %s5005_s29 }
 0x349   : > { %2433 = vrot.lane.b32.xlu1 %v5805_v31, %s5006_s30  ;;  %2403 = vrot.lane.b32.xlu0 %v5382_v20, %s5006_s30 }
 0x34b   : > { %v1895_v13 = vpop.f32.mrf.mxu2 }
 0x34c   : > { %v5819_v14 = vadd.f32 %v1944_v7, %v1895_v13  ;;  %2140 = vmatmul.bf16.gmra.mxu3 %v4379_v28  ;;  %v4797_v7 = vld [vmem:[%s6931_s2 + $0x44] sm:$0xf]  ;;  %v4400_v28 = vld [vmem:[%s6931_s2 + $0x48] sm:$0xf0]  ;;  %v4398_v13 = vld [vmem:[%s6931_s2 + $0x40] sm:$0xf] }
 0x34d   : > { %v4403_v3 = vor.u32 %v4797_v7, %v4400_v28  ;;  %v4801_v28 = vld [vmem:[%s6931_s2 + $0x64] sm:$0xf] }
 0x34f   : > { %v1947_v49 = vpop.f32.mrf.mxu3 }
 0x350   : > { %2091 = vmatmul.bf16.gmra.mxu2 %v4375_v2  ;;  %2902 = vrot.lane.b32.xlu2 %v5193_v27, %s5005_s29  ;;  %v4387_v27 = vor.u32 %v4793_v46, %v4384_v32  ;;  %v4798_v2 = vld [vmem:[%s6931_s2 + $0x44] sm:$0xf0] }
 0x351   : > { %2888 = vrot.lane.b32.xlu1 %v5145_v12, %s5005_s29  ;;  %2886 = vrot.lane.b32.xlu0 %v5143_v11, %s5005_s29  ;;  %v4382_v11 = vld [vmem:[%s6931_s2 + $0x20] sm:$0xf]  ;;  %v4794_v12 = vld [vmem:[%s6931_s2 + $0x24] sm:$0xf0] }
 0x352   : > { %v4383_v22 = vor.u32 %v4794_v12, %v4382_v11  ;;  %v4799_v11 = vld [vmem:[%s6931_s2 + $0x54] sm:$0xf]  ;;  %v4408_v12 = vld [vmem:[%s6931_s2 + $0x58] sm:$0xf0] }
 0x353   : > { %v1898_v33 = vpop.f32.mrf.mxu2 }
 0x354   : > { %v5827_v52 = vadd.f32 %v1947_v49, %v1898_v33 }
 0x357   : > { %v1949_v35 = vpop.f32.mrf.mxu3 }
 0x358   : > { %3219 = vrot.lane.b32.xlu2 %v5478_v51, %s5005_s29 }
 0x359   : > { %2894 = vrot.lane.b32.xlu1 %v5167_v50, %s5005_s29  ;;  %2892 = vrot.lane.b32.xlu0 %v5154_v30, %s5005_s29  ;;  %v5855_v30 = vpop.permute.xlu2 %2447 }
 0x35b   : > { %v1900_v41 = vpop.f32.mrf.mxu2 }
 0x35c   : > { %v5847_v58 = vadd.f32 %v1949_v35, %v1900_v41  ;;  %2145 = vmatmul.bf16.gmra.mxu3 %v4387_v27 }
 0x35f   : > { %v1952_v51 = vpop.f32.mrf.mxu3 }
 0x360   : > { %2096 = vmatmul.bf16.gmra.mxu2 %v4383_v22  ;;  %3213 = vrot.lane.b32.xlu2 %v5465_v0, %s5005_s29  ;;  %v4411_v22 = vor.u32 %v4799_v11, %v4408_v12 }
 0x361   : > { %2900 = vrot.lane.b32.xlu1 %v5176_v5, %s5005_s29  ;;  %2898 = vrot.lane.b32.xlu0 %v5178_v6, %s5005_s29  ;;  %v4395_v5 = vor.u32 %v4795_v25, %v4392_v55  ;;  %v4390_v6 = vld [vmem:[%s6931_s2 + $0x30] sm:$0xf] }
 0x362   : > { %v5877_v47 = vpop.permute.xlu2 %2453 }
 0x363   : > { %v1903_v50 = vpop.f32.mrf.mxu2 }
 0x364   : > { %v5857_v21 = vadd.f32 %v1952_v51, %v1903_v50  ;;  %v4406_v51 = vld [vmem:[%s6931_s2 + $0x50] sm:$0xf]  ;;  %v4800_v50 = vld [vmem:[%s6931_s2 + $0x54] sm:$0xf0] }
 0x367   : > { %v1954_v4 = vpop.f32.mrf.mxu3 }
 0x368   : > { %3247 = vrot.lane.b32.xlu2 %v5638_v43, %s5005_s29  ;;  %v4391_v43 = vor.u32 %v4796_v63, %v4390_v6  ;;  %v4407_v6 = vor.u32 %v4800_v50, %v4406_v51  ;;  %v6995_v63 = vld [vmem:[#allocation27_spill] sm:$0xff] }
 0x369   : > { %3223 = vrot.lane.b32.xlu1 %v5498_v10, %s5005_s29  ;;  %3221 = vrot.lane.b32.xlu0 %v5500_v45, %s5005_s29 }
 0x36b   : > { %v1905_v48 = vpop.f32.mrf.mxu2 }
 0x36c   : > { %v5879_v56 = vadd.f32 %v1954_v4, %v1905_v48  ;;  %2150 = vmatmul.bf16.gmra.mxu3 %v4395_v5  ;;  %v2450_v4 = vpop.permute.xlu0 %2449 }
 0x36f   : > { %v1957_v17 = vpop.f32.mrf.mxu3 }
 0x370   : > { %2101 = vmatmul.bf16.gmra.mxu2 %v4391_v43  ;;  %3241 = vrot.lane.b32.xlu2 %v5614_v26, %s5005_s29 }
 0x371   : > { %3217 = vrot.lane.b32.xlu1 %v5480_v23, %s5005_s29  ;;  %3249 = vrot.lane.b32.xlu0 %v5683_v29, %s5005_s29 }
 0x372   : > { %v5887_v10 = vpop.permute.xlu2 %2459 }
 0x373   : > { %v1908_v34 = vpop.f32.mrf.mxu2 }
 0x374   : > { %v5889_v18 = vadd.f32 %v1957_v17, %v1908_v34 }
 0x377   : > { %v1959_v24 = vpop.f32.mrf.mxu3 }
 0x378   : > { %3207 = vrot.lane.b32.xlu2 %v5427_v15, %s5005_s29  ;;  %v4399_v15 = vor.u32 %v4798_v2, %v4398_v13  ;;  %v6996_v2 = vld [vmem:[#allocation26_spill] sm:$0xff] }
 0x379   : > { %3251 = vrot.lane.b32.xlu1 %v5681_v38, %s5005_s29  ;;  %3215 = vrot.lane.b32.xlu0 %v5463_v1, %s5005_s29  ;;  %v5919_v1 = vpop.permute.xlu1 %2445 }
 0x37a   : > { %v5909_v49 = vpop.permute.xlu2 %2441  ;;  %v2456_v17 = vpop.permute.xlu0 %2455 }
 0x37b   : > { %v1910_v33 = vpop.f32.mrf.mxu2 }
 0x37c   : > { %v5911_v46 = vadd.f32 %v1959_v24, %v1910_v33  ;;  %2155 = vmatmul.bf16.gmra.mxu3 %v4403_v3  ;;  %v4416_v24 = vld [vmem:[%s6931_s2 + $0x68] sm:$0xf0]  ;;  %v4414_v33 = vld [vmem:[%s6931_s2 + $0x60] sm:$0xf] }
 0x37d   : > { %v4419_v13 = vor.u32 %v4801_v28, %v4416_v24  ;;  %v2478_v24 = vsel %vm340_vm10, %v5877_v47, %v2456_v17  ;;  %v4422_v17 = vld [vmem:[%s6931_s2 + $0x70] sm:$0xf] }
 0x37f   : > { %v1962_v32 = vpop.f32.mrf.mxu3 }
 0x380   : > { %2106 = vmatmul.bf16.gmra.mxu2 %v4399_v15  ;;  %3201 = vrot.lane.b32.xlu2 %v5418_v40, %s5005_s29  ;;  %v4802_v15 = vld [vmem:[%s6931_s2 + $0x64] sm:$0xf0] }
 0x381   : > { %3245 = vrot.lane.b32.xlu1 %v5640_v37, %s5005_s29  ;;  %3209 = vrot.lane.b32.xlu0 %v5444_v62, %s5005_s29  ;;  %v2452_v25 = vpop.permute.xlu1 %2451 }
 0x382   : > { %v5921_v38 = vpop.permute.xlu2 %2407  ;;  %v2477_v47 = vsel %vm340_vm10, %v2450_v4, %v2452_v25  ;;  %v2476_v25 = vsel %vm340_vm10, %v5919_v1, %v5855_v30 }
 0x383   : > { %v1913_v35 = vpop.f32.mrf.mxu2 }
 0x384   : > { %v5923_v27 = vadd.f32 %v1962_v32, %v1913_v35 }
 0x387   : > { %v1964_v41 = vpop.f32.mrf.mxu3 }
 0x388   : > { %3235 = vrot.lane.b32.xlu2 %v5773_v9, %s5005_s29 }
 0x389   : > { %3211 = vrot.lane.b32.xlu1 %v5442_v61, %s5005_s29  ;;  %3243 = vrot.lane.b32.xlu0 %v5612_v53, %s5005_s29  ;;  %v6994_v53 = vld [vmem:[#allocation25_spill] sm:$0xff] }
 0x38a   : > { %v5943_v55 = vpop.permute.xlu2 %2401  ;;  %v2458_v48 = vpop.permute.xlu1 %2457 }
 0x38b   : > { %v1915_v9 = vpop.f32.mrf.mxu2  ;;  %v2479_v51 = vsel %vm340_vm10, %v2458_v48, %v5887_v10  ;;  %v4424_v10 = vld [vmem:[%s6931_s2 + $0x78] sm:$0xf0] }
 0x38c   : > { %v5945_v5 = vadd.f32 %v1964_v41, %v1915_v9  ;;  %2160 = vmatmul.bf16.gmra.mxu3 %v4411_v22  ;;  %v4415_v22 = vor.u32 %v4802_v15, %v4414_v33  ;;  %v4804_v33 = vld [vmem:[%s6931_s2 + $0x74] sm:$0xf0] }
 0x38f   : > { %v1967_v61 = vpop.f32.mrf.mxu3 }
 0x390   : > { %2111 = vmatmul.bf16.gmra.mxu2 %v4407_v6  ;;  %3229 = vrot.lane.b32.xlu2 %v5789_v60, %s5005_s29 }
 0x391   : > { %3205 = vrot.lane.b32.xlu1 %v6994_v53, %s5005_s29  ;;  %3237 = vrot.lane.b32.xlu0 %v6995_v63, %s5005_s29 }
 0x392   : > { %v5953_v43 = vpop.permute.xlu2 %2435 }
 0x393   : > { %v1918_v34 = vpop.f32.mrf.mxu2 }
 0x394   : > { %v5955_v7 = vadd.f32 %v1967_v61, %v1918_v34 }
 0x397   : > { %v1969_v3 = vpop.f32.mrf.mxu3 }
 0x398   : > { %3195 = vrot.lane.b32.xlu2 %v5382_v20, %s5005_s29 }
 0x399   : > { %3239 = vrot.lane.b32.xlu1 %v6996_v2, %s5005_s29  ;;  %3203 = vrot.lane.b32.xlu0 %v5416_v39, %s5005_s29 }
 0x39a   : > { %v5975_v32 = vpop.permute.xlu2 %2890  ;;  %v2464_v35 = vpop.permute.xlu1 %2463 }
 0x39b   : > { %v1920_v11 = vpop.f32.mrf.mxu2  ;;  %v2462_v20 = vpop.permute.xlu0 %2461 }
 0x39c   : > { %v5977_v12 = vadd.f32 %v1969_v3, %v1920_v11  ;;  %v2480_v41 = vsel %vm340_vm10, %v2462_v20, %v2464_v35  ;;  %2165 = vmatmul.bf16.gmra.mxu3 %v4419_v13  ;;  %v4803_v3 = vld [vmem:[%s6931_s2 + $0x74] sm:$0xf] }
 0x39d   : > { %2546 = vmatpush.bf16.msra.mxu3 %v2480_v41  ;;  %v6997_v13 = vld [vmem:[#allocation8_spill] sm:$0xff]  ;;  %v4427_v2 = vor.u32 %v4803_v3, %v4424_v10  ;;  %v4446_v3 = vld [vmem:[%s6933_s4 + $0x80] sm:$0xf]  ;;  %v4838_v10 = vld [vmem:[%s6933_s4 + $0x84] sm:$0xf0] }
 0x39f   : > { %v1972_v39 = vpop.f32.mrf.mxu3 }
 0x3a0   : > { %2116 = vmatmul.bf16.gmra.mxu2 %v4415_v22  ;;  %3253 = vrot.lane.b32.xlu2 %v5721_v36, %s5005_s29  ;;  %v6998_v22 = vld [vmem:[#allocation23_spill] sm:$0xff] }
 0x3a1   : > { %3233 = vrot.lane.b32.xlu1 %v5703_v54, %s5005_s29  ;;  %3197 = vrot.lane.b32.xlu0 %v5403_v59, %s5005_s29 }
 0x3a2   : > { %2547 = vmatpush.bf16.msra.mxu3 %v2479_v51  ;;  %v5990_v61 = vpop.permute.xlu2 %2896 }
 0x3a3   : > { %v1923_v50 = vpop.f32.mrf.mxu2  ;;  %v2412_v9 = vpop.permute.xlu1 %2411 }
 0x3a4   : > { %v5988_v6 = vadd.f32 %v1972_v39, %v1923_v50  ;;  %v2410_v34 = vpop.permute.xlu0 %2409 }
 0x3a5   : > { %v2467_v28 = vsel %vm340_vm10, %v2410_v34, %v2412_v9 }
 0x3a6   : > { %2502 = vmatpush.bf16.msra.mxu2 %v2467_v28  ;;  %2548 = vmatpush.bf16.msra.mxu3 %v2478_v24  ;;  %v6999_v28 = vld [vmem:[#allocation22_spill] sm:$0xff]  ;;  %v4448_v24 = vld [vmem:[%s6933_s4 + $0x88] sm:$0xf0] }
 0x3a7   : > { %v1974_v48 = vpop.f32.mrf.mxu3 }
 0x3a8   : > { %2914 = vrot.lane.b32.xlu2 %v6997_v13, %s5005_s29 }
 0x3a9   : > { %3199 = vrot.lane.b32.xlu1 %v5401_v57, %s5005_s29  ;;  %3231 = vrot.lane.b32.xlu0 %v5787_v42, %s5005_s29  ;;  %v4423_v42 = vor.u32 %v4804_v33, %v4422_v17  ;;  %v4447_v33 = vor.u32 %v4838_v10, %v4446_v3 }
 0x3aa   : > { %2549 = vmatpush.bf16.msra.mxu3 %v2477_v47  ;;  %v6021_v4 = vpop.permute.xlu2 %2902 }
 0x3ab   : > { %v1925_v15 = vpop.f32.mrf.mxu2  ;;  %v2406_v35 = vpop.permute.xlu1 %2405 }
 0x3ac   : > { %v6014_v11 = vadd.f32 %v1974_v48, %v1925_v15  ;;  %v2444_v20 = vpop.permute.xlu0 %2443  ;;  %v2466_v57 = vsel %vm340_vm10, %v2406_v35, %v5921_v38  ;;  %2170 = vmatmul.bf16.gmra.mxu3 %v4427_v2  ;;  %v7000_v35 = vld [vmem:[#allocation3_spill] sm:$0xff] }
 0x3ad   : > { %2503 = vmatpush.bf16.msra.mxu2 %v2466_v57  ;;  %v2475_v38 = vsel %vm340_vm10, %v5909_v49, %v2444_v20  ;;  %v4837_v49 = vld [vmem:[%s6933_s4 + $0x84] sm:$0xf]  ;;  %v7001_v20 = vld [vmem:[#allocation24_spill] sm:$0xff] }
 0x3ae   : > { %2550 = vmatpush.bf16.msra.mxu3 %v2476_v25  ;;  %v4451_v47 = vor.u32 %v4837_v49, %v4448_v24 }
 0x3af   : > { %v1977_v41 = vpop.f32.mrf.mxu3 }
 0x3b0   : > { %2121 = vmatmul.bf16.gmra.mxu2 %v4423_v42  ;;  %2948 = vrot.lane.b32.xlu2 %v6998_v22, %s5005_s29 }
 0x3b1   : > { %3193 = vrot.lane.b32.xlu1 %v5380_v19, %s5005_s29  ;;  %3225 = vrot.lane.b32.xlu0 %v5805_v31, %s5005_s29 }
 0x3b2   : > { %2551 = vmatpush.bf16.msra.mxu3 %v2475_v38  ;;  %v6034_v34 = vpop.permute.xlu2 %3219  ;;  %v7003_v38 = vld [vmem:[#allocation2_spill] sm:$0xff] }
 0x3b3   : > { %v1928_v39 = vpop.f32.mrf.mxu2  ;;  %v2440_v30 = vpop.permute.xlu1 %2439 }
 0x3b4   : > { %v6031_v1 = vadd.f32 %v1977_v41, %v1928_v39  ;;  %v2438_v51 = vpop.permute.xlu0 %2437  ;;  %v7005_v39 = vld [vmem:[#allocation6_spill] sm:$0xff] }
 0x3b5   : > { %v2474_v50 = vsel %vm340_vm10, %v2438_v51, %v2440_v30 }
 0x3b6   : > { %2552 = vmatpush.bf16.msra.mxu3 %v2474_v50 }
 0x3b7   : > { %v1979_v9 = vpop.f32.mrf.mxu3 }
 0x3b8   : > { %2942 = vrot.lane.b32.xlu2 %v6999_v28, %s5005_s29 }
 0x3b9   : > { %3227 = vrot.lane.b32.xlu1 %v5771_v16, %s5005_s29  ;;  %3255 = vrot.lane.b32.xlu0 %v5719_v44, %s5005_s29 }
 0x3bb   : > { %v1930_v16 = vpop.f32.mrf.mxu2  ;;  %v2434_v48 = vpop.permute.xlu1 %2433 }
 0x3bc   : > { %v6054_v13 = vadd.f32 %v1979_v9, %v1930_v16  ;;  %v2404_v44 = vpop.permute.xlu0 %2403  ;;  %v2473_v2 = vsel %vm340_vm10, %v2434_v48, %v5953_v43  ;;  %v6066_v43 = vpop.permute.xlu2 %3213  ;;  %v7008_v16 = vld [vmem:[#allocation21_spill] sm:$0xff] }
 0x3bd   : > { %v2465_v17 = vsel %vm340_vm10, %v5943_v55, %v2404_v44  ;;  %2553 = vmatpush.bf16.msra.mxu3 %v2473_v2  ;;  %v7002_v55 = vld [vmem:[#allocation7_spill] sm:$0xff] }
 0x3be   : > { %2504 = vmatpush.bf16.msra.mxu2 %v2465_v17 }
 0x3bf   : > { %v2136_v15 = vpop.f32.mrf.mxu3 }
 0x3c0   : > { %2554 = vmatmul.bf16.vlgmr.msra.gmra.mxu3 %v4451_v47  ;;  %2908 = vrot.lane.b32.xlu2 %v7000_v35, %s5005_s29 }
 0x3c1   : > { %2740 = vmatpush.bf16.msrb.mxu3 %v5721_v36  ;;  %2505 = vmatmul.bf16.vlgmr.msra.gmra.mxu2 %v4447_v33  ;;  %v4464_v33 = vld [vmem:[%s6933_s4 + $0xa8] sm:$0xf0] }
 0x3c2   : > { %2691 = vmatpush.bf16.msrb.mxu2 %v5500_v45  ;;  %2946 = vrot.lane.b32.xlu1 %v7001_v20, %s5005_s29 }
 0x3c3   : > { %2916 = vrot.lane.b32.xlu0 %v7002_v55, %s5005_s29  ;;  %v2087_v36 = vpop.f32.mrf.mxu2  ;;  %v2889_v45 = vpop.permute.xlu1 %2888 }
 0x3c4   : > { %v2088_v57 = vadd.f32 %v2087_v36, %v5797_v8  ;;  %v2887_v42 = vpop.permute.xlu0 %2886  ;;  %v4456_v8 = vld [vmem:[%s6933_s4 + $0x98] sm:$0xf0]  ;;  %v6100_v50 = vpop.permute.xlu2 %3247 }
 0x3c5   : > { %2741 = vmatpush.bf16.msrb.mxu3 %v5683_v29  ;;  %v6074_v25 = vsel %vm355_vm9, %v2887_v42, %v2889_v45  ;;  %v4839_v29 = vld [vmem:[%s6933_s4 + $0x94] sm:$0xf] }
 0x3c6   : > { %2692 = vmatpush.bf16.msrb.mxu2 %v5480_v23  ;;  %v6076_v41 = vadd.f32 %v2136_v15, %v2088_v57  ;;  %v7004_v23 = vld [vmem:[#allocation5_spill] sm:$0xff]  ;;  %v4459_v49 = vor.u32 %v4839_v29, %v4456_v8  ;;  %v7011_v15 = vld [vmem:[#allocation20_spill] sm:$0xff] }
 0x3c7   : > { %v2138_v22 = vpop.f32.mrf.mxu3 }
 0x3c8   : > { %2904 = vrot.lane.b32.xlu2 %v7003_v38, %s5005_s29 }
 0x3c9   : > { %2742 = vmatpush.bf16.msrb.mxu3 %v5640_v37  ;;  %v4840_v37 = vld [vmem:[%s6933_s4 + $0x94] sm:$0xf0] }
 0x3ca   : > { %2693 = vmatpush.bf16.msrb.mxu2 %v5465_v0  ;;  %2912 = vrot.lane.b32.xlu1 %v7004_v23, %s5005_s29  ;;  %v4454_v0 = vld [vmem:[%s6933_s4 + $0x90] sm:$0xf]  ;;  %v7012_v23 = vld [vmem:[#allocation10_spill] sm:$0xff] }
 0x3cb   : > { %2910 = vrot.lane.b32.xlu0 %v7005_v39, %s5005_s29  ;;  %v2089_v30 = vpop.f32.mrf.mxu2  ;;  %v2895_v51 = vpop.permute.xlu1 %2894  ;;  %v4455_v24 = vor.u32 %v4840_v37, %v4454_v0 }
 0x3cc   : > { %v2090_v9 = vadd.f32 %v2089_v30, %v5819_v14  ;;  %v2893_v28 = vpop.permute.xlu0 %2892  ;;  %v7006_v14 = vld [vmem:[#allocation16_spill] sm:$0xff]  ;;  %v6127_v2 = vpop.permute.xlu2 %3241 }
 0x3cd   : > { %2743 = vmatpush.bf16.msrb.mxu3 %v5614_v26  ;;  %v6105_v26 = vsel %vm355_vm9, %v2895_v51, %v5990_v61  ;;  %v6109_v3 = vsel %vm355_vm9, %v5975_v32, %v2893_v28  ;;  %v7007_v61 = vld [vmem:[#allocation4_spill] sm:$0xff] }
 0x3ce   : > { %2694 = vmatpush.bf16.msrb.mxu2 %v5444_v62  ;;  %v6111_v10 = vadd.f32 %v2138_v22, %v2090_v9  ;;  %v7015_v9 = vld [vmem:[#allocation13_spill] sm:$0xff]  ;;  %v4843_v28 = vld [vmem:[%s6933_s4 + $0xb4] sm:$0xf] }
 0x3cf   : > { %v2141_v62 = vpop.f32.mrf.mxu3 }
 0x3d0   : > { %2559 = vmatmul.bf16.gmra.mxu3 %v4459_v49  ;;  %2930 = vrot.lane.b32.xlu2 %v7006_v14, %s5005_s29  ;;  %v4472_v49 = vld [vmem:[%s6933_s4 + $0xb8] sm:$0xf0] }
 0x3d1   : > { %2744 = vmatpush.bf16.msrb.mxu3 %v6995_v63  ;;  %2510 = vmatmul.bf16.gmra.mxu2 %v4455_v24  ;;  %v7016_v24 = vld [vmem:[#allocation15_spill] sm:$0xff] }
 0x3d2   : > { %2695 = vmatpush.bf16.msrb.mxu2 %v6994_v53  ;;  %2906 = vrot.lane.b32.xlu1 %v7007_v61, %s5005_s29 }
 0x3d3   : > { %2944 = vrot.lane.b32.xlu0 %v7008_v16, %s5005_s29  ;;  %v2092_v32 = vpop.f32.mrf.mxu2  ;;  %v2901_v63 = vpop.permute.xlu1 %2900 }
 0x3d4   : > { %v2093_v53 = vadd.f32 %v2092_v32, %v5827_v52  ;;  %v2899_v48 = vpop.permute.xlu0 %2898  ;;  %v4841_v52 = vld [vmem:[%s6933_s4 + $0xa4] sm:$0xf]  ;;  %v6157_v38 = vpop.permute.xlu2 %3207 }
 0x3d5   : > { %2745 = vmatpush.bf16.msrb.mxu3 %v5703_v54  ;;  %v6125_v44 = vsel %vm355_vm9, %v2899_v48, %v2901_v63  ;;  %v7009_v54 = vld [vmem:[#allocation14_spill] sm:$0xff]  ;;  %v4467_v45 = vor.u32 %v4841_v52, %v4464_v33  ;;  %v4475_v63 = vor.u32 %v4843_v28, %v4472_v49  ;;  %v7017_v52 = vld [vmem:[#allocation11_spill] sm:$0xff] }
 0x3d6   : > { %2696 = vmatpush.bf16.msrb.mxu2 %v5418_v40  ;;  %v6129_v47 = vadd.f32 %v2141_v62, %v2093_v53  ;;  %v7010_v40 = vld [vmem:[#allocation19_spill] sm:$0xff]  ;;  %v4844_v62 = vld [vmem:[%s6933_s4 + $0xb4] sm:$0xf0] }
 0x3d7   : > { %v2143_v17 = vpop.f32.mrf.mxu3 }
 0x3d8   : > { %2928 = vrot.lane.b32.xlu2 %v7009_v54, %s5005_s29 }
 0x3d9   : > { %2746 = vmatpush.bf16.msrb.mxu3 %v5789_v60  ;;  %v4842_v60 = vld [vmem:[%s6933_s4 + $0xa4] sm:$0xf0] }
 0x3da   : > { %2697 = vmatpush.bf16.msrb.mxu2 %v5403_v59  ;;  %2940 = vrot.lane.b32.xlu1 %v7010_v40, %s5005_s29  ;;  %v4462_v59 = vld [vmem:[%s6933_s4 + $0xa0] sm:$0xf] }
 0x3db   : > { %2938 = vrot.lane.b32.xlu0 %v7011_v15, %s5005_s29  ;;  %v2094_v35 = vpop.f32.mrf.mxu2  ;;  %v3224_v20 = vpop.permute.xlu1 %3223  ;;  %v4463_v42 = vor.u32 %v4842_v60, %v4462_v59 }
 0x3dc   : > { %v2095_v55 = vadd.f32 %v2094_v35, %v5847_v58  ;;  %v3222_v36 = vpop.permute.xlu0 %3221  ;;  %v7014_v58 = vld [vmem:[#allocation18_spill] sm:$0xff] }
 0x3dd   : > { %2747 = vmatpush.bf16.msrb.mxu3 %v5805_v31  ;;  %v3264_v57 = vsel %vm355_vm9, %v3222_v36, %v3224_v20  ;;  %v4845_v36 = vld [vmem:[%s6933_s4 + $0xc4] sm:$0xf] }
 0x3de   : > { %2698 = vmatpush.bf16.msrb.mxu2 %v5380_v19  ;;  %v6155_v31 = vadd.f32 %v2143_v17, %v2095_v55  ;;  %v7013_v19 = vld [vmem:[#allocation17_spill] sm:$0xff] }
 0x3df   : > { %v2146_v22 = vpop.f32.mrf.mxu3 }
 0x3e0   : > { %2564 = vmatmul.bf16.gmra.mxu3 %v4467_v45  ;;  %2918 = vrot.lane.b32.xlu2 %v7012_v23, %s5005_s29  ;;  %v4480_v45 = vld [vmem:[%s6933_s4 + $0xc8] sm:$0xf0] }
 0x3e1   : > { %2515 = vmatmul.bf16.gmra.mxu2 %v4463_v42 }
 0x3e2   : > { %3289 = vmatpush.bf16.msra.mxu2 %v3264_v57  ;;  %2936 = vrot.lane.b32.xlu1 %v7013_v19, %s5005_s29  ;;  %v7019_v57 = vld [vmem:[#allocation9_spill] sm:$0xff] }
 0x3e3   : > { %2934 = vrot.lane.b32.xlu0 %v7014_v58, %s5005_s29  ;;  %v2097_v29 = vpop.f32.mrf.mxu2  ;;  %v3218_v8 = vpop.permute.xlu1 %3217 }
 0x3e4   : > { %v2098_v39 = vadd.f32 %v2097_v29, %v5857_v21  ;;  %v3250_v0 = vpop.permute.xlu0 %3249  ;;  %v3263_v37 = vsel %vm355_vm9, %v3218_v8, %v6034_v34  ;;  %v6178_v21 = vpop.permute.xlu2 %3201  ;;  %v4470_v34 = vld [vmem:[%s6933_s4 + $0xb0] sm:$0xf]  ;;  %v4483_v29 = vor.u32 %v4845_v36, %v4480_v45 }
 0x3e5   : > { %v4471_v17 = vor.u32 %v4844_v62, %v4470_v34 }
 0x3e6   : > { %3290 = vmatpush.bf16.msra.mxu2 %v3263_v37  ;;  %v6168_v30 = vadd.f32 %v2146_v22, %v2098_v39 }
 0x3e7   : > { %v2148_v51 = vpop.f32.mrf.mxu3 }
 0x3ea   : > { %2926 = vrot.lane.b32.xlu1 %v7015_v9, %s5005_s29 }
 0x3eb   : > { %2932 = vrot.lane.b32.xlu0 %v7016_v24, %s5005_s29  ;;  %v2099_v14 = vpop.f32.mrf.mxu2  ;;  %v3252_v61 = vpop.permute.xlu1 %3251 }
 0x3ec   : > { %v2100_v16 = vadd.f32 %v2099_v14, %v5879_v56  ;;  %v3216_v32 = vpop.permute.xlu0 %3215  ;;  %v6190_v53 = vsel %vm355_vm9, %v3250_v0, %v3252_v61  ;;  %v7018_v56 = vld [vmem:[#allocation12_spill] sm:$0xff]  ;;  %v6200_v59 = vpop.permute.xlu2 %3235  ;;  %v4488_v61 = vld [vmem:[%s6933_s4 + $0xd8] sm:$0xf0] }
 0x3ed   : > { %v3262_v48 = vsel %vm355_vm9, %v6066_v43, %v3216_v32  ;;  %v4847_v14 = vld [vmem:[%s6933_s4 + $0xd4] sm:$0xf] }
 0x3ee   : > { %v6194_v54 = vadd.f32 %v2148_v51, %v2100_v16  ;;  %3291 = vmatpush.bf16.msra.mxu2 %v3262_v48 }
 0x3ef   : > { %v2151_v40 = vpop.f32.mrf.mxu3 }
 0x3f0   : > { %2569 = vmatmul.bf16.gmra.mxu3 %v4475_v63 }
 0x3f1   : > { %2520 = vmatmul.bf16.gmra.mxu2 %v4471_v17  ;;  %v4491_v17 = vor.u32 %v4847_v14, %v4488_v61 }
 0x3f2   : > { %2924 = vrot.lane.b32.xlu1 %v7017_v52, %s5005_s29 }
 0x3f3   : > { %2922 = vrot.lane.b32.xlu0 %v7018_v56, %s5005_s29  ;;  %v2102_v33 = vpop.f32.mrf.mxu2  ;;  %v3246_v15 = vpop.permute.xlu1 %3245 }
 0x3f4   : > { %v2103_v60 = vadd.f32 %v2102_v33, %v5889_v18  ;;  %v3210_v43 = vpop.permute.xlu0 %3209  ;;  %v6205_v35 = vsel %vm355_vm9, %v3246_v15, %v6100_v50  ;;  %v4478_v18 = vld [vmem:[%s6933_s4 + $0xc0] sm:$0xf]  ;;  %v4846_v50 = vld [vmem:[%s6933_s4 + $0xc4] sm:$0xf0]  ;;  %v6227_v39 = vpop.permute.xlu2 %3229 }
 0x3f5   : > { %v4479_v8 = vor.u32 %v4846_v50, %v4478_v18  ;;  %v4494_v18 = vld [vmem:[%s6933_s4 + $0xe0] sm:$0xf] }
 0x3f6   : > { %v6207_v20 = vadd.f32 %v2151_v40, %v2103_v60 }
 0x3f7   : > { %v2153_v55 = vpop.f32.mrf.mxu3 }
 0x3fb   : > { %2920 = vrot.lane.b32.xlu0 %v7019_v57, %s5005_s29  ;;  %v2104_v42 = vpop.f32.mrf.mxu2  ;;  %v3212_v22 = vpop.permute.xlu1 %3211  ;;  %v4496_v57 = vld [vmem:[%s6933_s4 + $0xe8] sm:$0xf0]  ;;  %s4752_s29 = sshll.u32 %s7025_s21, 7 }
 0x3fc   : > { %v2105_v23 = vadd.f32 %v2104_v42, %v5911_v46  ;;  %v6224_v19 = vpop.permute.xlu0 %3243  ;;  %v3261_v58 = vsel %vm355_vm9, %v3210_v43, %v3212_v22  ;;  %v3196_v62 = vpop.permute.xlu2 %3195  ;;  %s6867_s13 = scalar_lea.vmem %s6935_s6, %s4752_s29 }
 0x3fd   : > { %3292 = vmatpush.bf16.msra.mxu2 %v3261_v58 }
 0x3fe   : > { %v6229_v0 = vadd.f32 %v2153_v55, %v2105_v23 }
 0x3ff   : > { %v2156_v37 = vpop.f32.mrf.mxu3 }
 0x400   : > { %2574 = vmatmul.bf16.gmra.mxu3 %v4483_v29 }
 0x401   : > { %2525 = vmatmul.bf16.gmra.mxu2 %v4479_v8 }
 0x403   : > { %v2107_v51 = vpop.f32.mrf.mxu2  ;;  %v3206_v9 = vpop.permute.xlu1 %3205 }
 0x404   : > { %v2108_v28 = vadd.f32 %v2107_v51, %v5923_v27  ;;  %v6232_v49 = vpop.permute.xlu0 %3237  ;;  %v3260_v46 = vsel %vm355_vm9, %v3206_v9, %v6157_v38  ;;  %v4486_v27 = vld [vmem:[%s6933_s4 + $0xd0] sm:$0xf]  ;;  %v4848_v38 = vld [vmem:[%s6933_s4 + $0xd4] sm:$0xf0]  ;;  %v3254_v15 = vpop.permute.xlu2 %3253 }
 0x405   : > { %3293 = vmatpush.bf16.msra.mxu2 %v3260_v46  ;;  %v4487_v52 = vor.u32 %v4848_v38, %v4486_v27 }
 0x406   : > { %v6236_v24 = vadd.f32 %v2156_v37, %v2108_v28 }
 0x407   : > { %v2158_v34 = vpop.f32.mrf.mxu3 }
 0x40b   : > { %v2109_v16 = vpop.f32.mrf.mxu2  ;;  %v6250_v32 = vpop.permute.xlu1 %3239 }
 0x40c   : > { %v2110_v63 = vadd.f32 %v2109_v16, %v5945_v5  ;;  %v3204_v48 = vpop.permute.xlu0 %3203  ;;  %v2915_v22 = vpop.permute.xlu2 %2914  ;;  %v4851_v16 = vld [vmem:[%s6933_s4 + $0xf4] sm:$0xf] }
 0x40d   : > { %v3259_v40 = vsel %vm355_vm9, %v6178_v21, %v3204_v48  ;;  %v4849_v21 = vld [vmem:[%s6933_s4 + $0xe4] sm:$0xf] }
 0x40e   : > { %v6255_v56 = vadd.f32 %v2158_v34, %v2110_v63  ;;  %3294 = vmatpush.bf16.msra.mxu2 %v3259_v40  ;;  %v4499_v8 = vor.u32 %v4849_v21, %v4496_v57  ;;  %v4504_v63 = vld [vmem:[%s6933_s4 + $0xf8] sm:$0xf0] }
 0x40f   : > { %v2161_v33 = vpop.f32.mrf.mxu3 }
 0x410   : > { %2579 = vmatmul.bf16.gmra.mxu3 %v4491_v17 }
 0x411   : > { %2530 = vmatmul.bf16.gmra.mxu2 %v4487_v52 }
 0x413   : > { %v2112_v60 = vpop.f32.mrf.mxu2  ;;  %v6257_v43 = vpop.permute.xlu1 %3233 }
 0x414   : > { %v2113_v55 = vadd.f32 %v2112_v60, %v5955_v7  ;;  %v3198_v36 = vpop.permute.xlu0 %3197  ;;  %v4850_v7 = vld [vmem:[%s6933_s4 + $0xe4] sm:$0xf0]  ;;  %v2949_v61 = vpop.permute.xlu2 %2948 }
 0x415   : > { %v4495_v37 = vor.u32 %v4850_v7, %v4494_v18 }
 0x416   : > { %v6260_v5 = vadd.f32 %v2161_v33, %v2113_v55  ;;  %v4507_v33 = vor.u32 %v4851_v16, %v4504_v63 }
 0x417   : > { %v2163_v45 = vpop.f32.mrf.mxu3 }
 0x41b   : > { %v2114_v50 = vpop.f32.mrf.mxu2  ;;  %v3200_v42 = vpop.permute.xlu1 %3199 }
 0x41c   : > { %v2115_v23 = vadd.f32 %v2114_v50, %v5977_v12  ;;  %v6275_v58 = vpop.permute.xlu0 %3231  ;;  %v3258_v29 = vsel %vm355_vm9, %v3198_v36, %v3200_v42 }
 0x41d   : > { %3295 = vmatpush.bf16.msra.mxu2 %v3258_v29 }
 0x41e   : > { %v6278_v51 = vadd.f32 %v2163_v45, %v2115_v23  ;;  %v2943_v45 = vpop.permute.xlu2 %2942  ;;  %v3269_v23 = vsel %vm355_vm9, %v6127_v2, %v6224_v19 }
 0x41f   : > { %v2166_v9 = vpop.f32.mrf.mxu3 }
 0x420   : > { %2584 = vmatmul.bf16.gmra.mxu3 %v4499_v8  ;;  %v4510_v8 = vld [vmem:[%s6933_s4] sm:$0xf] }
 0x421   : > { %2535 = vmatmul.bf16.gmra.mxu2 %v4495_v37 }
 0x423   : > { %v2117_v28 = vpop.f32.mrf.mxu2  ;;  %v3194_v46 = vpop.permute.xlu1 %3193 }
 0x424   : > { %v2118_v34 = vadd.f32 %v2117_v28, %v5988_v6  ;;  %v6281_v14 = vpop.permute.xlu0 %3225  ;;  %v3257_v12 = vsel %vm355_vm9, %v3194_v46, %v3196_v62  ;;  %v4502_v6 = vld [vmem:[%s6933_s4 + $0xf0] sm:$0xf]  ;;  %v4852_v62 = vld [vmem:[%s6933_s4 + $0xf4] sm:$0xf0] }
 0x425   : > { %3296 = vmatpush.bf16.msra.mxu2 %v3257_v12  ;;  %v4503_v55 = vor.u32 %v4852_v62, %v4502_v6 }
 0x426   : > { %v6284_v27 = vadd.f32 %v2166_v9, %v2118_v34  ;;  %v2909_v29 = vpop.permute.xlu2 %2908  ;;  %v3268_v34 = vsel %vm355_vm9, %v6232_v49, %v6250_v32 }
 0x427   : > { %v2168_v38 = vpop.f32.mrf.mxu3 }
 0x42b   : > { %v2119_v48 = vpop.f32.mrf.mxu2  ;;  %v3228_v17 = vpop.permute.xlu1 %3227 }
 0x42c   : > { %v2120_v40 = vadd.f32 %v2119_v48, %v6014_v11  ;;  %v3256_v52 = vpop.permute.xlu0 %3255 }
 0x42d   : > { %v3272_v60 = vsel %vm355_vm9, %v3254_v15, %v3256_v52  ;;  %v4807_v52 = vld [vmem:[%s6933_s4 + $0x14] sm:$0xf] }
 0x42e   : > { %v6300_v36 = vadd.f32 %v2168_v38, %v2120_v40  ;;  %3338 = vmatpush.bf16.msra.mxu3 %v3272_v60  ;;  %v3267_v38 = vsel %vm355_vm9, %v6257_v43, %v6200_v59  ;;  %v2905_v48 = vpop.permute.xlu2 %2904  ;;  %v3266_v40 = vsel %vm355_vm9, %v6227_v39, %v6275_v58  ;;  %v3265_v43 = vsel %vm355_vm9, %v6281_v14, %v3228_v17  ;;  %v4518_v39 = vld [vmem:[%s6933_s4 + $0x10] sm:$0xf] }
 0x42f   : > { %v2171_v21 = vpop.f32.mrf.mxu3  ;;  %v2954_v59 = vsel %vm355_vm9, %v6021_v4, %v2905_v48  ;;  %v4808_v4 = vld [vmem:[%s6933_s4 + $0x14] sm:$0xf0] }
 0x430   : > { %2589 = vmatmul.bf16.gmra.mxu3 %v4507_v33  ;;  %v4520_v33 = vld [vmem:[%s6933_s4 + $0x18] sm:$0xf0] }
 0x431   : > { %2540 = vmatmul.bf16.gmra.mxu2 %v4503_v55  ;;  %v4523_v55 = vor.u32 %v4807_v52, %v4520_v33  ;;  %v4534_v52 = vld [vmem:[%s6933_s4 + $0x30] sm:$0xf]  ;;  %v4811_v33 = vld [vmem:[%s6933_s4 + $0x34] sm:$0xf] }
 0x432   : > { %3339 = vmatpush.bf16.msra.mxu3 %v6190_v53  ;;  %v4805_v53 = vld [vmem:[%s6933_s4 + $0x4] sm:$0xf] }
 0x433   : > { %v2122_v57 = vpop.f32.mrf.mxu2 }
 0x434   : > { %v2947_v18 = vpop.permute.xlu1 %2946  ;;  %v2123_v7 = vadd.f32 %v2122_v57, %v6031_v1  ;;  %v4512_v1 = vld [vmem:[%s6933_s4 + $0x8] sm:$0xf0]  ;;  %v4519_v57 = vor.u32 %v4808_v4, %v4518_v39  ;;  %v4536_v39 = vld [vmem:[%s6933_s4 + $0x38] sm:$0xf0]  ;;  %v4812_v4 = vld [vmem:[%s6933_s4 + $0x34] sm:$0xf0] }
 0x435   : > { %v2917_v50 = vpop.permute.xlu0 %2916  ;;  %v2965_v11 = vsel %vm355_vm9, %v2947_v18, %v2949_v61  ;;  %v4515_v28 = vor.u32 %v4805_v53, %v4512_v1  ;;  %v4854_v53 = vld [vmem:[%s6931_s2 + $0x104] sm:$0xf0] }
 0x436   : > { %v2957_v42 = vsel %vm355_vm9, %v2915_v22, %v2917_v50  ;;  %3031 = vmatpush.bf16.msrb.mxu1 %v2965_v11  ;;  %v6306_v15 = vadd.f32 %v2171_v21, %v2123_v7  ;;  %3340 = vmatpush.bf16.msra.mxu3 %v6205_v35  ;;  %v4806_v35 = vld [vmem:[%s6933_s4 + $0x4] sm:$0xf0]  ;;  %v2931_v1 = vpop.permute.xlu2 %2930 }
 0x437   : > { %2982 = vmatpush.bf16.msrb.mxu0 %v2957_v42  ;;  %v2173_v22 = vpop.f32.mrf.mxu3  ;;  %v4511_v12 = vor.u32 %v4806_v35, %v4510_v8  ;;  %v4810_v8 = vld [vmem:[%s6933_s4 + $0x24] sm:$0xf0] }
 0x43a   : > { %3341 = vmatpush.bf16.msra.mxu3 %v3269_v23 }
 0x43b   : > { %v2124_v2 = vpop.f32.mrf.mxu2 }
 0x43c   : > { %v2913_v19 = vpop.permute.xlu1 %2912  ;;  %v2125_v37 = vadd.f32 %v2124_v2, %v6054_v13 }
 0x43d   : > { %v2911_v9 = vpop.permute.xlu0 %2910 }
 0x43e   : > { %v2956_v46 = vsel %vm355_vm9, %v2911_v9, %v2913_v19  ;;  %v6329_v61 = vadd.f32 %v2173_v22, %v2125_v37  ;;  %3342 = vmatpush.bf16.msra.mxu3 %v3268_v34  ;;  %v4526_v22 = vld [vmem:[%s6933_s4 + $0x20] sm:$0xf] }
 0x43f   : > { %2983 = vmatpush.bf16.msrb.mxu0 %v2956_v46  ;;  %v4527_v46 = vor.u32 %v4810_v8, %v4526_v22  ;;  %v3403_v34 = vld [vmem:[%s6932_s3] sm:$0xff] }
 0x440   : > { %2748 = vmatmul.bf16.vlgmr.msrb.gmra.mxu3 %v4515_v28  ;;  %v4542_v8 = vld [vmem:[%s6933_s4 + $0x40] sm:$0xf] }
 0x441   : > { %2699 = vmatmul.bf16.vlgmr.msrb.gmra.mxu2 %v4511_v12  ;;  %v5009_v12 = vmov 0  }
 0x442   : > { %3343 = vmatpush.bf16.msra.mxu3 %v3267_v38  ;;  %4914 = vset.pattern.permute.xlu1 %v5009_v12  ;;  %v2929_v38 = vpop.permute.xlu2 %2928 }
 0x443   : > { %v2555_v16 = vpop.f32.mrf.mxu3  ;;  %3421 = vperm.xlu1 %4914, %v3403_v34   ;;  %4916 = vset.pattern.permute.xlu0 %v5009_v12 }
 0x444   : > { %v2907_v13 = vpop.permute.xlu1 %2906  ;;  %v2506_v63 = vpop.f32.mrf.mxu2  ;;  %4915 = vset.pattern.permute.xlu2 %v5009_v12 }
 0x445   : > { %v2945_v6 = vpop.permute.xlu0 %2944  ;;  %v2955_v62 = vsel %vm355_vm9, %v2907_v13, %v2909_v29  ;;  %v6335_v49 = vadd.f32 %v2555_v16, %v2506_v63  ;;  %v4809_v29 = vld [vmem:[%s6933_s4 + $0x24] sm:$0xf] }
 0x446   : > { %2984 = vmatpush.bf16.msrb.mxu0 %v2955_v62  ;;  %v2964_v32 = vsel %vm355_vm9, %v2943_v45, %v2945_v6  ;;  %3344 = vmatpush.bf16.msra.mxu3 %v3266_v40  ;;  %v4598_v40 = vld [vmem:[%s6931_s2 + $0x110] sm:$0xf] }
 0x447   : > { %3032 = vmatpush.bf16.msrb.mxu1 %v2964_v32 }
 0x44a   : > { %2985 = vmatpush.bf16.msrb.mxu0 %v2954_v59  ;;  %3345 = vmatpush.bf16.msra.mxu3 %v3265_v43  ;;  %v4856_v59 = vld [vmem:[%s6931_s2 + $0x114] sm:$0xf0] }
 0x44b   : > { %v2557_v60 = vpop.f32.mrf.mxu3  ;;  %v4599_v43 = vor.u32 %v4856_v59, %v4598_v40  ;;  %v4860_v40 = vld [vmem:[%s6931_s2 + $0x134] sm:$0xf0]  ;;  %v3408_v59 = vld [vmem:[%s6932_s3 + $0x28] sm:$0xff] }
 0x44c   : > { %v2941_v58 = vpop.permute.xlu1 %2940  ;;  %v2508_v14 = vpop.f32.mrf.mxu2 }
 0x44d   : > { %v2939_v17 = vpop.permute.xlu0 %2938  ;;  %v6357_v45 = vadd.f32 %v2557_v60, %v2508_v14  ;;  %v4592_v60 = vld [vmem:[%s6931_s2 + $0x108] sm:$0xf0]  ;;  %v2919_v14 = vpop.permute.xlu2 %2918 }
 0x44e   : > { %2986 = vmatpush.bf16.msrb.mxu0 %v6125_v44  ;;  %v2963_v21 = vsel %vm355_vm9, %v2939_v17, %v2941_v58  ;;  %v4590_v44 = vld [vmem:[%s6931_s2 + $0x100] sm:$0xf]  ;;  %v4853_v58 = vld [vmem:[%s6931_s2 + $0x104] sm:$0xf] }
 0x44f   : > { %3033 = vmatpush.bf16.msrb.mxu1 %v2963_v21 }
 0x450   : > { %2753 = vmatmul.bf16.gmra.mxu3 %v4523_v55 }
 0x451   : > { %2704 = vmatmul.bf16.gmra.mxu2 %v4519_v57  ;;  %v4539_v57 = vor.u32 %v4811_v33, %v4536_v39  ;;  %v4815_v33 = vld [vmem:[%s6933_s4 + $0x54] sm:$0xf]  ;;  %v4552_v39 = vld [vmem:[%s6933_s4 + $0x58] sm:$0xf0] }
 0x452   : > { %2987 = vmatpush.bf16.msrb.mxu0 %v6105_v26  ;;  %v4591_v26 = vor.u32 %v4854_v53, %v4590_v44 }
 0x453   : > { %v2560_v7 = vpop.f32.mrf.mxu3 }
 0x454   : > { %v2937_v18 = vpop.permute.xlu1 %2936  ;;  %v2511_v50 = vpop.f32.mrf.mxu2 }
 0x455   : > { %v2935_v11 = vpop.permute.xlu0 %2934  ;;  %v6362_v42 = vadd.f32 %v2560_v7, %v2511_v50  ;;  %v4535_v50 = vor.u32 %v4812_v4, %v4534_v52  ;;  %v4550_v52 = vld [vmem:[%s6933_s4 + $0x50] sm:$0xf]  ;;  %v4816_v4 = vld [vmem:[%s6933_s4 + $0x54] sm:$0xf0] }
 0x456   : > { %2988 = vmatpush.bf16.msrb.mxu0 %v6109_v3  ;;  %v2962_v23 = vsel %vm355_vm9, %v2935_v11, %v2937_v18  ;;  %v4528_v3 = vld [vmem:[%s6933_s4 + $0x28] sm:$0xf0]  ;;  %v4595_v11 = vor.u32 %v4853_v58, %v4592_v60  ;;  %v4857_v58 = vld [vmem:[%s6931_s2 + $0x124] sm:$0xf] }
 0x457   : > { %3034 = vmatpush.bf16.msrb.mxu1 %v2962_v23  ;;  %v4531_v37 = vor.u32 %v4809_v29, %v4528_v3  ;;  %v3405_v23 = vld [vmem:[%s6932_s3 + $0x10] sm:$0xff]  ;;  %v4858_v29 = vld [vmem:[%s6931_s2 + $0x124] sm:$0xf0]  ;;  %v3406_v3 = vld [vmem:[%s6932_s3 + $0x18] sm:$0xff] }
 0x458   : > { %3431 = vperm.xlu0 %4916, %v3405_v23   ;;  %3436 = vperm.xlu1 %4914, %v3406_v3   ;;  %v4608_v60 = vld [vmem:[%s6931_s2 + $0x128] sm:$0xf0]  ;;  %v4622_v23 = vld [vmem:[%s6931_s2 + $0x140] sm:$0xf] }
 0x45a   : > { %2989 = vmatpush.bf16.msrb.mxu0 %v6074_v25 }
 0x45b   : > { %v2562_v2 = vpop.f32.mrf.mxu3 }
 0x45c   : > { %v2927_v35 = vpop.permute.xlu1 %2926  ;;  %v2513_v19 = vpop.f32.mrf.mxu2 }
 0x45d   : > { %v2933_v25 = vpop.permute.xlu0 %2932  ;;  %2990 = vmatmul.bf16.vlgmr.msrb.gmra.mxu0 %v4591_v26  ;;  %v6385_v9 = vadd.f32 %v2562_v2, %v2513_v19  ;;  %v2960_v13 = vsel %vm355_vm9, %v2927_v35, %v2929_v38  ;;  %v4606_v26 = vld [vmem:[%s6931_s2 + $0x120] sm:$0xf]  ;;  %v4813_v35 = vld [vmem:[%s6933_s4 + $0x44] sm:$0xf]  ;;  %v4544_v2 = vld [vmem:[%s6933_s4 + $0x48] sm:$0xf0] }
 0x45e   : > { %v2961_v28 = vsel %vm355_vm9, %v2931_v1, %v2933_v25  ;;  %v4607_v22 = vor.u32 %v4858_v29, %v4606_v26  ;;  %v4814_v19 = vld [vmem:[%s6933_s4 + $0x44] sm:$0xf0]  ;;  %v4855_v25 = vld [vmem:[%s6931_s2 + $0x114] sm:$0xf]  ;;  %v4547_v34 = vor.u32 %v4813_v35, %v4544_v2  ;;  %v3407_v26 = vld [vmem:[%s6932_s3 + $0x20] sm:$0xff] }
 0x45f   : > { %3035 = vmatpush.bf16.msrb.mxu1 %v2961_v28  ;;  %v4543_v38 = vor.u32 %v4814_v19, %v4542_v8  ;;  %v3410_v29 = vld [vmem:[%s6932_s3 + $0x38] sm:$0xff]  ;;  %v4817_v8 = vld [vmem:[%s6933_s4 + $0x64] sm:$0xf]  ;;  %v4560_v35 = vld [vmem:[%s6933_s4 + $0x68] sm:$0xf0] }
 0x460   : > { %2758 = vmatmul.bf16.gmra.mxu3 %v4531_v37  ;;  %v4600_v37 = vld [vmem:[%s6931_s2 + $0x118] sm:$0xf0]  ;;  %3446 = vperm.xlu1 %4914, %v3408_v59   ;;  %v4818_v2 = vld [vmem:[%s6933_s4 + $0x64] sm:$0xf0]  ;;  %v4859_v19 = vld [vmem:[%s6931_s2 + $0x134] sm:$0xf] }
 0x461   : > { %2709 = vmatmul.bf16.gmra.mxu2 %v4527_v46  ;;  %3456 = vperm.xlu0 %4916, %v3410_v29   ;;  %v4864_v59 = vld [vmem:[%s6931_s2 + $0x154] sm:$0xf0] }
 0x463   : > { %3036 = vmatpush.bf16.msrb.mxu1 %v2960_v13  ;;  %v2565_v63 = vpop.f32.mrf.mxu3  ;;  %v4603_v13 = vor.u32 %v4855_v25, %v4600_v37  ;;  %v4616_v25 = vld [vmem:[%s6931_s2 + $0x138] sm:$0xf0] }
 0x464   : > { %v2925_v16 = vpop.permute.xlu1 %2924  ;;  %v2516_v6 = vpop.f32.mrf.mxu2 }
 0x465   : > { %v2923_v62 = vpop.permute.xlu0 %2922  ;;  %v6392_v48 = vadd.f32 %v2565_v63, %v2516_v6 }
 0x466   : > { %v2959_v32 = vsel %vm355_vm9, %v2923_v62, %v2925_v16  ;;  %v3404_v16 = vld [vmem:[%s6932_s3 + $0x8] sm:$0xff] }
 0x467   : > { %3037 = vmatpush.bf16.msrb.mxu1 %v2959_v32  ;;  %3426 = vperm.xlu2 %4915, %v3404_v16   ;;  %v4614_v32 = vld [vmem:[%s6931_s2 + $0x130] sm:$0xf]  ;;  %v3411_v16 = vld [vmem:[%s6932_s3 + $0x40] sm:$0xff] }
 0x468   : > { %3461 = vperm.xlu1 %4914, %v3411_v16   ;;  %v4870_v16 = vld [vmem:[%s6933_s4 + $0x104] sm:$0xf0] }
 0x46b   : > { %v2567_v17 = vpop.f32.mrf.mxu3 }
 0x46c   : > { %v2518_v55 = vpop.f32.mrf.mxu2 }
 0x46d   : > { %v2921_v21 = vpop.permute.xlu0 %2920  ;;  %2995 = vmatmul.bf16.gmra.mxu0 %v4599_v43  ;;  %v6419_v18 = vadd.f32 %v2567_v17, %v2518_v55  ;;  %v4615_v43 = vor.u32 %v4860_v40, %v4614_v32  ;;  %v4555_v55 = vor.u32 %v4815_v33, %v4552_v39  ;;  %v4630_v40 = vld [vmem:[%s6931_s2 + $0x150] sm:$0xf] }
 0x46e   : > { %v2958_v7 = vsel %vm355_vm9, %v2919_v14, %v2921_v21  ;;  %v4631_v33 = vor.u32 %v4864_v59, %v4630_v40  ;;  %v4566_v39 = vld [vmem:[%s6933_s4 + $0x70] sm:$0xf] }
 0x46f   : > { %3038 = vmatpush.bf16.msrb.mxu1 %v2958_v7  ;;  %v4611_v7 = vor.u32 %v4857_v58, %v4608_v60  ;;  %3441 = vperm.xlu2 %4915, %v3407_v26   ;;  %v4568_v58 = vld [vmem:[%s6933_s4 + $0x78] sm:$0xf0]  ;;  %v4820_v60 = vld [vmem:[%s6933_s4 + $0x74] sm:$0xf0]  ;;  %v3416_v26 = vld [vmem:[%s6932_s3 + $0x68] sm:$0xff] }
 0x470   : > { %2763 = vmatmul.bf16.gmra.mxu3 %v4539_v57  ;;  %v4551_v57 = vor.u32 %v4816_v4, %v4550_v52  ;;  %v3409_v52 = vld [vmem:[%s6932_s3 + $0x30] sm:$0xff] }
 0x471   : > { %2714 = vmatmul.bf16.gmra.mxu2 %v4535_v50  ;;  %v4819_v4 = vld [vmem:[%s6933_s4 + $0x74] sm:$0xf] }
 0x472   : > { %3039 = vmatmul.bf16.vlgmr.msrb.gmra.mxu1 %v4595_v11 }
 0x473   : > { %v2570_v44 = vpop.f32.mrf.mxu3 }
 0x474   : > { %v2521_v53 = vpop.f32.mrf.mxu2 }
 0x475   : > { %v6425_v1 = vadd.f32 %v2570_v44, %v2521_v53  ;;  %v4862_v53 = vld [vmem:[%s6931_s2 + $0x144] sm:$0xf0] }
 0x476   : > { %v4623_v3 = vor.u32 %v4862_v53, %v4622_v23  ;;  %v3414_v53 = vld [vmem:[%s6932_s3 + $0x58] sm:$0xff] }
 0x477   : > { %3451 = vperm.xlu2 %4915, %v3409_v52   ;;  %3476 = vperm.xlu1 %4914, %v3414_v53   ;;  %v4871_v53 = vld [vmem:[%s6933_s4 + $0x114] sm:$0xf] }
 0x47b   : > { %v2572_v28 = vpop.f32.mrf.mxu3 }
 0x47c   : > { %v2523_v46 = vpop.f32.mrf.mxu2 }
 0x47d   : > { %3000 = vmatmul.bf16.gmra.mxu0 %v4607_v22  ;;  %v6454_v12 = vadd.f32 %v2572_v28, %v2523_v46  ;;  %v4558_v22 = vld [vmem:[%s6933_s4 + $0x60] sm:$0xf]  ;;  %v4563_v46 = vor.u32 %v4817_v8, %v4560_v35  ;;  %v4866_v35 = vld [vmem:[%s6931_s2 + $0x164] sm:$0xf0] }
 0x480   : > { %2768 = vmatmul.bf16.gmra.mxu3 %v4547_v34 }
 0x481   : > { %2719 = vmatmul.bf16.gmra.mxu2 %v4543_v38  ;;  %v4559_v38 = vor.u32 %v4818_v2, %v4558_v22  ;;  %v4638_v22 = vld [vmem:[%s6931_s2 + $0x160] sm:$0xf]  ;;  %v3417_v2 = vld [vmem:[%s6932_s3 + $0x70] sm:$0xff] }
 0x482   : > { %3044 = vmatmul.bf16.gmra.mxu1 %v4603_v13  ;;  %v4619_v13 = vor.u32 %v4859_v19, %v4616_v25  ;;  %v3515_v19 = vld [vmem:[%s6934_s5] sm:$0xff]  ;;  %3491 = vperm.xlu1 %4914, %v3417_v2   ;;  %v4639_v25 = vor.u32 %v4866_v35, %v4638_v22  ;;  %v4872_v22 = vld [vmem:[%s6933_s4 + $0x114] sm:$0xf0] }
 0x483   : > { %v2575_v63 = vpop.f32.mrf.mxu3 }
 0x484   : > { %v2526_v6 = vpop.f32.mrf.mxu2 }
 0x485   : > { %v6459_v62 = vadd.f32 %v2575_v63, %v2526_v6 }
 0x48b   : > { %v2577_v14 = vpop.f32.mrf.mxu3 }
 0x48c   : > { %v2528_v17 = vpop.f32.mrf.mxu2 }
 0x48d   : > { %3005 = vmatmul.bf16.gmra.mxu0 %v4615_v43  ;;  %v6488_v21 = vadd.f32 %v2577_v14, %v2528_v17  ;;  %v3413_v43 = vld [vmem:[%s6932_s3 + $0x50] sm:$0xff]  ;;  %v4861_v14 = vld [vmem:[%s6931_s2 + $0x144] sm:$0xf]  ;;  %v4624_v17 = vld [vmem:[%s6931_s2 + $0x148] sm:$0xf0] }
 0x48e   : > { %3471 = vperm.xlu0 %4916, %v3413_v43   ;;  %v4627_v23 = vor.u32 %v4861_v14, %v4624_v17  ;;  %v4868_v14 = vld [vmem:[%s6931_s2 + $0x174] sm:$0xf0] }
 0x490   : > { %2773 = vmatmul.bf16.gmra.mxu3 %v4555_v55 }
 0x491   : > { %2724 = vmatmul.bf16.gmra.mxu2 %v4551_v57 }
 0x492   : > { %3049 = vmatmul.bf16.gmra.mxu1 %v4611_v7  ;;  %v4571_v7 = vor.u32 %v4819_v4, %v4568_v58 }
 0x493   : > { %v2580_v50 = vpop.f32.mrf.mxu3 }
 0x494   : > { %v2531_v11 = vpop.f32.mrf.mxu2 }
 0x495   : > { %v6493_v44 = vadd.f32 %v2580_v50, %v2531_v11  ;;  %v4567_v11 = vor.u32 %v4820_v60, %v4566_v39  ;;  %v3412_v39 = vld [vmem:[%s6932_s3 + $0x48] sm:$0xff]  ;;  %v4646_v60 = vld [vmem:[%s6931_s2 + $0x170] sm:$0xf] }
 0x496   : > { %3486 = vperm.xlu0 %4916, %v3416_v26   ;;  %3466 = vperm.xlu2 %4915, %v3412_v39   ;;  %v4680_v26 = vld [vmem:[%s6933_s4 + $0x118] sm:$0xf0]  ;;  %v4873_v39 = vld [vmem:[%s6933_s4 + $0x124] sm:$0xf] }
 0x49b   : > { %v2582_v37 = vpop.f32.mrf.mxu3 }
 0x49c   : > { %v2533_v28 = vpop.f32.mrf.mxu2 }
 0x49d   : > { %3010 = vmatmul.bf16.gmra.mxu0 %v4623_v3  ;;  %v6522_v34 = vadd.f32 %v2582_v37, %v2533_v28  ;;  %v4863_v37 = vld [vmem:[%s6931_s2 + $0x154] sm:$0xf]  ;;  %v4869_v28 = vld [vmem:[%s6933_s4 + $0x104] sm:$0xf] }
 0x49e   : > { %3533 = vperm.xlu0 %4916, %v3515_v19   ;;  %v4683_v19 = vor.u32 %v4871_v53, %v4680_v26  ;;  %v3520_v26 = vld [vmem:[%s6934_s5 + $0x28] sm:$0xff] }
 0x4a0   : > { %2778 = vmatmul.bf16.gmra.mxu3 %v4563_v46  ;;  %v4672_v46 = vld [vmem:[%s6933_s4 + $0x108] sm:$0xf0] }
 0x4a1   : > { %2729 = vmatmul.bf16.gmra.mxu2 %v4559_v38  ;;  %v4632_v38 = vld [vmem:[%s6931_s2 + $0x158] sm:$0xf0]  ;;  %v4675_v40 = vor.u32 %v4869_v28, %v4672_v46 }
 0x4a2   : > { %3054 = vmatmul.bf16.gmra.mxu1 %v4619_v13  ;;  %v4670_v13 = vld [vmem:[%s6933_s4 + $0x100] sm:$0xf]  ;;  %v4635_v43 = vor.u32 %v4863_v37, %v4632_v38  ;;  %v3418_v46 = vld [vmem:[%s6932_s3 + $0x78] sm:$0xff]  ;;  %v3521_v38 = vld [vmem:[%s6934_s5 + $0x30] sm:$0xff] }
 0x4a3   : > { %v2585_v63 = vpop.f32.mrf.mxu3  ;;  %v4671_v52 = vor.u32 %v4870_v16, %v4670_v13  ;;  %v3522_v13 = vld [vmem:[%s6934_s5 + $0x38] sm:$0xff] }
 0x4a4   : > { %v2536_v6 = vpop.f32.mrf.mxu2 }
 0x4a5   : > { %v6527_v32 = vadd.f32 %v2585_v63, %v2536_v6 }
 0x4ab   : > { %v2587_v55 = vpop.f32.mrf.mxu3 }
 0x4ac   : > { %v2538_v57 = vpop.f32.mrf.mxu2 }
 0x4ad   : > { %3015 = vmatmul.bf16.gmra.mxu0 %v4631_v33  ;;  %v6559_v50 = vadd.f32 %v2587_v55, %v2538_v57  ;;  %v3516_v33 = vld [vmem:[%s6934_s5 + $0x8] sm:$0xff]  ;;  %v3415_v55 = vld [vmem:[%s6932_s3 + $0x60] sm:$0xff]  ;;  %v3518_v57 = vld [vmem:[%s6934_s5 + $0x18] sm:$0xff] }
 0x4ae   : > { %3538 = vperm.xlu1 %4914, %v3516_v33   ;;  %3481 = vperm.xlu2 %4915, %v3415_v55  }
 0x4af   : > { %3548 = vperm.xlu0 %4916, %v3518_v57  }
 0x4b0   : > { %2783 = vmatmul.bf16.gmra.mxu3 %v4571_v7  ;;  %v3519_v7 = vld [vmem:[%s6934_s5 + $0x20] sm:$0xff] }
 0x4b1   : > { %2734 = vmatmul.bf16.gmra.mxu2 %v4567_v11 }
 0x4b2   : > { %3059 = vmatmul.bf16.gmra.mxu1 %v4627_v23  ;;  %v4647_v23 = vor.u32 %v4868_v14, %v4646_v60  ;;  %v4648_v60 = vld [vmem:[%s6931_s2 + $0x178] sm:$0xf0]  ;;  %v4686_v14 = vld [vmem:[%s6933_s4 + $0x120] sm:$0xf] }
 0x4b3   : > { %v2590_v29 = vpop.f32.mrf.mxu3 }
 0x4b4   : > { %v2541_v3 = vpop.f32.mrf.mxu2 }
 0x4b5   : > { %v6570_v8 = vadd.f32 %v2590_v29, %v2541_v3  ;;  %v4640_v29 = vld [vmem:[%s6931_s2 + $0x168] sm:$0xf0]  ;;  %v4678_v3 = vld [vmem:[%s6933_s4 + $0x110] sm:$0xf] }
 0x4b6   : > { %3553 = vperm.xlu1 %4914, %v3519_v7   ;;  %v4679_v28 = vor.u32 %v4872_v22, %v4678_v3  ;;  %3496 = vperm.xlu2 %4915, %v3418_v46   ;;  %v3528_v3 = vld [vmem:[%s6934_s5 + $0x68] sm:$0xff]  ;;  %v4875_v46 = vld [vmem:[%s6933_s4 + $0x134] sm:$0xf] }
 0x4b7   : > { %3563 = vperm.xlu0 %4916, %v3521_v38  }
 0x4bb   : > { %v2592_v63 = vpop.f32.mrf.mxu3 }
 0x4bc   : > { %v2543_v6 = vpop.f32.mrf.mxu2 }
 0x4bd   : > { %3020 = vmatmul.bf16.gmra.mxu0 %v4639_v25  ;;  %v6599_v59 = vadd.f32 %v2592_v63, %v2543_v6 }
 0x4be   : > { %3568 = vperm.xlu1 %4914, %v3522_v13   ;;  %v4694_v13 = vld [vmem:[%s6933_s4 + $0x130] sm:$0xf] }
 0x4c0   : > { %3346 = vmatmul.bf16.vlgmr.msra.gmra.mxu3 %v4675_v40  ;;  %v3517_v40 = vld [vmem:[%s6934_s5 + $0x10] sm:$0xff] }
 0x4c1   : > { %3297 = vmatmul.bf16.vlgmr.msra.gmra.mxu2 %v4671_v52  ;;  %v3525_v52 = vld [vmem:[%s6934_s5 + $0x50] sm:$0xff]  ;;  %3543 = vperm.xlu2 %4915, %v3517_v40  }
 0x4c2   : > { %3064 = vmatmul.bf16.gmra.mxu1 %v4635_v43  ;;  %v3524_v43 = vld [vmem:[%s6934_s5 + $0x48] sm:$0xff] }
 0x4c3   : > { %v2749_v4 = vpop.f32.mrf.mxu3  ;;  %3578 = vperm.xlu0 %4916, %v3524_v43  }
 0x4c4   : > { %v2700_v58 = vpop.f32.mrf.mxu2 }
 0x4c5   : > { %v2701_v17 = vadd.f32 %v2700_v58, %v6335_v49  ;;  %v4865_v49 = vld [vmem:[%s6931_s2 + $0x164] sm:$0xf] }
 0x4c6   : > { %v4643_v37 = vor.u32 %v4865_v49, %v4640_v29  ;;  %3583 = vperm.xlu1 %4914, %v3525_v52   ;;  %v3527_v29 = vld [vmem:[%s6934_s5 + $0x60] sm:$0xff] }
 0x4c7   : > { %v6623_v11 = vadd.f32 %v2749_v4, %v2701_v17  ;;  %v4688_v4 = vld [vmem:[%s6933_s4 + $0x128] sm:$0xf0]  ;;  %v4874_v17 = vld [vmem:[%s6933_s4 + $0x124] sm:$0xf0] }
 0x4c8   : > { %v4691_v7 = vor.u32 %v4873_v39, %v4688_v4  ;;  %v4687_v53 = vor.u32 %v4874_v17, %v4686_v14  ;;  %v3422_v14 = vpop.permute.xlu1 %3421 }
 0x4c9   : > { %3558 = vperm.xlu2 %4915, %v3520_v26  }
 0x4cb   : > { %v2751_v35 = vpop.f32.mrf.mxu3  ;;  %3593 = vperm.xlu0 %4916, %v3527_v29   ;;  %v3427_v29 = vpop.permute.xlu2 %3426 }
 0x4cc   : > { %v2702_v2 = vpop.f32.mrf.mxu2 }
 0x4cd   : > { %3025 = vmatmul.bf16.gmra.mxu0 %v4647_v23  ;;  %v2703_v25 = vadd.f32 %v2702_v2, %v6357_v45 }
 0x4ce   : > { %3598 = vperm.xlu1 %4914, %v3528_v3  }
 0x4cf   : > { %v6653_v16 = vadd.f32 %v2751_v35, %v2703_v25  ;;  %v3523_v25 = vld [vmem:[%s6934_s5 + $0x40] sm:$0xff] }
 0x4d0   : > { %3351 = vmatmul.bf16.gmra.mxu3 %v4683_v19 }
 0x4d1   : > { %3302 = vmatmul.bf16.gmra.mxu2 %v4679_v28  ;;  %3573 = vperm.xlu2 %4915, %v3523_v25  }
 0x4d2   : > { %3069 = vmatmul.bf16.gmra.mxu1 %v4643_v37  ;;  %v3530_v37 = vld [vmem:[%s6934_s5 + $0x78] sm:$0xff] }
 0x4d3   : > { %v2754_v45 = vpop.f32.mrf.mxu3  ;;  %3608 = vperm.xlu0 %4916, %v3530_v37  }
 0x4d4   : > { %v2705_v63 = vpop.f32.mrf.mxu2 }
 0x4d5   : > { %v2706_v6 = vadd.f32 %v2705_v63, %v6362_v42  ;;  %v4867_v42 = vld [vmem:[%s6931_s2 + $0x174] sm:$0xf] }
 0x4d6   : > { %v4651_v49 = vor.u32 %v4867_v42, %v4648_v60  ;;  %v3526_v42 = vld [vmem:[%s6934_s5 + $0x58] sm:$0xff] }
 0x4d7   : > { %v6665_v33 = vadd.f32 %v2754_v45, %v2706_v6  ;;  %v4876_v45 = vld [vmem:[%s6933_s4 + $0x134] sm:$0xf0] }
 0x4d8   : > { %v4695_v52 = vor.u32 %v4876_v45, %v4694_v13 }
 0x4d9   : > { %3588 = vperm.xlu2 %4915, %v3526_v42  }
 0x4da   : > { %v2991_v58 = vpop.f32.mrf.mxu0 }
 0x4db   : > { %v2756_v55 = vpop.f32.mrf.mxu3 }
 0x4dc   : > { %v2707_v57 = vpop.f32.mrf.mxu2 }
 0x4dd   : > { %v2708_v23 = vadd.f32 %v2707_v57, %v6385_v9 }
 0x4df   : > { %v6695_v22 = vadd.f32 %v2756_v55, %v2708_v23 }
 0x4e0   : > { %3356 = vmatmul.bf16.gmra.mxu3 %v4691_v7 }
 0x4e1   : > { %3307 = vmatmul.bf16.gmra.mxu2 %v4687_v53  ;;  %v3529_v53 = vld [vmem:[%s6934_s5 + $0x70] sm:$0xff] }
 0x4e2   : > { %3074 = vmatmul.bf16.gmra.mxu1 %v4651_v49  ;;  %v2993_v9 = vpop.f32.mrf.mxu0  ;;  %3603 = vperm.xlu2 %4915, %v3529_v53  }
 0x4e3   : > { %v2759_v35 = vpop.f32.mrf.mxu3 }
 0x4e4   : > { %v2710_v2 = vpop.f32.mrf.mxu2 }
 0x4e5   : > { %v2711_v19 = vadd.f32 %v2710_v2, %v6392_v48  ;;  %v4696_v48 = vld [vmem:[%s6933_s4 + $0x138] sm:$0xf0]  ;;  %v4702_v2 = vld [vmem:[%s6933_s4 + $0x140] sm:$0xf] }
 0x4e6   : > { %v4699_v40 = vor.u32 %v4875_v46, %v4696_v48 }
 0x4e7   : > { %v6704_v28 = vadd.f32 %v2759_v35, %v2711_v19 }
 0x4ea   : > { %v2996_v38 = vpop.f32.mrf.mxu0 }
 0x4eb   : > { %v2761_v63 = vpop.f32.mrf.mxu3 }
 0x4ec   : > { %v2712_v6 = vpop.f32.mrf.mxu2 }
 0x4ed   : > { %v2713_v43 = vadd.f32 %v2712_v6, %v6419_v18  ;;  %v3432_v6 = vpop.permute.xlu0 %3431 }
 0x4ef   : > { %v3040_v39 = vpop.f32.mrf.mxu1  ;;  %v6722_v4 = vadd.f32 %v2761_v63, %v2713_v43 }
 0x4f0   : > { %v3041_v60 = vadd.f32 %v3040_v39, %v2991_v58  ;;  %3361 = vmatmul.bf16.gmra.mxu3 %v4699_v40 }
 0x4f1   : > { %3312 = vmatmul.bf16.gmra.mxu2 %v4695_v52 }
 0x4f2   : > { %v3080_v17 = vadd.f32 %v3041_v60, %v6076_v41  ;;  %v2998_v55 = vpop.f32.mrf.mxu0  ;;  %v4877_v41 = vld [vmem:[%s6933_s4 + $0x144] sm:$0xf] }
 0x4f3   : > { %v2764_v7 = vpop.f32.mrf.mxu3 }
 0x4f4   : > { %v6725_v57 = vadd.f32 %v3422_v14, %v3080_v17  ;;  %v2715_v18 = vpop.f32.mrf.mxu2 }
 0x4f5   : > { %v2716_v23 = vadd.f32 %v2715_v18, %v6425_v1  ;;  %v4704_v1 = vld [vmem:[%s6933_s4 + $0x148] sm:$0xf0] }
 0x4f6   : > { %v4707_v37 = vor.u32 %v4877_v41, %v4704_v1 }
 0x4f7   : > { %v3042_v49 = vpop.f32.mrf.mxu1  ;;  %v6731_v26 = vadd.f32 %v2764_v7, %v2716_v23  ;;  %v3437_v7 = vpop.permute.xlu1 %3436  ;;  %v4710_v23 = vld [vmem:[%s6933_s4 + $0x150] sm:$0xf] }
 0x4f8   : > { %v3043_v58 = vadd.f32 %v3042_v49, %v2993_v9  ;;  %v4878_v9 = vld [vmem:[%s6933_s4 + $0x144] sm:$0xf0] }
 0x4f9   : > { %v4703_v48 = vor.u32 %v4878_v9, %v4702_v2  ;;  %v3442_v9 = vpop.permute.xlu2 %3441 }
 0x4fa   : > { %v3081_v3 = vadd.f32 %v3043_v58, %v6111_v10  ;;  %v3001_v35 = vpop.f32.mrf.mxu0 }
 0x4fb   : > { %v2766_v10 = vpop.f32.mrf.mxu3 }
 0x4fc   : > { %v6746_v19 = vadd.f32 %v3427_v29, %v3081_v3  ;;  %v2717_v25 = vpop.f32.mrf.mxu2 }
 0x4fd   : > { %v2718_v46 = vadd.f32 %v2717_v25, %v6454_v12 }
 0x4ff   : > { %v3045_v13 = vpop.f32.mrf.mxu1  ;;  %v6749_v45 = vadd.f32 %v2766_v10, %v2718_v46 }
 0x500   : > { %v3046_v63 = vadd.f32 %v3045_v13, %v2996_v38  ;;  %3366 = vmatmul.bf16.gmra.mxu3 %v4707_v37  ;;  %v4879_v38 = vld [vmem:[%s6933_s4 + $0x154] sm:$0xf] }
 0x501   : > { %3317 = vmatmul.bf16.gmra.mxu2 %v4703_v48 }
 0x502   : > { %v3082_v40 = vadd.f32 %v3046_v63, %v6129_v47  ;;  %v3003_v43 = vpop.f32.mrf.mxu0  ;;  %v4712_v47 = vld [vmem:[%s6933_s4 + $0x158] sm:$0xf0] }
 0x503   : > { %v2769_v42 = vpop.f32.mrf.mxu3  ;;  %v4715_v58 = vor.u32 %v4879_v38, %v4712_v47 }
 0x504   : > { %v6752_v52 = vadd.f32 %v3432_v6, %v3082_v40  ;;  %v2720_v39 = vpop.f32.mrf.mxu2  ;;  %v3447_v40 = vpop.permute.xlu1 %3446 }
 0x505   : > { %v2721_v60 = vadd.f32 %v2720_v39, %v6459_v62  ;;  %v4880_v62 = vld [vmem:[%s6933_s4 + $0x154] sm:$0xf0]  ;;  %v4882_v39 = vld [vmem:[%s6933_s4 + $0x164] sm:$0xf0] }
 0x506   : > { %v4711_v3 = vor.u32 %v4880_v62, %v4710_v23  ;;  %v3452_v62 = vpop.permute.xlu2 %3451 }
 0x507   : > { %v3047_v14 = vpop.f32.mrf.mxu1  ;;  %v6755_v17 = vadd.f32 %v2769_v42, %v2721_v60 }
 0x508   : > { %v3048_v12 = vadd.f32 %v3047_v14, %v2998_v55 }
 0x50a   : > { %v3083_v18 = vadd.f32 %v3048_v12, %v6155_v31  ;;  %v3006_v31 = vpop.f32.mrf.mxu0 }
 0x50b   : > { %v2771_v49 = vpop.f32.mrf.mxu3 }
 0x50c   : > { %v6770_v55 = vadd.f32 %v3437_v7, %v3083_v18  ;;  %v2722_v53 = vpop.f32.mrf.mxu2 }
 0x50d   : > { %v2723_v29 = vadd.f32 %v2722_v53, %v6488_v21 }
 0x50f   : > { %v3050_v41 = vpop.f32.mrf.mxu1  ;;  %v6773_v1 = vadd.f32 %v2771_v49, %v2723_v29 }
 0x510   : > { %v3051_v2 = vadd.f32 %v3050_v41, %v3001_v35  ;;  %3371 = vmatmul.bf16.gmra.mxu3 %v4715_v58  ;;  %v4881_v35 = vld [vmem:[%s6933_s4 + $0x164] sm:$0xf] }
 0x511   : > { %3322 = vmatmul.bf16.gmra.mxu2 %v4711_v3 }
 0x512   : > { %v3084_v10 = vadd.f32 %v3051_v2, %v6168_v30  ;;  %v3008_v13 = vpop.f32.mrf.mxu0  ;;  %v4720_v30 = vld [vmem:[%s6933_s4 + $0x168] sm:$0xf0] }
 0x513   : > { %v2774_v37 = vpop.f32.mrf.mxu3  ;;  %v4723_v14 = vor.u32 %v4881_v35, %v4720_v30 }
 0x514   : > { %v6776_v25 = vadd.f32 %v3442_v9, %v3084_v10  ;;  %v2725_v46 = vpop.f32.mrf.mxu2  ;;  %v3457_v9 = vpop.permute.xlu0 %3456 }
 0x515   : > { %v2726_v48 = vadd.f32 %v2725_v46, %v6493_v44  ;;  %v4718_v44 = vld [vmem:[%s6933_s4 + $0x160] sm:$0xf]  ;;  %v4884_v46 = vld [vmem:[%s6933_s4 + $0x174] sm:$0xf0] }
 0x516   : > { %v4719_v7 = vor.u32 %v4882_v39, %v4718_v44  ;;  %v3462_v44 = vpop.permute.xlu1 %3461 }
 0x517   : > { %v3052_v63 = vpop.f32.mrf.mxu1  ;;  %v6779_v6 = vadd.f32 %v2774_v37, %v2726_v48 }
 0x518   : > { %v3053_v21 = vadd.f32 %v3052_v63, %v3003_v43 }
 0x51a   : > { %v3085_v42 = vadd.f32 %v3053_v21, %v6194_v54  ;;  %v3011_v23 = vpop.f32.mrf.mxu0 }
 0x51b   : > { %v2776_v60 = vpop.f32.mrf.mxu3 }
 0x51c   : > { %v6794_v43 = vadd.f32 %v3447_v40, %v3085_v42  ;;  %v2727_v54 = vpop.f32.mrf.mxu2 }
 0x51d   : > { %v2728_v12 = vadd.f32 %v2727_v54, %v6522_v34 }
 0x51f   : > { %v3055_v18 = vpop.f32.mrf.mxu1  ;;  %v6797_v38 = vadd.f32 %v2776_v60, %v2728_v12  ;;  %v3472_v60 = vpop.permute.xlu0 %3471 }
 0x520   : > { %v3056_v47 = vadd.f32 %v3055_v18, %v3006_v31  ;;  %3376 = vmatmul.bf16.gmra.mxu3 %v4723_v14  ;;  %v4883_v31 = vld [vmem:[%s6933_s4 + $0x174] sm:$0xf] }
 0x521   : > { %3327 = vmatmul.bf16.gmra.mxu2 %v4719_v7 }
 0x522   : > { %v3086_v49 = vadd.f32 %v3056_v47, %v6207_v20  ;;  %v4728_v20 = vld [vmem:[%s6933_s4 + $0x178] sm:$0xf0]  ;;  %v3013_v37 = vpop.f32.mrf.mxu0 }
 0x523   : > { %v2779_v58 = vpop.f32.mrf.mxu3  ;;  %v4731_v63 = vor.u32 %v4883_v31, %v4728_v20 }
 0x524   : > { %v6800_v53 = vadd.f32 %v3452_v62, %v3086_v49  ;;  %v2730_v29 = vpop.f32.mrf.mxu2  ;;  %v3467_v49 = vpop.permute.xlu2 %3466 }
 0x525   : > { %v2731_v3 = vadd.f32 %v2730_v29, %v6527_v32  ;;  %v4726_v32 = vld [vmem:[%s6933_s4 + $0x170] sm:$0xf] }
 0x526   : > { %v4727_v40 = vor.u32 %v4884_v46, %v4726_v32 }
 0x527   : > { %v3057_v41 = vpop.f32.mrf.mxu1  ;;  %v6803_v2 = vadd.f32 %v2779_v58, %v2731_v3  ;;  %v3477_v58 = vpop.permute.xlu1 %3476 }
 0x528   : > { %v3058_v34 = vadd.f32 %v3057_v41, %v3008_v13  ;;  %v3487_v41 = vpop.permute.xlu0 %3486 }
 0x52a   : > { %v3087_v10 = vadd.f32 %v3058_v34, %v6229_v0  ;;  %v3016_v12 = vpop.f32.mrf.mxu0 }
 0x52b   : > { %v2781_v0 = vpop.f32.mrf.mxu3 }
 0x52c   : > { %v6818_v48 = vadd.f32 %v3457_v9, %v3087_v10  ;;  %v2732_v13 = vpop.f32.mrf.mxu2  ;;  %v3482_v46 = vpop.permute.xlu2 %3481 }
 0x52d   : > { %v2733_v21 = vadd.f32 %v2732_v13, %v6559_v50 }
 0x52f   : > { %v3060_v42 = vpop.f32.mrf.mxu1  ;;  %v6821_v35 = vadd.f32 %v2781_v0, %v2733_v21  ;;  %v6838_v0 = vpop.permute.xlu1 %3491 }
 0x530   : > { %v3061_v30 = vadd.f32 %v3060_v42, %v3011_v23  ;;  %3381 = vmatmul.bf16.gmra.mxu3 %v4731_v63  ;;  %v3534_v21 = vpop.permute.xlu0 %3533 }
 0x531   : > { %3332 = vmatmul.bf16.gmra.mxu2 %v4727_v40 }
 0x532   : > { %v3088_v39 = vadd.f32 %v3061_v30, %v6236_v24  ;;  %v3018_v9 = vpop.f32.mrf.mxu0 }
 0x533   : > { %v2784_v14 = vpop.f32.mrf.mxu3 }
 0x534   : > { %v6824_v54 = vadd.f32 %v3462_v44, %v3088_v39  ;;  %v2735_v7 = vpop.f32.mrf.mxu2 }
 0x535   : > { %v2736_v18 = vadd.f32 %v2735_v7, %v6570_v8  ;;  %v6844_v7 = vpop.permute.xlu2 %3496 }
 0x537   : > { %v3062_v47 = vpop.f32.mrf.mxu1  ;;  %v6827_v50 = vadd.f32 %v2784_v14, %v2736_v18 }
 0x538   : > { %v3063_v62 = vadd.f32 %v3062_v47, %v3013_v37  ;;  %v3539_v47 = vpop.permute.xlu1 %3538 }
 0x53a   : > { %v3089_v23 = vadd.f32 %v3063_v62, %v6255_v56  ;;  %v3021_v42 = vpop.f32.mrf.mxu0 }
 0x53b   : > { %v2786_v3 = vpop.f32.mrf.mxu3 }
 0x53c   : > { %v6830_v29 = vadd.f32 %v3467_v49, %v3089_v23  ;;  %v2737_v24 = vpop.f32.mrf.mxu2 }
 0x53d   : > { %v2738_v34 = vadd.f32 %v2737_v24, %v6599_v59 }
 0x53f   : > { %v3065_v10 = vpop.f32.mrf.mxu1  ;;  %v6833_v31 = vadd.f32 %v2786_v3, %v2738_v34 }
 0x540   : > { %v3066_v8 = vadd.f32 %v3065_v10, %v3016_v12 }
 0x542   : > { %v3090_v20 = vadd.f32 %v3066_v8, %v6260_v5  ;;  %v3023_v3 = vpop.f32.mrf.mxu0 }
 0x543   : > { %v3347_v37 = vpop.f32.mrf.mxu3 }
 0x544   : > { %v6836_v32 = vadd.f32 %v3472_v60, %v3090_v20  ;;  %v3298_v56 = vpop.f32.mrf.mxu2 }
 0x545   : > { %v3348_v13 = vadd.f32 %v3347_v37, %v3298_v56 }
 0x547   : > { %v3067_v63 = vpop.f32.mrf.mxu1  ;;  %v3387_v59 = vadd.f32 %v3348_v13, %v6623_v11  ;;  %v3544_v13 = vpop.permute.xlu2 %3543 }
 0x548   : > { %v3068_v40 = vadd.f32 %v3067_v63, %v3018_v9 }
 0x549   : > { %v3611_v44 = vadd.f32 %v3534_v21, %v3387_v59 }
 0x54a   : > { %v3091_v30 = vadd.f32 %v3068_v40, %v6278_v51  ;;  %v3026_v59 = vpop.f32.mrf.mxu0 }
 0x54b   : > { %v4732_v5 = vmul.f32 -1.442695, %v3611_v44  ;;  %v3349_v60 = vpop.f32.mrf.mxu3 }
 0x54c   : > { %v6842_v39 = vadd.f32 %v3477_v58, %v3091_v30  ;;  %v3300_v14 = vpop.f32.mrf.mxu2 }
 0x54d   : > { %4917 = vpow2.f32 %v4732_v5  ;;  %v3350_v12 = vadd.f32 %v3349_v60, %v3300_v14 }
 0x54f   : > { %v3070_v18 = vpop.f32.mrf.mxu1  ;;  %v3388_v49 = vadd.f32 %v3350_v12, %v6653_v16 }
 0x550   : > { %v3071_v62 = vadd.f32 %v3070_v18, %v3021_v42 }
 0x551   : > { %v3612_v23 = vadd.f32 %v3539_v47, %v3388_v49  ;;  %v3549_v47 = vpop.permute.xlu0 %3548 }
 0x552   : > { %v3092_v11 = vadd.f32 %v3071_v62, %v6284_v27 }
 0x553   : > { %v4918_v51 = vpop.eup %4917  ;;  %v4733_v58 = vmul.f32 -1.442695, %v3612_v23  ;;  %v3352_v34 = vpop.f32.mrf.mxu3 }
 0x554   : > { %v6848_v24 = vadd.f32 %v3482_v46, %v3092_v11  ;;  %v3675_v9 = vadd.f32 1.0, %v4918_v51  ;;  %v3303_v10 = vpop.f32.mrf.mxu2 }
 0x555   : > { %4919 = vpow2.f32 %v4733_v58  ;;  %v3353_v8 = vadd.f32 %v3352_v34, %v3303_v10 }
 0x556   : > { %4921 = vrcp.f32 %v3675_v9  ;;  %v3702_v18 = vand.u32 2147483648, %v3675_v9  ;;  %vm3696_vm0 = vweird.f32 %v3675_v9 }
 0x557   : > { %v3072_v20 = vpop.f32.mrf.mxu1  ;;  %v3389_v56 = vadd.f32 %v3353_v8, %v6665_v33 }
 0x558   : > { %v3073_v37 = vadd.f32 %v3072_v20, %v3023_v3 }
 0x559   : > { %v3613_v27 = vadd.f32 %v3544_v13, %v3389_v56 }
 0x55a   : > { %v3093_v16 = vadd.f32 %v3073_v37, %v6300_v36 }
 0x55b   : > { %v4920_v63 = vpop.eup %4919  ;;  %v4734_v46 = vmul.f32 -1.442695, %v3613_v27  ;;  %v3354_v40 = vpop.f32.mrf.mxu3 }
 0x55c   : > { %v6852_v21 = vadd.f32 %v3487_v41, %v3093_v16  ;;  %v4922_v42 = vpop.eup %4921  ;;  %v6854_v30 = vadd.f32 1.0, %v4920_v63  ;;  %v3305_v44 = vpop.f32.mrf.mxu2  ;;  %v3700_v41 = vand.u32 2147483647, %v3675_v9 }
 0x55d   : > { %v3692_v5 = vmul.f32 %v4922_v42, %v3675_v9  ;;  %4923 = vpow2.f32 %v4734_v46  ;;  %v3355_v60 = vadd.f32 %v3354_v40, %v3305_v44  ;;  %vm3697_vm15 = vweird.f32 %v4922_v42 }
 0x55e   : > { %4925 = vrcp.f32 %v6854_v30  ;;  %vm3698_vm1 = vmor %vm3696_vm0, %vm3697_vm15  ;;  %vm3701_vm2 = vcmp.eq.f32.partialorder %v3700_v41, 8.507059e+37  ;;  %v3717_v63 = vand.u32 2147483648, %v6854_v30  ;;  %vm3711_vm4 = vweird.f32 %v6854_v30 }
 0x55f   : > { %v3075_v33 = vpop.f32.mrf.mxu1  ;;  %v3693_v14 = vsub.f32 1.0, %v3692_v5  ;;  %v3390_v12 = vadd.f32 %v3355_v60, %v6695_v22  ;;  %v3703_v22 = vor.u32 1.1754944e-38, %v3702_v18  ;;  %v3554_v5 = vpop.permute.xlu1 %3553 }
 0x560   : > { %v3076_v36 = vadd.f32 %v3075_v33, %v3026_v59  ;;  %v3715_v59 = vand.u32 2147483647, %v6854_v30 }
 0x561   : > { %v3694_v62 = vmul.f32 %v4922_v42, %v3693_v14  ;;  %v3614_v11 = vadd.f32 %v3549_v47, %v3390_v12  ;;  %v3718_v12 = vor.u32 1.1754944e-38, %v3717_v63 }
 0x562   : > { %v3094_v49 = vadd.f32 %v3076_v36, %v6306_v15  ;;  %v3028_v15 = vpop.f32.mrf.mxu0  ;;  %vm3716_vm6 = vcmp.eq.f32.partialorder %v3715_v59, 8.507059e+37 }
 0x563   : > { %v4924_v23 = vpop.eup %4923  ;;  %v3695_v3 = vadd.f32 %v4922_v42, %v3694_v62  ;;  %v4735_v58 = vmul.f32 -1.442695, %v3614_v11  ;;  %v3357_v34 = vpop.f32.mrf.mxu3 }
 0x564   : > { %v6861_v51 = vadd.f32 %v6838_v0, %v3094_v49  ;;  %v4926_v10 = vpop.eup %4925  ;;  %v3677_v8 = vadd.f32 1.0, %v4924_v23  ;;  %v3308_v20 = vpop.f32.mrf.mxu2 }
 0x565   : > { %v3699_v37 = vsel %vm3698_vm1, %v4922_v42, %v3695_v3  ;;  %v3707_v56 = vmul.f32 %v4926_v10, %v6854_v30  ;;  %4927 = vpow2.f32 %v4735_v58  ;;  %v3358_v27 = vadd.f32 %v3357_v34, %v3308_v20 }
 0x566   : > { %v3704_v0 = vsel %vm3701_vm2, %v3703_v22, %v3699_v37  ;;  %4929 = vrcp.f32 %v3677_v8  ;;  %vm3712_vm3 = vweird.f32 %v4926_v10  ;;  %v3732_v23 = vand.u32 2147483648, %v3677_v8 }
 0x567   : > { %v3077_v9 = vpop.f32.mrf.mxu1  ;;  %v3931_v13 = vmul.f32 %v3704_v0, %v6725_v57  ;;  %v3708_v16 = vsub.f32 1.0, %v3707_v56  ;;  %v3391_v42 = vadd.f32 %v3358_v27, %v6704_v28  ;;  %vm3713_vm5 = vmor %vm3711_vm4, %vm3712_vm3  ;;  %v3730_v34 = vand.u32 2147483647, %v3677_v8 }
 0x568   : > { %v3078_v46 = vadd.f32 %v3077_v9, %v3028_v15  ;;  %vm3726_vm8 = vweird.f32 %v3677_v8  ;;  %v3733_v56 = vor.u32 1.1754944e-38, %v3732_v23 }
 0x569   : > { %3947 = vst [vmem:[%s6867_s13] sm:$0xff] %v3931_v13  ;;  %v3709_v40 = vmul.f32 %v4926_v10, %v3708_v16  ;;  %v3615_v57 = vadd.f32 %v3554_v5, %v3391_v42  ;;  %vm3731_vm10 = vcmp.eq.f32.partialorder %v3730_v34, 8.507059e+37 }
 0x56a   : > { %v3095_v44 = vadd.f32 %v3078_v46, %v6329_v61 }
 0x56b   : > { %v4928_v60 = vpop.eup %4927  ;;  %v3710_v33 = vadd.f32 %v4926_v10, %v3709_v40  ;;  %v3359_v14 = vpop.f32.mrf.mxu3  ;;  %v4736_v61 = vmul.f32 -1.442695, %v3615_v57 }
 0x56c   : > { %v4930_v36 = vpop.eup %4929  ;;  %v3678_v41 = vadd.f32 1.0, %v4928_v60  ;;  %v6877_v18 = vadd.f32 %v6844_v7, %v3095_v44  ;;  %v3310_v47 = vpop.f32.mrf.mxu2 }
 0x56d   : > { %v3714_v62 = vsel %vm3713_vm5, %v4926_v10, %v3710_v33  ;;  %v3722_v28 = vmul.f32 %v4930_v36, %v3677_v8  ;;  %v3360_v3 = vadd.f32 %v3359_v14, %v3310_v47  ;;  %vm3727_vm7 = vweird.f32 %v4930_v36  ;;  %v3559_v10 = vpop.permute.xlu2 %3558  ;;  %v3564_v44 = vpop.permute.xlu0 %3563 }
 0x56e   : > { %v3719_v49 = vsel %vm3716_vm6, %v3718_v12, %v3714_v62  ;;  %4931 = vrcp.f32 %v3678_v41  ;;  %vm3728_vm9 = vmor %vm3726_vm8, %vm3727_vm7  ;;  %v3745_v59 = vand.u32 2147483647, %v3678_v41  ;;  %v3747_v42 = vand.u32 2147483648, %v3678_v41 }
 0x56f   : > { %v3932_v11 = vmul.f32 %v3719_v49, %v6746_v19  ;;  %v3723_v30 = vsub.f32 1.0, %v3722_v28  ;;  %4933 = vpow2.f32 %v4736_v61  ;;  %v3392_v7 = vadd.f32 %v3360_v3, %v6722_v4 }
 0x570   : > { %vm3741_vm12 = vweird.f32 %v3678_v41  ;;  %vm3746_vm14 = vcmp.eq.f32.partialorder %v3745_v59, 8.507059e+37 }
 0x571   : > { %3948 = vst [vmem:[%s6867_s13 + $0x8] sm:$0xff] %v3932_v11  ;;  %v3724_v58 = vmul.f32 %v4930_v36, %v3723_v30  ;;  %v3616_v15 = vadd.f32 %v3559_v10, %v3392_v7 }
 0x573   : > { %v3725_v22 = vadd.f32 %v4930_v36, %v3724_v58  ;;  %v3362_v20 = vpop.f32.mrf.mxu3  ;;  %v4737_v46 = vmul.f32 -1.442695, %v3616_v15 }
 0x574   : > { %v4932_v37 = vpop.eup %4931  ;;  %v3313_v0 = vpop.f32.mrf.mxu2 }
 0x575   : > { %v4934_v19 = vpop.eup %4933  ;;  %v3729_v9 = vsel %vm3728_vm9, %v4930_v36, %v3725_v22  ;;  %v3737_v13 = vmul.f32 %v4932_v37, %v3678_v41  ;;  %v3363_v16 = vadd.f32 %v3362_v20, %v3313_v0  ;;  %vm3742_vm11 = vweird.f32 %v4932_v37  ;;  %v3569_v41 = vpop.permute.xlu1 %3568 }
 0x576   : > { %v3734_v27 = vsel %vm3731_vm10, %v3733_v56, %v3729_v9  ;;  %v3679_v63 = vadd.f32 1.0, %v4934_v19  ;;  %vm3743_vm13 = vmor %vm3741_vm12, %vm3742_vm11  ;;  %v3748_v36 = vor.u32 1.1754944e-38, %v3747_v42 }
 0x577   : > { %v3933_v4 = vmul.f32 %v3734_v27, %v6752_v52  ;;  %v3738_v40 = vsub.f32 1.0, %v3737_v13  ;;  %v3393_v8 = vadd.f32 %v3363_v16, %v6731_v26  ;;  %v3574_v16 = vpop.permute.xlu2 %3573 }
 0x578   : > { %4935 = vrcp.f32 %v3679_v63  ;;  %v3762_v58 = vand.u32 2147483648, %v3679_v63  ;;  %v3760_v22 = vand.u32 2147483647, %v3679_v63  ;;  %vm3756_vm0 = vweird.f32 %v3679_v63 }
 0x579   : > { %3949 = vst [vmem:[%s6867_s13 + $0x10] sm:$0xff] %v3933_v4  ;;  %v3739_v5 = vmul.f32 %v4932_v37, %v3738_v40  ;;  %4937 = vpow2.f32 %v4737_v46  ;;  %v3617_v60 = vadd.f32 %v3564_v44, %v3393_v8 }
 0x57a   : > { %vm3761_vm2 = vcmp.eq.f32.partialorder %v3760_v22, 8.507059e+37 }
 0x57b   : > { %v3740_v33 = vadd.f32 %v4932_v37, %v3739_v5  ;;  %v4738_v57 = vmul.f32 -1.442695, %v3617_v60  ;;  %v3364_v14 = vpop.f32.mrf.mxu3 }
 0x57c   : > { %v3315_v52 = vpop.f32.mrf.mxu2 }
 0x57d   : > { %v3744_v12 = vsel %vm3743_vm13, %v4932_v37, %v3740_v33  ;;  %4939 = vpow2.f32 %v4738_v57  ;;  %v3365_v26 = vadd.f32 %v3364_v14, %v3315_v52 }
 0x57e   : > { %v4936_v47 = vpop.eup %4935  ;;  %v3749_v62 = vsel %vm3746_vm14, %v3748_v36, %v3744_v12 }
 0x57f   : > { %v4938_v28 = vpop.eup %4937  ;;  %v3934_v61 = vmul.f32 %v3749_v62, %v6770_v55  ;;  %v3752_v49 = vmul.f32 %v4936_v47, %v3679_v63  ;;  %v3394_v11 = vadd.f32 %v3365_v26, %v6749_v45  ;;  %vm3757_vm15 = vweird.f32 %v4936_v47 }
 0x580   : > { %v3680_v30 = vadd.f32 1.0, %v4938_v28  ;;  %vm3758_vm1 = vmor %vm3756_vm0, %vm3757_vm15  ;;  %v3763_v55 = vor.u32 1.1754944e-38, %v3762_v58 }
 0x581   : > { %3950 = vst [vmem:[%s6867_s13 + $0x18] sm:$0xff] %v3934_v61  ;;  %v3753_v23 = vsub.f32 1.0, %v3752_v49  ;;  %v3618_v3 = vadd.f32 %v3569_v41, %v3394_v11  ;;  %v3579_v49 = vpop.permute.xlu0 %3578 }
 0x582   : > { %4941 = vrcp.f32 %v3680_v30  ;;  %v3775_v44 = vand.u32 2147483647, %v3680_v30  ;;  %v3777_v5 = vand.u32 2147483648, %v3680_v30  ;;  %vm3771_vm4 = vweird.f32 %v3680_v30 }
 0x583   : > { %v4940_v34 = vpop.eup %4939  ;;  %v3754_v7 = vmul.f32 %v4936_v47, %v3753_v23  ;;  %v4739_v10 = vmul.f32 -1.442695, %v3618_v3  ;;  %v3367_v20 = vpop.f32.mrf.mxu3 }
 0x584   : > { %v3681_v37 = vadd.f32 1.0, %v4940_v34  ;;  %v3318_v56 = vpop.f32.mrf.mxu2  ;;  %vm3776_vm6 = vcmp.eq.f32.partialorder %v3775_v44, 8.507059e+37  ;;  %v3778_v52 = vor.u32 1.1754944e-38, %v3777_v5 }
 0x585   : > { %v3755_v15 = vadd.f32 %v4936_v47, %v3754_v7  ;;  %4943 = vpow2.f32 %v4739_v10  ;;  %v3368_v45 = vadd.f32 %v3367_v20, %v3318_v56 }
 0x586   : > { %4945 = vrcp.f32 %v3681_v37  ;;  %v3790_v12 = vand.u32 2147483647, %v3681_v37  ;;  %v3792_v26 = vand.u32 2147483648, %v3681_v37  ;;  %vm3786_vm8 = vweird.f32 %v3681_v37 }
 0x587   : > { %v3759_v0 = vsel %vm3758_vm1, %v4936_v47, %v3755_v15  ;;  %v3395_v19 = vadd.f32 %v3368_v45, %v6755_v17 }
 0x588   : > { %v4942_v9 = vpop.eup %4941  ;;  %v3764_v13 = vsel %vm3761_vm2, %v3763_v55, %v3759_v0  ;;  %v3793_v34 = vor.u32 1.1754944e-38, %v3792_v26  ;;  %vm3791_vm10 = vcmp.eq.f32.partialorder %v3790_v12, 8.507059e+37 }
 0x589   : > { %v3935_v27 = vmul.f32 %v3764_v13, %v6776_v25  ;;  %v3767_v46 = vmul.f32 %v4942_v9, %v3680_v30  ;;  %v3619_v4 = vadd.f32 %v3574_v16, %v3395_v19  ;;  %vm3772_vm3 = vweird.f32 %v4942_v9  ;;  %v3584_v13 = vpop.permute.xlu1 %3583 }
 0x58a   : > { %vm3773_vm5 = vmor %vm3771_vm4, %vm3772_vm3 }
 0x58b   : > { %v4944_v40 = vpop.eup %4943  ;;  %3951 = vst [vmem:[%s6867_s13 + $0x20] sm:$0xff] %v3935_v27  ;;  %v3768_v63 = vsub.f32 1.0, %v3767_v46  ;;  %v4740_v8 = vmul.f32 -1.442695, %v3619_v4  ;;  %v3369_v59 = vpop.f32.mrf.mxu3 }
 0x58c   : > { %v4946_v42 = vpop.eup %4945  ;;  %v3682_v60 = vadd.f32 1.0, %v4944_v40  ;;  %v3320_v33 = vpop.f32.mrf.mxu2 }
 0x58d   : > { %v3769_v57 = vmul.f32 %v4942_v9, %v3768_v63  ;;  %v3782_v17 = vmul.f32 %v4946_v42, %v3681_v37  ;;  %4947 = vpow2.f32 %v4740_v8  ;;  %v3370_v36 = vadd.f32 %v3369_v59, %v3320_v33 }
 0x58e   : > { %4949 = vrcp.f32 %v3682_v60  ;;  %vm3787_vm7 = vweird.f32 %v4946_v42  ;;  %v3807_v37 = vand.u32 2147483648, %v3682_v60  ;;  %v3805_v0 = vand.u32 2147483647, %v3682_v60 }
 0x58f   : > { %v3770_v14 = vadd.f32 %v4942_v9, %v3769_v57  ;;  %v3783_v25 = vsub.f32 1.0, %v3782_v17  ;;  %v3396_v28 = vadd.f32 %v3370_v36, %v6773_v1  ;;  %vm3788_vm9 = vmor %vm3786_vm8, %vm3787_vm7  ;;  %vm3801_vm12 = vweird.f32 %v3682_v60 }
 0x590   : > { %v3808_v46 = vor.u32 1.1754944e-38, %v3807_v37  ;;  %vm3806_vm14 = vcmp.eq.f32.partialorder %v3805_v0, 8.507059e+37 }
 0x591   : > { %v3774_v47 = vsel %vm3773_vm5, %v4942_v9, %v3770_v14  ;;  %v3784_v62 = vmul.f32 %v4946_v42, %v3783_v25  ;;  %v3620_v30 = vadd.f32 %v3579_v49, %v3396_v28  ;;  %v3589_v14 = vpop.permute.xlu2 %3588 }
 0x592   : > { %v3779_v61 = vsel %vm3776_vm6, %v3778_v52, %v3774_v47 }
 0x593   : > { %v4948_v11 = vpop.eup %4947  ;;  %v3936_v41 = vmul.f32 %v3779_v61, %v6794_v43  ;;  %v3785_v23 = vadd.f32 %v4946_v42, %v3784_v62  ;;  %v3372_v3 = vpop.f32.mrf.mxu3  ;;  %v4741_v1 = vmul.f32 -1.442695, %v3620_v30 }
 0x594   : > { %v4950_v58 = vpop.eup %4949  ;;  %v3683_v7 = vadd.f32 1.0, %v4948_v11  ;;  %v3323_v22 = vpop.f32.mrf.mxu2 }
 0x595   : > { %3952 = vst [vmem:[%s6867_s13 + $0x28] sm:$0xff] %v3936_v41  ;;  %v3789_v10 = vsel %vm3788_vm9, %v4946_v42, %v3785_v23  ;;  %v3797_v20 = vmul.f32 %v4950_v58, %v3682_v60  ;;  %v3373_v45 = vadd.f32 %v3372_v3, %v3323_v22  ;;  %vm3802_vm11 = vweird.f32 %v4950_v58  ;;  %v3594_v3 = vpop.permute.xlu0 %3593 }
 0x596   : > { %v3794_v56 = vsel %vm3791_vm10, %v3793_v34, %v3789_v10  ;;  %4951 = vrcp.f32 %v3683_v7  ;;  %vm3803_vm13 = vmor %vm3801_vm12, %vm3802_vm11  ;;  %v3820_v57 = vand.u32 2147483647, %v3683_v7  ;;  %v3822_v17 = vand.u32 2147483648, %v3683_v7 }
 0x597   : > { %v3937_v15 = vmul.f32 %v3794_v56, %v6800_v53  ;;  %v3798_v43 = vsub.f32 1.0, %v3797_v20  ;;  %4953 = vpow2.f32 %v4741_v1  ;;  %v3397_v19 = vadd.f32 %v3373_v45, %v6779_v6 }
 0x598   : > { %vm3816_vm0 = vweird.f32 %v3683_v7  ;;  %v3823_v47 = vor.u32 1.1754944e-38, %v3822_v17  ;;  %vm3821_vm2 = vcmp.eq.f32.partialorder %v3820_v57, 8.507059e+37 }
 0x599   : > { %3953 = vst [vmem:[%s6867_s13 + $0x30] sm:$0xff] %v3937_v15  ;;  %v3799_v55 = vmul.f32 %v4950_v58, %v3798_v43  ;;  %v3621_v4 = vadd.f32 %v3584_v13, %v3397_v19 }
 0x59b   : > { %v3800_v9 = vadd.f32 %v4950_v58, %v3799_v55  ;;  %v3374_v16 = vpop.f32.mrf.mxu3  ;;  %v4742_v5 = vmul.f32 -1.442695, %v3621_v4 }
 0x59c   : > { %v4952_v27 = vpop.eup %4951  ;;  %v3325_v40 = vpop.f32.mrf.mxu2 }
 0x59d   : > { %v4954_v53 = vpop.eup %4953  ;;  %v3804_v63 = vsel %vm3803_vm13, %v4950_v58, %v3800_v9  ;;  %v3812_v8 = vmul.f32 %v4952_v27, %v3683_v7  ;;  %v3375_v59 = vadd.f32 %v3374_v16, %v3325_v40  ;;  %vm3817_vm15 = vweird.f32 %v4952_v27  ;;  %v3599_v9 = vpop.permute.xlu1 %3598 }
 0x59e   : > { %v3809_v42 = vsel %vm3806_vm14, %v3808_v46, %v3804_v63  ;;  %v3684_v44 = vadd.f32 1.0, %v4954_v53  ;;  %vm3818_vm1 = vmor %vm3816_vm0, %vm3817_vm15 }
 0x59f   : > { %v3938_v6 = vmul.f32 %v3809_v42, %v6818_v48  ;;  %v3813_v33 = vsub.f32 1.0, %v3812_v8  ;;  %v3398_v60 = vadd.f32 %v3375_v59, %v6797_v38 }
 0x5a0   : > { %4955 = vrcp.f32 %v3684_v44  ;;  %v3837_v7 = vand.u32 2147483648, %v3684_v44  ;;  %v3835_v20 = vand.u32 2147483647, %v3684_v44  ;;  %vm3831_vm4 = vweird.f32 %v3684_v44 }
 0x5a1   : > { %3954 = vst [vmem:[%s6867_s13 + $0x38] sm:$0xff] %v3938_v6  ;;  %v3814_v25 = vmul.f32 %v4952_v27, %v3813_v33  ;;  %4957 = vpow2.f32 %v4742_v5  ;;  %v3622_v36 = vadd.f32 %v3589_v14, %v3398_v60 }
 0x5a2   : > { %vm3836_vm6 = vcmp.eq.f32.partialorder %v3835_v20, 8.507059e+37 }
 0x5a3   : > { %v3815_v52 = vadd.f32 %v4952_v27, %v3814_v25  ;;  %v4743_v12 = vmul.f32 -1.442695, %v3622_v36  ;;  %v3377_v26 = vpop.f32.mrf.mxu3 }
 0x5a4   : > { %v3328_v48 = vpop.f32.mrf.mxu2 }
 0x5a5   : > { %v3819_v62 = vsel %vm3818_vm1, %v4952_v27, %v3815_v52  ;;  %4959 = vpow2.f32 %v4743_v12  ;;  %v3378_v38 = vadd.f32 %v3377_v26, %v3328_v48  ;;  %v3604_v12 = vpop.permute.xlu2 %3603 }
 0x5a6   : > { %v4956_v28 = vpop.eup %4955  ;;  %v3824_v61 = vsel %vm3821_vm2, %v3823_v47, %v3819_v62 }
 0x5a7   : > { %v4958_v49 = vpop.eup %4957  ;;  %v3939_v11 = vmul.f32 %v3824_v61, %v6824_v54  ;;  %v3827_v41 = vmul.f32 %v4956_v28, %v3684_v44  ;;  %v3399_v23 = vadd.f32 %v3378_v38, %v6803_v2  ;;  %vm3832_vm3 = vweird.f32 %v4956_v28 }
 0x5a8   : > { %v3685_v30 = vadd.f32 1.0, %v4958_v49  ;;  %vm3833_vm5 = vmor %vm3831_vm4, %vm3832_vm3  ;;  %v3838_v54 = vor.u32 1.1754944e-38, %v3837_v7 }
 0x5a9   : > { %3955 = vst [vmem:[%s6867_s13 + $0x40] sm:$0xff] %v3939_v11  ;;  %v3828_v58 = vsub.f32 1.0, %v3827_v41  ;;  %v3623_v34 = vadd.f32 %v3594_v3, %v3399_v23 }
 0x5aa   : > { %4961 = vrcp.f32 %v3685_v30  ;;  %v3850_v8 = vand.u32 2147483647, %v3685_v30  ;;  %v3852_v59 = vand.u32 2147483648, %v3685_v30  ;;  %vm3846_vm8 = vweird.f32 %v3685_v30 }
 0x5ab   : > { %v4960_v22 = vpop.eup %4959  ;;  %v3829_v10 = vmul.f32 %v4956_v28, %v3828_v58  ;;  %v4744_v1 = vmul.f32 -1.442695, %v3623_v34  ;;  %v3379_v56 = vpop.f32.mrf.mxu3 }
 0x5ac   : > { %v3686_v15 = vadd.f32 1.0, %v4960_v22  ;;  %v3330_v43 = vpop.f32.mrf.mxu2  ;;  %vm3851_vm10 = vcmp.eq.f32.partialorder %v3850_v8, 8.507059e+37  ;;  %v3853_v60 = vor.u32 1.1754944e-38, %v3852_v59 }
 0x5ad   : > { %v3830_v37 = vadd.f32 %v4956_v28, %v3829_v10  ;;  %4963 = vpow2.f32 %v4744_v1  ;;  %v3380_v2 = vadd.f32 %v3379_v56, %v3330_v43  ;;  %v3609_v1 = vpop.permute.xlu0 %3608 }
 0x5ae   : > { %4965 = vrcp.f32 %v3686_v15  ;;  %v3865_v57 = vand.u32 2147483647, %v3686_v15  ;;  %v3867_v17 = vand.u32 2147483648, %v3686_v15  ;;  %vm3861_vm12 = vweird.f32 %v3686_v15 }
 0x5af   : > { %v3834_v45 = vsel %vm3833_vm5, %v4956_v28, %v3830_v37  ;;  %v3400_v55 = vadd.f32 %v3380_v2, %v6821_v35 }
 0x5b0   : > { %v4962_v0 = vpop.eup %4961  ;;  %v3839_v19 = vsel %vm3836_vm6, %v3838_v54, %v3834_v45  ;;  %v3868_v28 = vor.u32 1.1754944e-38, %v3867_v17  ;;  %vm3866_vm14 = vcmp.eq.f32.partialorder %v3865_v57, 8.507059e+37 }
 0x5b1   : > { %v3940_v13 = vmul.f32 %v3839_v19, %v6830_v29  ;;  %v3842_v16 = vmul.f32 %v4962_v0, %v3685_v30  ;;  %v3624_v27 = vadd.f32 %v3599_v9, %v3400_v55  ;;  %vm3847_vm7 = vweird.f32 %v4962_v0 }
 0x5b2   : > { %vm3848_vm9 = vmor %vm3846_vm8, %vm3847_vm7 }
 0x5b3   : > { %v4964_v46 = vpop.eup %4963  ;;  %3956 = vst [vmem:[%s6867_s13 + $0x48] sm:$0xff] %v3940_v13  ;;  %v3843_v4 = vsub.f32 1.0, %v3842_v16  ;;  %v4745_v40 = vmul.f32 -1.442695, %v3624_v27  ;;  %v3382_v53 = vpop.f32.mrf.mxu3 }
 0x5b4   : > { %v4966_v63 = vpop.eup %4965  ;;  %v3687_v42 = vadd.f32 1.0, %v4964_v46  ;;  %v3333_v44 = vpop.f32.mrf.mxu2 }
 0x5b5   : > { %v3844_v5 = vmul.f32 %v4962_v0, %v3843_v4  ;;  %v3857_v35 = vmul.f32 %v4966_v63, %v3686_v15  ;;  %4967 = vpow2.f32 %v4745_v40  ;;  %v3383_v33 = vadd.f32 %v3382_v53, %v3333_v44 }
 0x5b6   : > { %4969 = vrcp.f32 %v3687_v42  ;;  %vm3862_vm11 = vweird.f32 %v4966_v63  ;;  %v3882_v58 = vand.u32 2147483648, %v3687_v42  ;;  %v3880_v22 = vand.u32 2147483647, %v3687_v42 }
 0x5b7   : > { %v3845_v6 = vadd.f32 %v4962_v0, %v3844_v5  ;;  %v3858_v29 = vsub.f32 1.0, %v3857_v35  ;;  %v3401_v36 = vadd.f32 %v3383_v33, %v6827_v50  ;;  %vm3863_vm13 = vmor %vm3861_vm12, %vm3862_vm11  ;;  %vm3876_vm0 = vweird.f32 %v3687_v42 }
 0x5b8   : > { %v3883_v15 = vor.u32 1.1754944e-38, %v3882_v58  ;;  %vm3881_vm2 = vcmp.eq.f32.partialorder %v3880_v22, 8.507059e+37 }
 0x5b9   : > { %v3849_v14 = vsel %vm3848_vm9, %v4962_v0, %v3845_v6  ;;  %v3859_v25 = vmul.f32 %v4966_v63, %v3858_v29  ;;  %v3625_v62 = vadd.f32 %v3604_v12, %v3401_v36 }
 0x5ba   : > { %v3854_v52 = vsel %vm3851_vm10, %v3853_v60, %v3849_v14 }
 0x5bb   : > { %v4968_v26 = vpop.eup %4967  ;;  %v3941_v47 = vmul.f32 %v3854_v52, %v6836_v32  ;;  %v3860_v48 = vadd.f32 %v4966_v63, %v3859_v25  ;;  %v4746_v41 = vmul.f32 -1.442695, %v3625_v62  ;;  %v3384_v50 = vpop.f32.mrf.mxu3 }
 0x5bc   : > { %v4970_v38 = vpop.eup %4969  ;;  %v3688_v61 = vadd.f32 1.0, %v4968_v26  ;;  %v3335_v23 = vpop.f32.mrf.mxu2 }
 0x5bd   : > { %3957 = vst [vmem:[%s6867_s13 + $0x50] sm:$0xff] %v3941_v47  ;;  %v3864_v49 = vsel %vm3863_vm13, %v4966_v63, %v3860_v48  ;;  %v3872_v11 = vmul.f32 %v4970_v38, %v3687_v42  ;;  %v3385_v34 = vadd.f32 %v3384_v50, %v3335_v23  ;;  %vm3877_vm15 = vweird.f32 %v4970_v38 }
 0x5be   : > { %v3869_v30 = vsel %vm3866_vm14, %v3868_v28, %v3864_v49  ;;  %4971 = vrcp.f32 %v3688_v61  ;;  %vm3878_vm1 = vmor %vm3876_vm0, %vm3877_vm15  ;;  %v3897_v9 = vand.u32 2147483648, %v3688_v61  ;;  %v3895_v13 = vand.u32 2147483647, %v3688_v61 }
 0x5bf   : > { %v3942_v3 = vmul.f32 %v3869_v30, %v6842_v39  ;;  %v3873_v32 = vsub.f32 1.0, %v3872_v11  ;;  %4973 = vpow2.f32 %v4746_v41  ;;  %v3402_v10 = vadd.f32 %v3385_v34, %v6833_v31 }
 0x5c0   : > { %vm3891_vm4 = vweird.f32 %v3688_v61  ;;  %v3898_v27 = vor.u32 1.1754944e-38, %v3897_v9  ;;  %vm3896_vm6 = vcmp.eq.f32.partialorder %v3895_v13, 8.507059e+37 }
 0x5c1   : > { %3958 = vst [vmem:[%s6867_s13 + $0x58] sm:$0xff] %v3942_v3  ;;  %v3874_v7 = vmul.f32 %v4970_v38, %v3873_v32  ;;  %v3626_v43 = vadd.f32 %v3609_v1, %v3402_v10 }
 0x5c3   : > { %v3875_v20 = vadd.f32 %v4970_v38, %v3874_v7  ;;  %v4747_v55 = vmul.f32 -1.442695, %v3626_v43 }
 0x5c4   : > { %v4972_v56 = vpop.eup %4971 }
 0x5c5   : > { %v4974_v37 = vpop.eup %4973  ;;  %v3879_v39 = vsel %vm3878_vm1, %v4970_v38, %v3875_v20  ;;  %v3887_v2 = vmul.f32 %v4972_v56, %v3688_v61  ;;  %vm3892_vm3 = vweird.f32 %v4972_v56 }
 0x5c6   : > { %v3884_v54 = vsel %vm3881_vm2, %v3883_v15, %v3879_v39  ;;  %v3689_v45 = vadd.f32 1.0, %v4974_v37  ;;  %vm3893_vm5 = vmor %vm3891_vm4, %vm3892_vm3 }
 0x5c7   : > { %v3943_v0 = vmul.f32 %v3884_v54, %v6848_v24  ;;  %v3888_v19 = vsub.f32 1.0, %v3887_v2 }
 0x5c8   : > { %4975 = vrcp.f32 %v3689_v45  ;;  %v3912_v42 = vand.u32 2147483648, %v3689_v45  ;;  %v3910_v5 = vand.u32 2147483647, %v3689_v45  ;;  %vm3906_vm8 = vweird.f32 %v3689_v45 }
 0x5c9   : > { %3959 = vst [vmem:[%s6867_s13 + $0x60] sm:$0xff] %v3943_v0  ;;  %v3889_v31 = vmul.f32 %v4972_v56, %v3888_v19  ;;  %4977 = vpow2.f32 %v4747_v55 }
 0x5ca   : > { %v3913_v6 = vor.u32 1.1754944e-38, %v3912_v42  ;;  %vm3911_vm10 = vcmp.eq.f32.partialorder %v3910_v5, 8.507059e+37 }
 0x5cb   : > { %v3890_v16 = vadd.f32 %v4972_v56, %v3889_v31 }
 0x5cd   : > { %v3894_v46 = vsel %vm3893_vm5, %v4972_v56, %v3890_v16 }
 0x5ce   : > { %v4976_v4 = vpop.eup %4975  ;;  %v3899_v40 = vsel %vm3896_vm6, %v3898_v27, %v3894_v46 }
 0x5cf   : > { %v4978_v53 = vpop.eup %4977  ;;  %v3944_v24 = vmul.f32 %v3899_v40, %v6852_v21  ;;  %v3902_v63 = vmul.f32 %v4976_v4, %v3689_v45  ;;  %vm3907_vm7 = vweird.f32 %v4976_v4 }
 0x5d0   : > { %v3690_v8 = vadd.f32 1.0, %v4978_v53  ;;  %vm3908_vm9 = vmor %vm3906_vm8, %vm3907_vm7 }
 0x5d1   : > { %3960 = vst [vmem:[%s6867_s13 + $0x68] sm:$0xff] %v3944_v24  ;;  %v3903_v59 = vsub.f32 1.0, %v3902_v63 }
 0x5d2   : > { %4979 = vrcp.f32 %v3690_v8  ;;  %v3927_v14 = vand.u32 2147483648, %v3690_v8  ;;  %v3925_v36 = vand.u32 2147483647, %v3690_v8  ;;  %vm3921_vm12 = vweird.f32 %v3690_v8 }
 0x5d3   : > { %v3904_v44 = vmul.f32 %v4976_v4, %v3903_v59 }
 0x5d4   : > { %v3928_v12 = vor.u32 1.1754944e-38, %v3927_v14  ;;  %vm3926_vm14 = vcmp.eq.f32.partialorder %v3925_v36, 8.507059e+37 }
 0x5d5   : > { %v3905_v35 = vadd.f32 %v4976_v4, %v3904_v44 }
 0x5d7   : > { %v3909_v29 = vsel %vm3908_vm9, %v4976_v4, %v3905_v35 }
 0x5d8   : > { %v4980_v33 = vpop.eup %4979  ;;  %v3914_v60 = vsel %vm3911_vm10, %v3913_v6, %v3909_v29 }
 0x5d9   : > { %v3945_v21 = vmul.f32 %v3914_v60, %v6861_v51  ;;  %v3917_v57 = vmul.f32 %v4980_v33, %v3690_v8  ;;  %vm3922_vm11 = vweird.f32 %v4980_v33 }
 0x5da   : > { %vm3923_vm13 = vmor %vm3921_vm12, %vm3922_vm11 }
 0x5db   : > { %3961 = vst [vmem:[%s6867_s13 + $0x70] sm:$0xff] %v3945_v21  ;;  %v3918_v17 = vsub.f32 1.0, %v3917_v57 }
 0x5dd   : > { %v3919_v25 = vmul.f32 %v4980_v33, %v3918_v17 }
 0x5df   : > { %v3920_v52 = vadd.f32 %v4980_v33, %v3919_v25 }
 0x5e1   : > { %v3924_v26 = vsel %vm3923_vm13, %v4980_v33, %v3920_v52 }
 0x5e2   : > { %v3929_v47 = vsel %vm3926_vm14, %v3928_v12, %v3924_v26 }
 0x5e3   : > { %v3946_v48 = vmul.f32 %v3929_v47, %v6877_v18 }
 0x5e5   : > { %3962 = vst [vmem:[%s6867_s13 + $0x78] sm:$0xff] %v3946_v48 }
 0x5e6 PF: > { %s16_s23 = sadd.s32 1, %s5003_s23   ;;  %s7020_s21 = smov %s4999_s22 }
 0x5e7   : > { %p13_p5 = scmp.ge.s32.totalorder %s16_s23, 4   ;;  %s7021_s22 = smov %s7023_s24 }
 0x5e9   :  { %15 = sbr.rel (!%p13_p5) target bundleno = 2 (0x2), region = 81 }

</bundles_post_ra>
